<compile_context>
chip_gen: v5e
topology: v5e:2x2
jax: 0.10.0
libtpu: 0.0.40
codegen_flags: <defaults>
</compile_context>

<pallas_src>
import functools

import jax
import jax.numpy as jnp
from jax.experimental import pallas as pl
from jax.experimental.pallas import tpu as pltpu


# ----------------------------------------------------------------------------
# small helpers (padding / tile selection), trace-time glue
# ----------------------------------------------------------------------------
def _round_up(x, m):
    return ((x + m - 1) // m) * m


def _pick_tile(dim, candidates):
    for c in candidates:
        if c <= dim and dim % c == 0:
            return c
    return dim


# ----------------------------------------------------------------------------
# Host-side prep: space-to-depth / parity decomposition of the padded image.
# x_pad[2ho+ki, 2wo+kj] == parity(pi,pj)[ho+ai, wo+aj] with ki=2ai+pi, kj=2aj+pj,
# so every kernel-position operand is a CONTIGUOUS window of a parity image and
# no 49x im2col tensor is ever materialized in HBM.
# ----------------------------------------------------------------------------
def _build_parity_images(x_nchw, pad=3):
    x = jnp.transpose(x_nchw, (0, 2, 3, 1))                 # NCHW -> NHWC
    n, h, w, c = x.shape
    xp = jnp.pad(x, ((0, 0), (pad, pad), (pad, pad), (0, 0)))
    hp, wp = h + 2 * pad, w + 2 * pad
    ho = (hp - 7) // 2 + 1
    wo = (wp - 7) // 2 + 1
    hpar, wpar = ho + 3, wo + 3
    slabs = []
    for pi in range(2):
        for pj in range(2):
            s = xp[:, pi::2, pj::2, :]
            s = s[:, :hpar, :wpar, :]
            dh, dw = hpar - s.shape[1], wpar - s.shape[2]
            if dh or dw:                                     # never read rows
                s = jnp.pad(s, ((0, 0), (0, dh), (0, dw), (0, 0)))
            slabs.append(s)
    xpar = jnp.stack(slabs, axis=1)                          # (N,4,Hpar,Wpar,C)
    xpar = xpar.reshape(n * 4 * hpar, wpar, c).astype(jnp.bfloat16)
    return xpar, ho, wo, hpar, wpar


# ----------------------------------------------------------------------------
# Kernel 1: fused encoder
#   7x7/s2 conv (from parity slabs, 49 MXU accumulations) + folded BN1 + ReLU
#   + 1x1 conv to 256 + BN2 + ReLU + global-average-pool accumulation.
#   grid = (batch, output_row); pooled (1,256) accumulator lives in VMEM.
# ----------------------------------------------------------------------------
def _encoder_kernel(xpar_ref, w1_ref, s1_ref, b1_ref, w2_ref, s2_ref, b2_ref,
                    out_ref, acc_ref, *, cin, hpar, wo):
    h = pl.program_id(1)

    @pl.when(h == 0)
    def _():
        acc_ref[...] = jnp.zeros_like(acc_ref)

    # group the 49 kernel positions by (parity image, row offset) so each needed
    # parity row is loaded once; all offsets are static Python ints.
    groups = {}
    for ki in range(7):
        for kj in range(7):
            key = ((ki % 2) * 2 + (kj % 2), ki // 2)         # (pidx, ai)
            groups.setdefault(key, []).append((kj // 2, ki * 7 + kj))

    n_stem = w1_ref.shape[1]
    y1 = jnp.zeros((wo, n_stem), jnp.float32)
    for (pidx, ai), items in groups.items():
        row = xpar_ref[pidx * hpar + h + ai]                 # (Wpar, C) bf16
        for aj, widx in items:
            slab = row[aj:aj + wo, :]                        # (Wo, C) contiguous
            w = w1_ref[widx * cin:(widx + 1) * cin, :]       # (C, 64)
            y1 = y1 + jnp.dot(slab, w, preferred_element_type=jnp.float32)

    # folded BN1 + ReLU (f32 epilogue), then fused 1x1 conv + BN2 + ReLU
    y1 = jnp.maximum(y1 * s1_ref[...] + b1_ref[...], 0.0)
    y2 = jnp.dot(y1.astype(jnp.bfloat16), w2_ref[...],
                 preferred_element_type=jnp.float32)
    y2 = jnp.maximum(y2 * s2_ref[...] + b2_ref[...], 0.0)

    # global average pool accumulation over all (ho, wo)
    acc_ref[...] += jnp.sum(y2, axis=0, keepdims=True)

    @pl.when(h == pl.num_programs(1) - 1)
    def _():
        inv = 1.0 / (pl.num_programs(1) * wo)
        out_ref[0] = (acc_ref[...] * inv).astype(out_ref.dtype)


def deeplab_encoder(params, x_nchw):
    """Stand-in DeepLab encoder (see TODO at top). Returns pooled (N, 256) f32."""
    n, cin = x_nchw.shape[0], x_nchw.shape[1]
    xpar, ho, wo, hpar, wpar = _build_parity_images(x_nchw)

    stem_ch = params["conv1_w"].shape[1]                     # 64
    d_mlp = params["conv2_w"].shape[1]                       # 256

    w1 = params["conv1_w"].astype(jnp.bfloat16)              # (49*C, 64)
    s1 = params["bn1_scale"].reshape(1, stem_ch).astype(jnp.float32)
    b1 = params["bn1_bias"].reshape(1, stem_ch).astype(jnp.float32)
    w2 = params["conv2_w"].astype(jnp.bfloat16)              # (64, 256)
    s2 = params["bn2_scale"].reshape(1, d_mlp).astype(jnp.float32)
    b2 = params["bn2_bias"].reshape(1, d_mlp).astype(jnp.float32)

    # TODO(synk): for very large resolutions, row-tile the parity images with
    # manual make_async_copy instead of one whole-image VMEM block per batch.
    pooled = pl.pallas_call(
        functools.partial(_encoder_kernel, cin=cin, hpar=hpar, wo=wo),
        out_shape=jax.ShapeDtypeStruct((n, 1, d_mlp), jnp.float32),
        grid_spec=pltpu.PrefetchScalarGridSpec(
            num_scalar_prefetch=0,
            grid=(n, ho),
            in_specs=[
                pl.BlockSpec((4 * hpar, wpar, cin), lambda i, j: (i, 0, 0)),
                pl.BlockSpec((49 * cin, stem_ch), lambda i, j: (0, 0)),
                pl.BlockSpec((1, stem_ch), lambda i, j: (0, 0)),
                pl.BlockSpec((1, stem_ch), lambda i, j: (0, 0)),
                pl.BlockSpec((stem_ch, d_mlp), lambda i, j: (0, 0)),
                pl.BlockSpec((1, d_mlp), lambda i, j: (0, 0)),
                pl.BlockSpec((1, d_mlp), lambda i, j: (0, 0)),
            ],
            out_specs=pl.BlockSpec((1, 1, d_mlp), lambda i, j: (i, 0, 0)),
            scratch_shapes=[pltpu.VMEM((1, d_mlp), jnp.float32)],
        ),
        compiler_params=pltpu.CompilerParams(
            dimension_semantics=("parallel", "arbitrary"),
            vmem_limit_bytes=32 * 1024 * 1024,
        ),
    )(xpar, w1, s1, b1, w2, s2, b2)
    return pooled.reshape(n, d_mlp)


# ----------------------------------------------------------------------------
# Kernel 2: projection heads + L2 normalization + l_pos (single grid step)
# ----------------------------------------------------------------------------
def _proj_norm_kernel(qf_ref, kf_ref, qw1_ref, qb1_ref, qw2_ref, qb2_ref,
                      kw1_ref, kb1_ref, kw2_ref, kb2_ref,
                      qn_ref, kn_ref, lpos_ref, *, inv_t):
    def proj_norm(x, w1_ref, b1_ref, w2_ref, b2_ref):
        hid = jnp.dot(x, w1_ref[...], preferred_element_type=jnp.float32)
        hid = jnp.maximum(hid + b1_ref[...], 0.0)
        o = jnp.dot(hid.astype(jnp.bfloat16), w2_ref[...],
                    preferred_element_type=jnp.float32) + b2_ref[...]
        # F.normalize(dim=1): x / max(||x||, 1e-12); rsqrt runs on the EUP.
        inv = jax.lax.rsqrt(
            jnp.maximum(jnp.sum(o * o, axis=-1, keepdims=True), 1e-24))
        return o * inv

    qn = proj_norm(qf_ref[...], qw1_ref, qb1_ref, qw2_ref, qb2_ref)
    kn = proj_norm(kf_ref[...], kw1_ref, kb1_ref, kw2_ref, kb2_ref)
    qn_ref[...] = qn.astype(qn_ref.dtype)
    kn_ref[...] = kn.astype(kn_ref.dtype)
    lpos = jnp.sum(qn * kn, axis=-1, keepdims=True) * inv_t
    # lane-dense (n_p, 128) store; the wrapper slices column 0 (cheap).
    lpos_ref[...] = jnp.broadcast_to(lpos, lpos_ref.shape).astype(lpos_ref.dtype)


# ----------------------------------------------------------------------------
# Kernel 3: l_neg = (qn @ queue) / T, bf16 MXU, f32 acc, fully parallel 2-D grid
# ----------------------------------------------------------------------------
def _lneg_kernel(qn_ref, queue_ref, o_ref, *, inv_t):
    o_ref[...] = (jnp.dot(qn_ref[...], queue_ref[...],
                          preferred_element_type=jnp.float32) * inv_t
                  ).astype(o_ref.dtype)


def moco_head(q_feat, k_feat, q_params, k_params, queue, T, *, tkq_max=1024):
    n, d_in = q_feat.shape                                   # d_in = 256
    out_dim = q_params["fc2_w"].shape[1]
    kq = queue.shape[1]

    n_p = _round_up(n, 8)
    d_out_p = _round_up(out_dim, 16)                         # sublane pad only
    kq_p = _round_up(kq, 128)
    tkq = _pick_tile(kq_p, tuple(t for t in (2048, 1024, 512, 256, 128)
                                 if t <= tkq_max))

    def pad_rows(x, rows):
        return jnp.pad(x, ((0, rows - x.shape[0]), (0, 0)))

    qf = pad_rows(q_feat, n_p).astype(jnp.bfloat16)
    kf = pad_rows(k_feat, n_p).astype(jnp.bfloat16)

    def prep(head):
        w1 = head["fc1_w"].astype(jnp.bfloat16)
        b1 = head["fc1_b"].reshape(1, d_in).astype(jnp.float32)
        w2 = jnp.pad(head["fc2_w"],
                     ((0, 0), (0, d_out_p - out_dim))).astype(jnp.bfloat16)
        b2 = jnp.pad(head["fc2_b"].reshape(1, out_dim),
                     ((0, 0), (0, d_out_p - out_dim))).astype(jnp.float32)
        return w1, b1, w2, b2

    qw1, qb1, qw2, qb2 = prep(q_params)
    kw1, kb1, kw2, kb2 = prep(k_params)

    def full(shape):
        nd = len(shape)
        return pl.BlockSpec(shape, lambda i, _nd=nd: (0,) * _nd)

    qn, kn, lpos = pl.pallas_call(
        functools.partial(_proj_norm_kernel, inv_t=1.0 / T),
        out_shape=(
            jax.ShapeDtypeStruct((n_p, d_out_p), jnp.bfloat16),
            jax.ShapeDtypeStruct((n_p, d_out_p), jnp.float32),
            jax.ShapeDtypeStruct((n_p, 128), jnp.float32),
        ),
        grid_spec=pltpu.PrefetchScalarGridSpec(
            num_scalar_prefetch=0,
            grid=(1,),
            in_specs=[
                full((n_p, d_in)), full((n_p, d_in)),
                full((d_in, d_in)), full((1, d_in)),
                full((d_in, d_out_p)), full((1, d_out_p)),
                full((d_in, d_in)), full((1, d_in)),
                full((d_in, d_out_p)), full((1, d_out_p)),
            ],
            out_specs=[full((n_p, d_out_p)), full((n_p, d_out_p)),
                       full((n_p, 128))],
        ),
        compiler_params=pltpu.CompilerParams(
            dimension_semantics=("arbitrary",),
            vmem_limit_bytes=32 * 1024 * 1024,
        ),
    )(qf, kf, qw1, qb1, qw2, qb2, kw1, kb1, kw2, kb2)

    # queue padded only to 16 rows (sublane), bf16, tiled 'tkq' columns at a time
    queue_p = jnp.pad(queue, ((0, d_out_p - out_dim), (0, kq_p - kq))
                      ).astype(jnp.bfloat16)

    lneg = pl.pallas_call(
        functools.partial(_lneg_kernel, inv_t=1.0 / T),
        out_shape=jax.ShapeDtypeStruct((n_p, kq_p), jnp.float32),
        grid_spec=pltpu.PrefetchScalarGridSpec(
            num_scalar_prefetch=0,
            grid=(1, kq_p // tkq),        # (batch-row tiles, queue tiles)
            in_specs=[
                pl.BlockSpec((n_p, d_out_p), lambda i, j: (i, 0)),
                pl.BlockSpec((d_out_p, tkq), lambda i, j: (0, j)),
            ],
            out_specs=pl.BlockSpec((n_p, tkq), lambda i, j: (i, j)),
        ),
        compiler_params=pltpu.CompilerParams(
            dimension_semantics=("parallel", "parallel"),
            vmem_limit_bytes=32 * 1024 * 1024,
        ),
    )(qn, queue_p)

    logits = jnp.concatenate([lpos[:n, :1], lneg[:n, :kq]], axis=1)
    k_norm = kn[:n, :out_dim]
    return logits, k_norm


# ----------------------------------------------------------------------------
# MoCo forward
# ----------------------------------------------------------------------------
def moco_forward(q_params, k_params, im_q, im_k, queue, queue_ptr,
                 *, m=0.99, T=0.07):
    # TODO(synk): forward-only; no custom_vjp is defined for the pallas_calls.
    # --- query path ---
    q_feat = deeplab_encoder(q_params, im_q)

    # --- momentum update of key encoder + key head (glue) ---
    k_params = jax.tree_util.tree_map(
        lambda pk, pq: pk * m + pq * (1.0 - m), k_params, q_params)

    # --- key path (no grad) ---
    k_feat = jax.lax.stop_gradient(deeplab_encoder(k_params, im_k))

    # --- projection heads + L2 norm + contrastive logits ---
    logits, k = moco_head(q_feat, k_feat, q_params, k_params, queue, T)
    k = jax.lax.stop_gradient(k)

    labels = jnp.zeros((q_feat.shape[0],), dtype=jnp.int32)

    # --- dequeue and enqueue (buffer mutation, glue) ---
    # TODO(synk): like the PyTorch code (assert K % batch == 0) this does not
    #             wrap when queue_ptr + batch > K.
    batch = k.shape[0]
    kq = queue.shape[1]
    new_queue = jax.lax.dynamic_update_slice(queue, k.T, (0, queue_ptr))
    new_ptr = (queue_ptr + batch) % kq

    return logits, labels, new_queue, new_ptr, k_params


# ----------------------------------------------------------------------------
# Pure-JAX reference (mirrors the bf16-input / f32-accumulate numerics)
# ----------------------------------------------------------------------------
def reference_forward(q_params, k_params, im_q, im_k, queue, *, m, T):
    kp = jax.tree_util.tree_map(lambda a, b: a * m + b * (1.0 - m),
                                k_params, q_params)

    def im2col(x_nhwc, kh, kw, stride, pad):
        x = jnp.pad(x_nhwc, ((0, 0), (pad, pad), (pad, pad), (0, 0)))
        nb, hp, wp, c = x.shape
        ho = (hp - kh) // stride + 1
        wo = (wp - kw) // stride + 1
        cols = []
        for i in range(kh):
            for j in range(kw):
                cols.append(x[:, i: i + ho * stride: stride,
                              j: j + wo * stride: stride, :])
        patches = jnp.stack(cols, axis=-2)
        return patches.reshape(nb, ho, wo, kh * kw * c), ho, wo

    def enc(p, x):
        xh = jnp.transpose(x, (0, 2, 3, 1))
        patches, ho, wo = im2col(xh, 7, 7, 2, 3)
        a = patches.reshape(x.shape[0] * ho * wo, -1)
        y = jnp.dot(a.astype(jnp.bfloat16), p["conv1_w"].astype(jnp.bfloat16),
                    preferred_element_type=jnp.float32)
        y = jnp.maximum(y * p["bn1_scale"] + p["bn1_bias"], 0.0)
        y2 = jnp.dot(y.astype(jnp.bfloat16), p["conv2_w"].astype(jnp.bfloat16),
                     preferred_element_type=jnp.float32)
        y2 = jnp.maximum(y2 * p["bn2_scale"] + p["bn2_bias"], 0.0)
        feat = y2.reshape(x.shape[0], ho * wo, -1)
        return jnp.mean(feat, axis=1)

    def head(p, x):
        h = jnp.dot(x.astype(jnp.bfloat16), p["fc1_w"].astype(jnp.bfloat16),
                    preferred_element_type=jnp.float32) + p["fc1_b"]
        h = jnp.maximum(h, 0.0)
        o = jnp.dot(h.astype(jnp.bfloat16), p["fc2_w"].astype(jnp.bfloat16),
                    preferred_element_type=jnp.float32) + p["fc2_b"]
        return o / jnp.maximum(jnp.linalg.norm(o, axis=1, keepdims=True), 1e-12)

    q = head(q_params, enc(q_params, im_q))
    k = head(kp, enc(kp, im_k))
    l_pos = jnp.sum(q * k, axis=1, keepdims=True)
    l_neg = jnp.dot(q.astype(jnp.bfloat16), queue.astype(jnp.bfloat16),
                    preferred_element_type=jnp.float32)
    logits = jnp.concatenate([l_pos, l_neg], axis=1) / T
    return logits, k


# ----------------------------------------------------------------------------
# Deterministic parameter init (synthetic weights; shapes per module contract)
# ----------------------------------------------------------------------------
def init_params(key, in_channels, out_dim, dim_mlp=256, stem_ch=64):
    ks = jax.random.split(key, 4)
    return {
        "conv1_w": jax.random.normal(ks[0], (7 * 7 * in_channels, stem_ch),
                                     jnp.float32) * 0.05,
        "bn1_scale": jnp.ones((stem_ch,), jnp.float32),
        "bn1_bias": jnp.zeros((stem_ch,), jnp.float32),
        "conv2_w": jax.random.normal(ks[1], (stem_ch, dim_mlp),
                                     jnp.float32) * 0.05,
        "bn2_scale": jnp.ones((dim_mlp,), jnp.float32),
        "bn2_bias": jnp.zeros((dim_mlp,), jnp.float32),
        "fc1_w": jax.random.normal(ks[2], (dim_mlp, dim_mlp),
                                   jnp.float32) * 0.02,
        "fc1_b": jnp.zeros((dim_mlp,), jnp.float32),
        "fc2_w": jax.random.normal(ks[3], (dim_mlp, out_dim),
                                   jnp.float32) * 0.02,
        "fc2_b": jnp.zeros((out_dim,), jnp.float32),
    }


if __name__ == "__main__":
    key = jax.random.PRNGKey(0)
    k_imq, k_imk, k_par, k_queue = jax.random.split(key, 4)

    B, C, H, W = 2, 4, 16, 16     # small synthetic shapes
    OUT_DIM, KQ = 10, 32          # out_dim=10 (module default), queue size K=32
    M, T = 0.99, 0.07

    im_q = jax.random.normal(k_imq, (B, C, H, W), jnp.float32)
    im_k = jax.random.normal(k_imk, (B, C, H, W), jnp.float32)

    q_params = init_params(k_par, C, OUT_DIM)
    # encoder_k / proj1 initialized as exact copies of encoder_q / proj
    k_params = jax.tree_util.tree_map(lambda x: x + 0.0, q_params)

    # queue buffer: randn(out_dim, K) normalized along dim=0
    queue = jax.random.normal(k_queue, (OUT_DIM, KQ), jnp.float32)
    queue = queue / jnp.maximum(jnp.linalg.norm(queue, axis=0, keepdims=True),
                                1e-12)
    queue_ptr = jnp.array(0, jnp.int32)

    fwd = jax.jit(functools.partial(moco_forward, m=M, T=T))
    logits, labels, new_queue, new_ptr, _ = fwd(
        q_params, k_params, im_q, im_k, queue, queue_ptr)
    jax.block_until_ready((logits, labels, new_queue, new_ptr))

    assert logits.shape == (B, 1 + KQ)
    assert labels.shape == (B,)
    assert new_queue.shape == (OUT_DIM, KQ)

    # numerical sanity check against a pure-JAX reference
    ref_logits, ref_k = reference_forward(q_params, k_params, im_q, im_k,
                                          queue, m=M, T=T)
    assert bool(jnp.allclose(logits, ref_logits, atol=5e-2, rtol=5e-2)), (
        "logits mismatch vs reference")
    assert bool(jnp.allclose(new_queue[:, :B], ref_k.T, atol=5e-2, rtol=5e-2)), (
        "queue update mismatch vs reference")

    print("KERNEL_OK")
</pallas_src>

<mosaic_0001>
module attributes {stable_mosaic.version = 11 : i64} {
  func.func @_encoder_kernel(%arg0: i32, %arg1: i32, %arg2: memref<44x11x4xbf16, #tpu.memory_space<vmem>>, %arg3: memref<196x64xbf16, #tpu.memory_space<vmem>>, %arg4: memref<1x64xf32, #tpu.memory_space<vmem>>, %arg5: memref<1x64xf32, #tpu.memory_space<vmem>>, %arg6: memref<64x256xbf16, #tpu.memory_space<vmem>>, %arg7: memref<1x256xf32, #tpu.memory_space<vmem>>, %arg8: memref<1x256xf32, #tpu.memory_space<vmem>>, %arg9: memref<1x1x256xf32, #tpu.memory_space<vmem>>, %arg10: memref<1x256xf32, #tpu.memory_space<vmem>>) attributes {dimension_semantics = [#tpu.dimension_semantics<parallel>, #tpu.dimension_semantics<arbitrary>], iteration_bounds = array<i64: 2, 8>, scalar_prefetch = 0 : i64, scratch_operands = 1 : i64, tpu.core_type = #tpu.core_type<tc>, window_params = [{transform_indices = @transform_0, window_bounds = array<i64: 44, 11, 4>}, {pipeline_mode = #tpu.pipeline_mode<synchronous>, transform_indices = @transform_1, window_bounds = array<i64: 196, 64>}, {pipeline_mode = #tpu.pipeline_mode<synchronous>, transform_indices = @transform_2, window_bounds = array<i64: 1, 64>}, {pipeline_mode = #tpu.pipeline_mode<synchronous>, transform_indices = @transform_3, window_bounds = array<i64: 1, 64>}, {pipeline_mode = #tpu.pipeline_mode<synchronous>, transform_indices = @transform_4, window_bounds = array<i64: 64, 256>}, {pipeline_mode = #tpu.pipeline_mode<synchronous>, transform_indices = @transform_5, window_bounds = array<i64: 1, 256>}, {pipeline_mode = #tpu.pipeline_mode<synchronous>, transform_indices = @transform_6, window_bounds = array<i64: 1, 256>}, {transform_indices = @transform_7, window_bounds = array<i64: 1, 1, 256>}]} {
    %c0_i32 = arith.constant 0 : i32
    %0 = arith.cmpi eq, %arg1, %c0_i32 : i32
    %1 = arith.extui %0 : i1 to i32
    %c0_i32_0 = arith.constant 0 : i32
    %2 = arith.cmpi ne, %1, %c0_i32_0 : i32
    scf.if %2 {
      %cst_168 = arith.constant 0.000000e+00 : f32
      %297 = vector.broadcast %cst_168 : f32 to vector<1x256xf32>
      %c0_169 = arith.constant 0 : index
      %c0_170 = arith.constant 0 : index
      %298 = vector.load %arg10[%c0_169, %c0_170] : memref<1x256xf32, #tpu.memory_space<vmem>>, vector<1x256xf32>
      tpu.vector_store %arg10[%c0_169, %c0_170], %297 {strides = array<i32>} : memref<1x256xf32, #tpu.memory_space<vmem>>, vector<1x256xf32>,
    } else {
    }
    %cst = arith.constant 0.000000e+00 : f32
    %3 = vector.broadcast %cst : f32 to vector<8x64xf32>
    %c0_i32_1 = arith.constant 0 : i32
    %4 = arith.addi %c0_i32_1, %arg1 : i32
    %c0_i32_2 = arith.constant 0 : i32
    %5 = arith.addi %4, %c0_i32_2 : i32
    %6 = arith.index_cast %5 : i32 to index
    %c0 = arith.constant 0 : index
    %c0_3 = arith.constant 0 : index
    %7 = vector.load %arg2[%6, %c0, %c0_3] : memref<44x11x4xbf16, #tpu.memory_space<vmem>>, vector<1x11x4xbf16>
    %8 = vector.shape_cast %7 : vector<1x11x4xbf16> to vector<11x4xbf16>
    %9 = vector.extract_strided_slice %8 {offsets = [0, 0], sizes = [8, 4], strides = [1, 1]} : vector<11x4xbf16> to vector<8x4xbf16>
    %c0_4 = arith.constant 0 : index
    %c0_5 = arith.constant 0 : index
    %10 = vector.load %arg3[%c0_4, %c0_5] : memref<196x64xbf16, #tpu.memory_space<vmem>>, vector<4x64xbf16>
    %cst_6 = arith.constant dense<0.000000e+00> : vector<8x64xf32>
    %11 = tpu.matmul %9, %10, %cst_6 {dimension_numbers = #tpu.dot_dimension_numbers<[1], [0], [0], [1], [0, 0, 1, 1], [], []>} : vector<8x4xbf16>, vector<4x64xbf16>, vector<8x64xf32> -> vector<8x64xf32>
    %12 = arith.addf %3, %11 : vector<8x64xf32>
    %13 = vector.extract_strided_slice %8 {offsets = [1, 0], sizes = [8, 4], strides = [1, 1]} : vector<11x4xbf16> to vector<8x4xbf16>
    %c8 = arith.constant 8 : index
    %c0_7 = arith.constant 0 : index
    %14 = vector.load %arg3[%c8, %c0_7] : memref<196x64xbf16, #tpu.memory_space<vmem>>, vector<4x64xbf16>
    %cst_8 = arith.constant dense<0.000000e+00> : vector<8x64xf32>
    %15 = tpu.matmul %13, %14, %cst_8 {dimension_numbers = #tpu.dot_dimension_numbers<[1], [0], [0], [1], [0, 0, 1, 1], [], []>} : vector<8x4xbf16>, vector<4x64xbf16>, vector<8x64xf32> -> vector<8x64xf32>
    %16 = arith.addf %12, %15 : vector<8x64xf32>
    %17 = vector.extract_strided_slice %8 {offsets = [2, 0], sizes = [8, 4], strides = [1, 1]} : vector<11x4xbf16> to vector<8x4xbf16>
    %c16 = arith.constant 16 : index
    %c0_9 = arith.constant 0 : index
    %18 = vector.load %arg3[%c16, %c0_9] : memref<196x64xbf16, #tpu.memory_space<vmem>>, vector<4x64xbf16>
    %cst_10 = arith.constant dense<0.000000e+00> : vector<8x64xf32>
    %19 = tpu.matmul %17, %18, %cst_10 {dimension_numbers = #tpu.dot_dimension_numbers<[1], [0], [0], [1], [0, 0, 1, 1], [], []>} : vector<8x4xbf16>, vector<4x64xbf16>, vector<8x64xf32> -> vector<8x64xf32>
    %20 = arith.addf %16, %19 : vector<8x64xf32>
    %21 = vector.extract_strided_slice %8 {offsets = [3, 0], sizes = [8, 4], strides = [1, 1]} : vector<11x4xbf16> to vector<8x4xbf16>
    %c24 = arith.constant 24 : index
    %c0_11 = arith.constant 0 : index
    %22 = vector.load %arg3[%c24, %c0_11] : memref<196x64xbf16, #tpu.memory_space<vmem>>, vector<4x64xbf16>
    %cst_12 = arith.constant dense<0.000000e+00> : vector<8x64xf32>
    %23 = tpu.matmul %21, %22, %cst_12 {dimension_numbers = #tpu.dot_dimension_numbers<[1], [0], [0], [1], [0, 0, 1, 1], [], []>} : vector<8x4xbf16>, vector<4x64xbf16>, vector<8x64xf32> -> vector<8x64xf32>
    %24 = arith.addf %20, %23 : vector<8x64xf32>
    %c11_i32 = arith.constant 11 : i32
    %25 = arith.addi %c11_i32, %arg1 : i32
    %c0_i32_13 = arith.constant 0 : i32
    %26 = arith.addi %25, %c0_i32_13 : i32
    %27 = arith.index_cast %26 : i32 to index
    %c0_14 = arith.constant 0 : index
    %c0_15 = arith.constant 0 : index
    %28 = vector.load %arg2[%27, %c0_14, %c0_15] : memref<44x11x4xbf16, #tpu.memory_space<vmem>>, vector<1x11x4xbf16>
    %29 = vector.shape_cast %28 : vector<1x11x4xbf16> to vector<11x4xbf16>
    %30 = vector.extract_strided_slice %29 {offsets = [0, 0], sizes = [8, 4], strides = [1, 1]} : vector<11x4xbf16> to vector<8x4xbf16>
    %c4 = arith.constant 4 : index
    %c0_16 = arith.constant 0 : index
    %31 = vector.load %arg3[%c4, %c0_16] : memref<196x64xbf16, #tpu.memory_space<vmem>>, vector<4x64xbf16>
    %cst_17 = arith.constant dense<0.000000e+00> : vector<8x64xf32>
    %32 = tpu.matmul %30, %31, %cst_17 {dimension_numbers = #tpu.dot_dimension_numbers<[1], [0], [0], [1], [0, 0, 1, 1], [], []>} : vector<8x4xbf16>, vector<4x64xbf16>, vector<8x64xf32> -> vector<8x64xf32>
    %33 = arith.addf %24, %32 : vector<8x64xf32>
    %34 = vector.extract_strided_slice %29 {offsets = [1, 0], sizes = [8, 4], strides = [1, 1]} : vector<11x4xbf16> to vector<8x4xbf16>
    %c12 = arith.constant 12 : index
    %c0_18 = arith.constant 0 : index
    %35 = vector.load %arg3[%c12, %c0_18] : memref<196x64xbf16, #tpu.memory_space<vmem>>, vector<4x64xbf16>
    %cst_19 = arith.constant dense<0.000000e+00> : vector<8x64xf32>
    %36 = tpu.matmul %34, %35, %cst_19 {dimension_numbers = #tpu.dot_dimension_numbers<[1], [0], [0], [1], [0, 0, 1, 1], [], []>} : vector<8x4xbf16>, vector<4x64xbf16>, vector<8x64xf32> -> vector<8x64xf32>
    %37 = arith.addf %33, %36 : vector<8x64xf32>
    %38 = vector.extract_strided_slice %29 {offsets = [2, 0], sizes = [8, 4], strides = [1, 1]} : vector<11x4xbf16> to vector<8x4xbf16>
    %c20 = arith.constant 20 : index
    %c0_20 = arith.constant 0 : index
    %39 = vector.load %arg3[%c20, %c0_20] : memref<196x64xbf16, #tpu.memory_space<vmem>>, vector<4x64xbf16>
    %cst_21 = arith.constant dense<0.000000e+00> : vector<8x64xf32>
    %40 = tpu.matmul %38, %39, %cst_21 {dimension_numbers = #tpu.dot_dimension_numbers<[1], [0], [0], [1], [0, 0, 1, 1], [], []>} : vector<8x4xbf16>, vector<4x64xbf16>, vector<8x64xf32> -> vector<8x64xf32>
    %41 = arith.addf %37, %40 : vector<8x64xf32>
    %c22_i32 = arith.constant 22 : i32
    %42 = arith.addi %c22_i32, %arg1 : i32
    %c0_i32_22 = arith.constant 0 : i32
    %43 = arith.addi %42, %c0_i32_22 : i32
    %44 = arith.index_cast %43 : i32 to index
    %c0_23 = arith.constant 0 : index
    %c0_24 = arith.constant 0 : index
    %45 = vector.load %arg2[%44, %c0_23, %c0_24] : memref<44x11x4xbf16, #tpu.memory_space<vmem>>, vector<1x11x4xbf16>
    %46 = vector.shape_cast %45 : vector<1x11x4xbf16> to vector<11x4xbf16>
    %47 = vector.extract_strided_slice %46 {offsets = [0, 0], sizes = [8, 4], strides = [1, 1]} : vector<11x4xbf16> to vector<8x4xbf16>
    %c28 = arith.constant 28 : index
    %c0_25 = arith.constant 0 : index
    %48 = vector.load %arg3[%c28, %c0_25] : memref<196x64xbf16, #tpu.memory_space<vmem>>, vector<4x64xbf16>
    %cst_26 = arith.constant dense<0.000000e+00> : vector<8x64xf32>
    %49 = tpu.matmul %47, %48, %cst_26 {dimension_numbers = #tpu.dot_dimension_numbers<[1], [0], [0], [1], [0, 0, 1, 1], [], []>} : vector<8x4xbf16>, vector<4x64xbf16>, vector<8x64xf32> -> vector<8x64xf32>
    %50 = arith.addf %41, %49 : vector<8x64xf32>
    %51 = vector.extract_strided_slice %46 {offsets = [1, 0], sizes = [8, 4], strides = [1, 1]} : vector<11x4xbf16> to vector<8x4xbf16>
    %c36 = arith.constant 36 : index
    %c0_27 = arith.constant 0 : index
    %52 = vector.load %arg3[%c36, %c0_27] : memref<196x64xbf16, #tpu.memory_space<vmem>>, vector<4x64xbf16>
    %cst_28 = arith.constant dense<0.000000e+00> : vector<8x64xf32>
    %53 = tpu.matmul %51, %52, %cst_28 {dimension_numbers = #tpu.dot_dimension_numbers<[1], [0], [0], [1], [0, 0, 1, 1], [], []>} : vector<8x4xbf16>, vector<4x64xbf16>, vector<8x64xf32> -> vector<8x64xf32>
    %54 = arith.addf %50, %53 : vector<8x64xf32>
    %55 = vector.extract_strided_slice %46 {offsets = [2, 0], sizes = [8, 4], strides = [1, 1]} : vector<11x4xbf16> to vector<8x4xbf16>
    %c44 = arith.constant 44 : index
    %c0_29 = arith.constant 0 : index
    %56 = vector.load %arg3[%c44, %c0_29] : memref<196x64xbf16, #tpu.memory_space<vmem>>, vector<4x64xbf16>
    %cst_30 = arith.constant dense<0.000000e+00> : vector<8x64xf32>
    %57 = tpu.matmul %55, %56, %cst_30 {dimension_numbers = #tpu.dot_dimension_numbers<[1], [0], [0], [1], [0, 0, 1, 1], [], []>} : vector<8x4xbf16>, vector<4x64xbf16>, vector<8x64xf32> -> vector<8x64xf32>
    %58 = arith.addf %54, %57 : vector<8x64xf32>
    %59 = vector.extract_strided_slice %46 {offsets = [3, 0], sizes = [8, 4], strides = [1, 1]} : vector<11x4xbf16> to vector<8x4xbf16>
    %c52 = arith.constant 52 : index
    %c0_31 = arith.constant 0 : index
    %60 = vector.load %arg3[%c52, %c0_31] : memref<196x64xbf16, #tpu.memory_space<vmem>>, vector<4x64xbf16>
    %cst_32 = arith.constant dense<0.000000e+00> : vector<8x64xf32>
    %61 = tpu.matmul %59, %60, %cst_32 {dimension_numbers = #tpu.dot_dimension_numbers<[1], [0], [0], [1], [0, 0, 1, 1], [], []>} : vector<8x4xbf16>, vector<4x64xbf16>, vector<8x64xf32> -> vector<8x64xf32>
    %62 = arith.addf %58, %61 : vector<8x64xf32>
    %c33_i32 = arith.constant 33 : i32
    %63 = arith.addi %c33_i32, %arg1 : i32
    %c0_i32_33 = arith.constant 0 : i32
    %64 = arith.addi %63, %c0_i32_33 : i32
    %65 = arith.index_cast %64 : i32 to index
    %c0_34 = arith.constant 0 : index
    %c0_35 = arith.constant 0 : index
    %66 = vector.load %arg2[%65, %c0_34, %c0_35] : memref<44x11x4xbf16, #tpu.memory_space<vmem>>, vector<1x11x4xbf16>
    %67 = vector.shape_cast %66 : vector<1x11x4xbf16> to vector<11x4xbf16>
    %68 = vector.extract_strided_slice %67 {offsets = [0, 0], sizes = [8, 4], strides = [1, 1]} : vector<11x4xbf16> to vector<8x4xbf16>
    %c32 = arith.constant 32 : index
    %c0_36 = arith.constant 0 : index
    %69 = vector.load %arg3[%c32, %c0_36] : memref<196x64xbf16, #tpu.memory_space<vmem>>, vector<4x64xbf16>
    %cst_37 = arith.constant dense<0.000000e+00> : vector<8x64xf32>
    %70 = tpu.matmul %68, %69, %cst_37 {dimension_numbers = #tpu.dot_dimension_numbers<[1], [0], [0], [1], [0, 0, 1, 1], [], []>} : vector<8x4xbf16>, vector<4x64xbf16>, vector<8x64xf32> -> vector<8x64xf32>
    %71 = arith.addf %62, %70 : vector<8x64xf32>
    %72 = vector.extract_strided_slice %67 {offsets = [1, 0], sizes = [8, 4], strides = [1, 1]} : vector<11x4xbf16> to vector<8x4xbf16>
    %c40 = arith.constant 40 : index
    %c0_38 = arith.constant 0 : index
    %73 = vector.load %arg3[%c40, %c0_38] : memref<196x64xbf16, #tpu.memory_space<vmem>>, vector<4x64xbf16>
    %cst_39 = arith.constant dense<0.000000e+00> : vector<8x64xf32>
    %74 = tpu.matmul %72, %73, %cst_39 {dimension_numbers = #tpu.dot_dimension_numbers<[1], [0], [0], [1], [0, 0, 1, 1], [], []>} : vector<8x4xbf16>, vector<4x64xbf16>, vector<8x64xf32> -> vector<8x64xf32>
    %75 = arith.addf %71, %74 : vector<8x64xf32>
    %76 = vector.extract_strided_slice %67 {offsets = [2, 0], sizes = [8, 4], strides = [1, 1]} : vector<11x4xbf16> to vector<8x4xbf16>
    %c48 = arith.constant 48 : index
    %c0_40 = arith.constant 0 : index
    %77 = vector.load %arg3[%c48, %c0_40] : memref<196x64xbf16, #tpu.memory_space<vmem>>, vector<4x64xbf16>
    %cst_41 = arith.constant dense<0.000000e+00> : vector<8x64xf32>
    %78 = tpu.matmul %76, %77, %cst_41 {dimension_numbers = #tpu.dot_dimension_numbers<[1], [0], [0], [1], [0, 0, 1, 1], [], []>} : vector<8x4xbf16>, vector<4x64xbf16>, vector<8x64xf32> -> vector<8x64xf32>
    %79 = arith.addf %75, %78 : vector<8x64xf32>
    %c0_i32_42 = arith.constant 0 : i32
    %80 = arith.addi %c0_i32_42, %arg1 : i32
    %c1_i32 = arith.constant 1 : i32
    %81 = arith.addi %80, %c1_i32 : i32
    %82 = arith.index_cast %81 : i32 to index
    %c0_43 = arith.constant 0 : index
    %c0_44 = arith.constant 0 : index
    %83 = vector.load %arg2[%82, %c0_43, %c0_44] : memref<44x11x4xbf16, #tpu.memory_space<vmem>>, vector<1x11x4xbf16>
    %84 = vector.shape_cast %83 : vector<1x11x4xbf16> to vector<11x4xbf16>
    %85 = vector.extract_strided_slice %84 {offsets = [0, 0], sizes = [8, 4], strides = [1, 1]} : vector<11x4xbf16> to vector<8x4xbf16>
    %c56 = arith.constant 56 : index
    %c0_45 = arith.constant 0 : index
    %86 = vector.load %arg3[%c56, %c0_45] : memref<196x64xbf16, #tpu.memory_space<vmem>>, vector<4x64xbf16>
    %cst_46 = arith.constant dense<0.000000e+00> : vector<8x64xf32>
    %87 = tpu.matmul %85, %86, %cst_46 {dimension_numbers = #tpu.dot_dimension_numbers<[1], [0], [0], [1], [0, 0, 1, 1], [], []>} : vector<8x4xbf16>, vector<4x64xbf16>, vector<8x64xf32> -> vector<8x64xf32>
    %88 = arith.addf %79, %87 : vector<8x64xf32>
    %89 = vector.extract_strided_slice %84 {offsets = [1, 0], sizes = [8, 4], strides = [1, 1]} : vector<11x4xbf16> to vector<8x4xbf16>
    %c64 = arith.constant 64 : index
    %c0_47 = arith.constant 0 : index
    %90 = vector.load %arg3[%c64, %c0_47] : memref<196x64xbf16, #tpu.memory_space<vmem>>, vector<4x64xbf16>
    %cst_48 = arith.constant dense<0.000000e+00> : vector<8x64xf32>
    %91 = tpu.matmul %89, %90, %cst_48 {dimension_numbers = #tpu.dot_dimension_numbers<[1], [0], [0], [1], [0, 0, 1, 1], [], []>} : vector<8x4xbf16>, vector<4x64xbf16>, vector<8x64xf32> -> vector<8x64xf32>
    %92 = arith.addf %88, %91 : vector<8x64xf32>
    %93 = vector.extract_strided_slice %84 {offsets = [2, 0], sizes = [8, 4], strides = [1, 1]} : vector<11x4xbf16> to vector<8x4xbf16>
    %c72 = arith.constant 72 : index
    %c0_49 = arith.constant 0 : index
    %94 = vector.load %arg3[%c72, %c0_49] : memref<196x64xbf16, #tpu.memory_space<vmem>>, vector<4x64xbf16>
    %cst_50 = arith.constant dense<0.000000e+00> : vector<8x64xf32>
    %95 = tpu.matmul %93, %94, %cst_50 {dimension_numbers = #tpu.dot_dimension_numbers<[1], [0], [0], [1], [0, 0, 1, 1], [], []>} : vector<8x4xbf16>, vector<4x64xbf16>, vector<8x64xf32> -> vector<8x64xf32>
    %96 = arith.addf %92, %95 : vector<8x64xf32>
    %97 = vector.extract_strided_slice %84 {offsets = [3, 0], sizes = [8, 4], strides = [1, 1]} : vector<11x4xbf16> to vector<8x4xbf16>
    %c80 = arith.constant 80 : index
    %c0_51 = arith.constant 0 : index
    %98 = vector.load %arg3[%c80, %c0_51] : memref<196x64xbf16, #tpu.memory_space<vmem>>, vector<4x64xbf16>
    %cst_52 = arith.constant dense<0.000000e+00> : vector<8x64xf32>
    %99 = tpu.matmul %97, %98, %cst_52 {dimension_numbers = #tpu.dot_dimension_numbers<[1], [0], [0], [1], [0, 0, 1, 1], [], []>} : vector<8x4xbf16>, vector<4x64xbf16>, vector<8x64xf32> -> vector<8x64xf32>
    %100 = arith.addf %96, %99 : vector<8x64xf32>
    %c11_i32_53 = arith.constant 11 : i32
    %101 = arith.addi %c11_i32_53, %arg1 : i32
    %c1_i32_54 = arith.constant 1 : i32
    %102 = arith.addi %101, %c1_i32_54 : i32
    %103 = arith.index_cast %102 : i32 to index
    %c0_55 = arith.constant 0 : index
    %c0_56 = arith.constant 0 : index
    %104 = vector.load %arg2[%103, %c0_55, %c0_56] : memref<44x11x4xbf16, #tpu.memory_space<vmem>>, vector<1x11x4xbf16>
    %105 = vector.shape_cast %104 : vector<1x11x4xbf16> to vector<11x4xbf16>
    %106 = vector.extract_strided_slice %105 {offsets = [0, 0], sizes = [8, 4], strides = [1, 1]} : vector<11x4xbf16> to vector<8x4xbf16>
    %c60 = arith.constant 60 : index
    %c0_57 = arith.constant 0 : index
    %107 = vector.load %arg3[%c60, %c0_57] : memref<196x64xbf16, #tpu.memory_space<vmem>>, vector<4x64xbf16>
    %cst_58 = arith.constant dense<0.000000e+00> : vector<8x64xf32>
    %108 = tpu.matmul %106, %107, %cst_58 {dimension_numbers = #tpu.dot_dimension_numbers<[1], [0], [0], [1], [0, 0, 1, 1], [], []>} : vector<8x4xbf16>, vector<4x64xbf16>, vector<8x64xf32> -> vector<8x64xf32>
    %109 = arith.addf %100, %108 : vector<8x64xf32>
    %110 = vector.extract_strided_slice %105 {offsets = [1, 0], sizes = [8, 4], strides = [1, 1]} : vector<11x4xbf16> to vector<8x4xbf16>
    %c68 = arith.constant 68 : index
    %c0_59 = arith.constant 0 : index
    %111 = vector.load %arg3[%c68, %c0_59] : memref<196x64xbf16, #tpu.memory_space<vmem>>, vector<4x64xbf16>
    %cst_60 = arith.constant dense<0.000000e+00> : vector<8x64xf32>
    %112 = tpu.matmul %110, %111, %cst_60 {dimension_numbers = #tpu.dot_dimension_numbers<[1], [0], [0], [1], [0, 0, 1, 1], [], []>} : vector<8x4xbf16>, vector<4x64xbf16>, vector<8x64xf32> -> vector<8x64xf32>
    %113 = arith.addf %109, %112 : vector<8x64xf32>
    %114 = vector.extract_strided_slice %105 {offsets = [2, 0], sizes = [8, 4], strides = [1, 1]} : vector<11x4xbf16> to vector<8x4xbf16>
    %c76 = arith.constant 76 : index
    %c0_61 = arith.constant 0 : index
    %115 = vector.load %arg3[%c76, %c0_61] : memref<196x64xbf16, #tpu.memory_space<vmem>>, vector<4x64xbf16>
    %cst_62 = arith.constant dense<0.000000e+00> : vector<8x64xf32>
    %116 = tpu.matmul %114, %115, %cst_62 {dimension_numbers = #tpu.dot_dimension_numbers<[1], [0], [0], [1], [0, 0, 1, 1], [], []>} : vector<8x4xbf16>, vector<4x64xbf16>, vector<8x64xf32> -> vector<8x64xf32>
    %117 = arith.addf %113, %116 : vector<8x64xf32>
    %c22_i32_63 = arith.constant 22 : i32
    %118 = arith.addi %c22_i32_63, %arg1 : i32
    %c1_i32_64 = arith.constant 1 : i32
    %119 = arith.addi %118, %c1_i32_64 : i32
    %120 = arith.index_cast %119 : i32 to index
    %c0_65 = arith.constant 0 : index
    %c0_66 = arith.constant 0 : index
    %121 = vector.load %arg2[%120, %c0_65, %c0_66] : memref<44x11x4xbf16, #tpu.memory_space<vmem>>, vector<1x11x4xbf16>
    %122 = vector.shape_cast %121 : vector<1x11x4xbf16> to vector<11x4xbf16>
    %123 = vector.extract_strided_slice %122 {offsets = [0, 0], sizes = [8, 4], strides = [1, 1]} : vector<11x4xbf16> to vector<8x4xbf16>
    %c84 = arith.constant 84 : index
    %c0_67 = arith.constant 0 : index
    %124 = vector.load %arg3[%c84, %c0_67] : memref<196x64xbf16, #tpu.memory_space<vmem>>, vector<4x64xbf16>
    %cst_68 = arith.constant dense<0.000000e+00> : vector<8x64xf32>
    %125 = tpu.matmul %123, %124, %cst_68 {dimension_numbers = #tpu.dot_dimension_numbers<[1], [0], [0], [1], [0, 0, 1, 1], [], []>} : vector<8x4xbf16>, vector<4x64xbf16>, vector<8x64xf32> -> vector<8x64xf32>
    %126 = arith.addf %117, %125 : vector<8x64xf32>
    %127 = vector.extract_strided_slice %122 {offsets = [1, 0], sizes = [8, 4], strides = [1, 1]} : vector<11x4xbf16> to vector<8x4xbf16>
    %c92 = arith.constant 92 : index
    %c0_69 = arith.constant 0 : index
    %128 = vector.load %arg3[%c92, %c0_69] : memref<196x64xbf16, #tpu.memory_space<vmem>>, vector<4x64xbf16>
    %cst_70 = arith.constant dense<0.000000e+00> : vector<8x64xf32>
    %129 = tpu.matmul %127, %128, %cst_70 {dimension_numbers = #tpu.dot_dimension_numbers<[1], [0], [0], [1], [0, 0, 1, 1], [], []>} : vector<8x4xbf16>, vector<4x64xbf16>, vector<8x64xf32> -> vector<8x64xf32>
    %130 = arith.addf %126, %129 : vector<8x64xf32>
    %131 = vector.extract_strided_slice %122 {offsets = [2, 0], sizes = [8, 4], strides = [1, 1]} : vector<11x4xbf16> to vector<8x4xbf16>
    %c100 = arith.constant 100 : index
    %c0_71 = arith.constant 0 : index
    %132 = vector.load %arg3[%c100, %c0_71] : memref<196x64xbf16, #tpu.memory_space<vmem>>, vector<4x64xbf16>
    %cst_72 = arith.constant dense<0.000000e+00> : vector<8x64xf32>
    %133 = tpu.matmul %131, %132, %cst_72 {dimension_numbers = #tpu.dot_dimension_numbers<[1], [0], [0], [1], [0, 0, 1, 1], [], []>} : vector<8x4xbf16>, vector<4x64xbf16>, vector<8x64xf32> -> vector<8x64xf32>
    %134 = arith.addf %130, %133 : vector<8x64xf32>
    %135 = vector.extract_strided_slice %122 {offsets = [3, 0], sizes = [8, 4], strides = [1, 1]} : vector<11x4xbf16> to vector<8x4xbf16>
    %c108 = arith.constant 108 : index
    %c0_73 = arith.constant 0 : index
    %136 = vector.load %arg3[%c108, %c0_73] : memref<196x64xbf16, #tpu.memory_space<vmem>>, vector<4x64xbf16>
    %cst_74 = arith.constant dense<0.000000e+00> : vector<8x64xf32>
    %137 = tpu.matmul %135, %136, %cst_74 {dimension_numbers = #tpu.dot_dimension_numbers<[1], [0], [0], [1], [0, 0, 1, 1], [], []>} : vector<8x4xbf16>, vector<4x64xbf16>, vector<8x64xf32> -> vector<8x64xf32>
    %138 = arith.addf %134, %137 : vector<8x64xf32>
    %c33_i32_75 = arith.constant 33 : i32
    %139 = arith.addi %c33_i32_75, %arg1 : i32
    %c1_i32_76 = arith.constant 1 : i32
    %140 = arith.addi %139, %c1_i32_76 : i32
    %141 = arith.index_cast %140 : i32 to index
    %c0_77 = arith.constant 0 : index
    %c0_78 = arith.constant 0 : index
    %142 = vector.load %arg2[%141, %c0_77, %c0_78] : memref<44x11x4xbf16, #tpu.memory_space<vmem>>, vector<1x11x4xbf16>
    %143 = vector.shape_cast %142 : vector<1x11x4xbf16> to vector<11x4xbf16>
    %144 = vector.extract_strided_slice %143 {offsets = [0, 0], sizes = [8, 4], strides = [1, 1]} : vector<11x4xbf16> to vector<8x4xbf16>
    %c88 = arith.constant 88 : index
    %c0_79 = arith.constant 0 : index
    %145 = vector.load %arg3[%c88, %c0_79] : memref<196x64xbf16, #tpu.memory_space<vmem>>, vector<4x64xbf16>
    %cst_80 = arith.constant dense<0.000000e+00> : vector<8x64xf32>
    %146 = tpu.matmul %144, %145, %cst_80 {dimension_numbers = #tpu.dot_dimension_numbers<[1], [0], [0], [1], [0, 0, 1, 1], [], []>} : vector<8x4xbf16>, vector<4x64xbf16>, vector<8x64xf32> -> vector<8x64xf32>
    %147 = arith.addf %138, %146 : vector<8x64xf32>
    %148 = vector.extract_strided_slice %143 {offsets = [1, 0], sizes = [8, 4], strides = [1, 1]} : vector<11x4xbf16> to vector<8x4xbf16>
    %c96 = arith.constant 96 : index
    %c0_81 = arith.constant 0 : index
    %149 = vector.load %arg3[%c96, %c0_81] : memref<196x64xbf16, #tpu.memory_space<vmem>>, vector<4x64xbf16>
    %cst_82 = arith.constant dense<0.000000e+00> : vector<8x64xf32>
    %150 = tpu.matmul %148, %149, %cst_82 {dimension_numbers = #tpu.dot_dimension_numbers<[1], [0], [0], [1], [0, 0, 1, 1], [], []>} : vector<8x4xbf16>, vector<4x64xbf16>, vector<8x64xf32> -> vector<8x64xf32>
    %151 = arith.addf %147, %150 : vector<8x64xf32>
    %152 = vector.extract_strided_slice %143 {offsets = [2, 0], sizes = [8, 4], strides = [1, 1]} : vector<11x4xbf16> to vector<8x4xbf16>
    %c104 = arith.constant 104 : index
    %c0_83 = arith.constant 0 : index
    %153 = vector.load %arg3[%c104, %c0_83] : memref<196x64xbf16, #tpu.memory_space<vmem>>, vector<4x64xbf16>
    %cst_84 = arith.constant dense<0.000000e+00> : vector<8x64xf32>
    %154 = tpu.matmul %152, %153, %cst_84 {dimension_numbers = #tpu.dot_dimension_numbers<[1], [0], [0], [1], [0, 0, 1, 1], [], []>} : vector<8x4xbf16>, vector<4x64xbf16>, vector<8x64xf32> -> vector<8x64xf32>
    %155 = arith.addf %151, %154 : vector<8x64xf32>
    %c0_i32_85 = arith.constant 0 : i32
    %156 = arith.addi %c0_i32_85, %arg1 : i32
    %c2_i32 = arith.constant 2 : i32
    %157 = arith.addi %156, %c2_i32 : i32
    %158 = arith.index_cast %157 : i32 to index
    %c0_86 = arith.constant 0 : index
    %c0_87 = arith.constant 0 : index
    %159 = vector.load %arg2[%158, %c0_86, %c0_87] : memref<44x11x4xbf16, #tpu.memory_space<vmem>>, vector<1x11x4xbf16>
    %160 = vector.shape_cast %159 : vector<1x11x4xbf16> to vector<11x4xbf16>
    %161 = vector.extract_strided_slice %160 {offsets = [0, 0], sizes = [8, 4], strides = [1, 1]} : vector<11x4xbf16> to vector<8x4xbf16>
    %c112 = arith.constant 112 : index
    %c0_88 = arith.constant 0 : index
    %162 = vector.load %arg3[%c112, %c0_88] : memref<196x64xbf16, #tpu.memory_space<vmem>>, vector<4x64xbf16>
    %cst_89 = arith.constant dense<0.000000e+00> : vector<8x64xf32>
    %163 = tpu.matmul %161, %162, %cst_89 {dimension_numbers = #tpu.dot_dimension_numbers<[1], [0], [0], [1], [0, 0, 1, 1], [], []>} : vector<8x4xbf16>, vector<4x64xbf16>, vector<8x64xf32> -> vector<8x64xf32>
    %164 = arith.addf %155, %163 : vector<8x64xf32>
    %165 = vector.extract_strided_slice %160 {offsets = [1, 0], sizes = [8, 4], strides = [1, 1]} : vector<11x4xbf16> to vector<8x4xbf16>
    %c120 = arith.constant 120 : index
    %c0_90 = arith.constant 0 : index
    %166 = vector.load %arg3[%c120, %c0_90] : memref<196x64xbf16, #tpu.memory_space<vmem>>, vector<4x64xbf16>
    %cst_91 = arith.constant dense<0.000000e+00> : vector<8x64xf32>
    %167 = tpu.matmul %165, %166, %cst_91 {dimension_numbers = #tpu.dot_dimension_numbers<[1], [0], [0], [1], [0, 0, 1, 1], [], []>} : vector<8x4xbf16>, vector<4x64xbf16>, vector<8x64xf32> -> vector<8x64xf32>
    %168 = arith.addf %164, %167 : vector<8x64xf32>
    %169 = vector.extract_strided_slice %160 {offsets = [2, 0], sizes = [8, 4], strides = [1, 1]} : vector<11x4xbf16> to vector<8x4xbf16>
    %c128 = arith.constant 128 : index
    %c0_92 = arith.constant 0 : index
    %170 = vector.load %arg3[%c128, %c0_92] : memref<196x64xbf16, #tpu.memory_space<vmem>>, vector<4x64xbf16>
    %cst_93 = arith.constant dense<0.000000e+00> : vector<8x64xf32>
    %171 = tpu.matmul %169, %170, %cst_93 {dimension_numbers = #tpu.dot_dimension_numbers<[1], [0], [0], [1], [0, 0, 1, 1], [], []>} : vector<8x4xbf16>, vector<4x64xbf16>, vector<8x64xf32> -> vector<8x64xf32>
    %172 = arith.addf %168, %171 : vector<8x64xf32>
    %173 = vector.extract_strided_slice %160 {offsets = [3, 0], sizes = [8, 4], strides = [1, 1]} : vector<11x4xbf16> to vector<8x4xbf16>
    %c136 = arith.constant 136 : index
    %c0_94 = arith.constant 0 : index
    %174 = vector.load %arg3[%c136, %c0_94] : memref<196x64xbf16, #tpu.memory_space<vmem>>, vector<4x64xbf16>
    %cst_95 = arith.constant dense<0.000000e+00> : vector<8x64xf32>
    %175 = tpu.matmul %173, %174, %cst_95 {dimension_numbers = #tpu.dot_dimension_numbers<[1], [0], [0], [1], [0, 0, 1, 1], [], []>} : vector<8x4xbf16>, vector<4x64xbf16>, vector<8x64xf32> -> vector<8x64xf32>
    %176 = arith.addf %172, %175 : vector<8x64xf32>
    %c11_i32_96 = arith.constant 11 : i32
    %177 = arith.addi %c11_i32_96, %arg1 : i32
    %c2_i32_97 = arith.constant 2 : i32
    %178 = arith.addi %177, %c2_i32_97 : i32
    %179 = arith.index_cast %178 : i32 to index
    %c0_98 = arith.constant 0 : index
    %c0_99 = arith.constant 0 : index
    %180 = vector.load %arg2[%179, %c0_98, %c0_99] : memref<44x11x4xbf16, #tpu.memory_space<vmem>>, vector<1x11x4xbf16>
    %181 = vector.shape_cast %180 : vector<1x11x4xbf16> to vector<11x4xbf16>
    %182 = vector.extract_strided_slice %181 {offsets = [0, 0], sizes = [8, 4], strides = [1, 1]} : vector<11x4xbf16> to vector<8x4xbf16>
    %c116 = arith.constant 116 : index
    %c0_100 = arith.constant 0 : index
    %183 = vector.load %arg3[%c116, %c0_100] : memref<196x64xbf16, #tpu.memory_space<vmem>>, vector<4x64xbf16>
    %cst_101 = arith.constant dense<0.000000e+00> : vector<8x64xf32>
    %184 = tpu.matmul %182, %183, %cst_101 {dimension_numbers = #tpu.dot_dimension_numbers<[1], [0], [0], [1], [0, 0, 1, 1], [], []>} : vector<8x4xbf16>, vector<4x64xbf16>, vector<8x64xf32> -> vector<8x64xf32>
    %185 = arith.addf %176, %184 : vector<8x64xf32>
    %186 = vector.extract_strided_slice %181 {offsets = [1, 0], sizes = [8, 4], strides = [1, 1]} : vector<11x4xbf16> to vector<8x4xbf16>
    %c124 = arith.constant 124 : index
    %c0_102 = arith.constant 0 : index
    %187 = vector.load %arg3[%c124, %c0_102] : memref<196x64xbf16, #tpu.memory_space<vmem>>, vector<4x64xbf16>
    %cst_103 = arith.constant dense<0.000000e+00> : vector<8x64xf32>
    %188 = tpu.matmul %186, %187, %cst_103 {dimension_numbers = #tpu.dot_dimension_numbers<[1], [0], [0], [1], [0, 0, 1, 1], [], []>} : vector<8x4xbf16>, vector<4x64xbf16>, vector<8x64xf32> -> vector<8x64xf32>
    %189 = arith.addf %185, %188 : vector<8x64xf32>
    %190 = vector.extract_strided_slice %181 {offsets = [2, 0], sizes = [8, 4], strides = [1, 1]} : vector<11x4xbf16> to vector<8x4xbf16>
    %c132 = arith.constant 132 : index
    %c0_104 = arith.constant 0 : index
    %191 = vector.load %arg3[%c132, %c0_104] : memref<196x64xbf16, #tpu.memory_space<vmem>>, vector<4x64xbf16>
    %cst_105 = arith.constant dense<0.000000e+00> : vector<8x64xf32>
    %192 = tpu.matmul %190, %191, %cst_105 {dimension_numbers = #tpu.dot_dimension_numbers<[1], [0], [0], [1], [0, 0, 1, 1], [], []>} : vector<8x4xbf16>, vector<4x64xbf16>, vector<8x64xf32> -> vector<8x64xf32>
    %193 = arith.addf %189, %192 : vector<8x64xf32>
    %c22_i32_106 = arith.constant 22 : i32
    %194 = arith.addi %c22_i32_106, %arg1 : i32
    %c2_i32_107 = arith.constant 2 : i32
    %195 = arith.addi %194, %c2_i32_107 : i32
    %196 = arith.index_cast %195 : i32 to index
    %c0_108 = arith.constant 0 : index
    %c0_109 = arith.constant 0 : index
    %197 = vector.load %arg2[%196, %c0_108, %c0_109] : memref<44x11x4xbf16, #tpu.memory_space<vmem>>, vector<1x11x4xbf16>
    %198 = vector.shape_cast %197 : vector<1x11x4xbf16> to vector<11x4xbf16>
    %199 = vector.extract_strided_slice %198 {offsets = [0, 0], sizes = [8, 4], strides = [1, 1]} : vector<11x4xbf16> to vector<8x4xbf16>
    %c140 = arith.constant 140 : index
    %c0_110 = arith.constant 0 : index
    %200 = vector.load %arg3[%c140, %c0_110] : memref<196x64xbf16, #tpu.memory_space<vmem>>, vector<4x64xbf16>
    %cst_111 = arith.constant dense<0.000000e+00> : vector<8x64xf32>
    %201 = tpu.matmul %199, %200, %cst_111 {dimension_numbers = #tpu.dot_dimension_numbers<[1], [0], [0], [1], [0, 0, 1, 1], [], []>} : vector<8x4xbf16>, vector<4x64xbf16>, vector<8x64xf32> -> vector<8x64xf32>
    %202 = arith.addf %193, %201 : vector<8x64xf32>
    %203 = vector.extract_strided_slice %198 {offsets = [1, 0], sizes = [8, 4], strides = [1, 1]} : vector<11x4xbf16> to vector<8x4xbf16>
    %c148 = arith.constant 148 : index
    %c0_112 = arith.constant 0 : index
    %204 = vector.load %arg3[%c148, %c0_112] : memref<196x64xbf16, #tpu.memory_space<vmem>>, vector<4x64xbf16>
    %cst_113 = arith.constant dense<0.000000e+00> : vector<8x64xf32>
    %205 = tpu.matmul %203, %204, %cst_113 {dimension_numbers = #tpu.dot_dimension_numbers<[1], [0], [0], [1], [0, 0, 1, 1], [], []>} : vector<8x4xbf16>, vector<4x64xbf16>, vector<8x64xf32> -> vector<8x64xf32>
    %206 = arith.addf %202, %205 : vector<8x64xf32>
    %207 = vector.extract_strided_slice %198 {offsets = [2, 0], sizes = [8, 4], strides = [1, 1]} : vector<11x4xbf16> to vector<8x4xbf16>
    %c156 = arith.constant 156 : index
    %c0_114 = arith.constant 0 : index
    %208 = vector.load %arg3[%c156, %c0_114] : memref<196x64xbf16, #tpu.memory_space<vmem>>, vector<4x64xbf16>
    %cst_115 = arith.constant dense<0.000000e+00> : vector<8x64xf32>
    %209 = tpu.matmul %207, %208, %cst_115 {dimension_numbers = #tpu.dot_dimension_numbers<[1], [0], [0], [1], [0, 0, 1, 1], [], []>} : vector<8x4xbf16>, vector<4x64xbf16>, vector<8x64xf32> -> vector<8x64xf32>
    %210 = arith.addf %206, %209 : vector<8x64xf32>
    %211 = vector.extract_strided_slice %198 {offsets = [3, 0], sizes = [8, 4], strides = [1, 1]} : vector<11x4xbf16> to vector<8x4xbf16>
    %c164 = arith.constant 164 : index
    %c0_116 = arith.constant 0 : index
    %212 = vector.load %arg3[%c164, %c0_116] : memref<196x64xbf16, #tpu.memory_space<vmem>>, vector<4x64xbf16>
    %cst_117 = arith.constant dense<0.000000e+00> : vector<8x64xf32>
    %213 = tpu.matmul %211, %212, %cst_117 {dimension_numbers = #tpu.dot_dimension_numbers<[1], [0], [0], [1], [0, 0, 1, 1], [], []>} : vector<8x4xbf16>, vector<4x64xbf16>, vector<8x64xf32> -> vector<8x64xf32>
    %214 = arith.addf %210, %213 : vector<8x64xf32>
    %c33_i32_118 = arith.constant 33 : i32
    %215 = arith.addi %c33_i32_118, %arg1 : i32
    %c2_i32_119 = arith.constant 2 : i32
    %216 = arith.addi %215, %c2_i32_119 : i32
    %217 = arith.index_cast %216 : i32 to index
    %c0_120 = arith.constant 0 : index
    %c0_121 = arith.constant 0 : index
    %218 = vector.load %arg2[%217, %c0_120, %c0_121] : memref<44x11x4xbf16, #tpu.memory_space<vmem>>, vector<1x11x4xbf16>
    %219 = vector.shape_cast %218 : vector<1x11x4xbf16> to vector<11x4xbf16>
    %220 = vector.extract_strided_slice %219 {offsets = [0, 0], sizes = [8, 4], strides = [1, 1]} : vector<11x4xbf16> to vector<8x4xbf16>
    %c144 = arith.constant 144 : index
    %c0_122 = arith.constant 0 : index
    %221 = vector.load %arg3[%c144, %c0_122] : memref<196x64xbf16, #tpu.memory_space<vmem>>, vector<4x64xbf16>
    %cst_123 = arith.constant dense<0.000000e+00> : vector<8x64xf32>
    %222 = tpu.matmul %220, %221, %cst_123 {dimension_numbers = #tpu.dot_dimension_numbers<[1], [0], [0], [1], [0, 0, 1, 1], [], []>} : vector<8x4xbf16>, vector<4x64xbf16>, vector<8x64xf32> -> vector<8x64xf32>
    %223 = arith.addf %214, %222 : vector<8x64xf32>
    %224 = vector.extract_strided_slice %219 {offsets = [1, 0], sizes = [8, 4], strides = [1, 1]} : vector<11x4xbf16> to vector<8x4xbf16>
    %c152 = arith.constant 152 : index
    %c0_124 = arith.constant 0 : index
    %225 = vector.load %arg3[%c152, %c0_124] : memref<196x64xbf16, #tpu.memory_space<vmem>>, vector<4x64xbf16>
    %cst_125 = arith.constant dense<0.000000e+00> : vector<8x64xf32>
    %226 = tpu.matmul %224, %225, %cst_125 {dimension_numbers = #tpu.dot_dimension_numbers<[1], [0], [0], [1], [0, 0, 1, 1], [], []>} : vector<8x4xbf16>, vector<4x64xbf16>, vector<8x64xf32> -> vector<8x64xf32>
    %227 = arith.addf %223, %226 : vector<8x64xf32>
    %228 = vector.extract_strided_slice %219 {offsets = [2, 0], sizes = [8, 4], strides = [1, 1]} : vector<11x4xbf16> to vector<8x4xbf16>
    %c160 = arith.constant 160 : index
    %c0_126 = arith.constant 0 : index
    %229 = vector.load %arg3[%c160, %c0_126] : memref<196x64xbf16, #tpu.memory_space<vmem>>, vector<4x64xbf16>
    %cst_127 = arith.constant dense<0.000000e+00> : vector<8x64xf32>
    %230 = tpu.matmul %228, %229, %cst_127 {dimension_numbers = #tpu.dot_dimension_numbers<[1], [0], [0], [1], [0, 0, 1, 1], [], []>} : vector<8x4xbf16>, vector<4x64xbf16>, vector<8x64xf32> -> vector<8x64xf32>
    %231 = arith.addf %227, %230 : vector<8x64xf32>
    %c0_i32_128 = arith.constant 0 : i32
    %232 = arith.addi %c0_i32_128, %arg1 : i32
    %c3_i32 = arith.constant 3 : i32
    %233 = arith.addi %232, %c3_i32 : i32
    %234 = arith.index_cast %233 : i32 to index
    %c0_129 = arith.constant 0 : index
    %c0_130 = arith.constant 0 : index
    %235 = vector.load %arg2[%234, %c0_129, %c0_130] : memref<44x11x4xbf16, #tpu.memory_space<vmem>>, vector<1x11x4xbf16>
    %236 = vector.shape_cast %235 : vector<1x11x4xbf16> to vector<11x4xbf16>
    %237 = vector.extract_strided_slice %236 {offsets = [0, 0], sizes = [8, 4], strides = [1, 1]} : vector<11x4xbf16> to vector<8x4xbf16>
    %c168 = arith.constant 168 : index
    %c0_131 = arith.constant 0 : index
    %238 = vector.load %arg3[%c168, %c0_131] : memref<196x64xbf16, #tpu.memory_space<vmem>>, vector<4x64xbf16>
    %cst_132 = arith.constant dense<0.000000e+00> : vector<8x64xf32>
    %239 = tpu.matmul %237, %238, %cst_132 {dimension_numbers = #tpu.dot_dimension_numbers<[1], [0], [0], [1], [0, 0, 1, 1], [], []>} : vector<8x4xbf16>, vector<4x64xbf16>, vector<8x64xf32> -> vector<8x64xf32>
    %240 = arith.addf %231, %239 : vector<8x64xf32>
    %241 = vector.extract_strided_slice %236 {offsets = [1, 0], sizes = [8, 4], strides = [1, 1]} : vector<11x4xbf16> to vector<8x4xbf16>
    %c176 = arith.constant 176 : index
    %c0_133 = arith.constant 0 : index
    %242 = vector.load %arg3[%c176, %c0_133] : memref<196x64xbf16, #tpu.memory_space<vmem>>, vector<4x64xbf16>
    %cst_134 = arith.constant dense<0.000000e+00> : vector<8x64xf32>
    %243 = tpu.matmul %241, %242, %cst_134 {dimension_numbers = #tpu.dot_dimension_numbers<[1], [0], [0], [1], [0, 0, 1, 1], [], []>} : vector<8x4xbf16>, vector<4x64xbf16>, vector<8x64xf32> -> vector<8x64xf32>
    %244 = arith.addf %240, %243 : vector<8x64xf32>
    %245 = vector.extract_strided_slice %236 {offsets = [2, 0], sizes = [8, 4], strides = [1, 1]} : vector<11x4xbf16> to vector<8x4xbf16>
    %c184 = arith.constant 184 : index
    %c0_135 = arith.constant 0 : index
    %246 = vector.load %arg3[%c184, %c0_135] : memref<196x64xbf16, #tpu.memory_space<vmem>>, vector<4x64xbf16>
    %cst_136 = arith.constant dense<0.000000e+00> : vector<8x64xf32>
    %247 = tpu.matmul %245, %246, %cst_136 {dimension_numbers = #tpu.dot_dimension_numbers<[1], [0], [0], [1], [0, 0, 1, 1], [], []>} : vector<8x4xbf16>, vector<4x64xbf16>, vector<8x64xf32> -> vector<8x64xf32>
    %248 = arith.addf %244, %247 : vector<8x64xf32>
    %249 = vector.extract_strided_slice %236 {offsets = [3, 0], sizes = [8, 4], strides = [1, 1]} : vector<11x4xbf16> to vector<8x4xbf16>
    %c192 = arith.constant 192 : index
    %c0_137 = arith.constant 0 : index
    %250 = vector.load %arg3[%c192, %c0_137] : memref<196x64xbf16, #tpu.memory_space<vmem>>, vector<4x64xbf16>
    %cst_138 = arith.constant dense<0.000000e+00> : vector<8x64xf32>
    %251 = tpu.matmul %249, %250, %cst_138 {dimension_numbers = #tpu.dot_dimension_numbers<[1], [0], [0], [1], [0, 0, 1, 1], [], []>} : vector<8x4xbf16>, vector<4x64xbf16>, vector<8x64xf32> -> vector<8x64xf32>
    %252 = arith.addf %248, %251 : vector<8x64xf32>
    %c11_i32_139 = arith.constant 11 : i32
    %253 = arith.addi %c11_i32_139, %arg1 : i32
    %c3_i32_140 = arith.constant 3 : i32
    %254 = arith.addi %253, %c3_i32_140 : i32
    %255 = arith.index_cast %254 : i32 to index
    %c0_141 = arith.constant 0 : index
    %c0_142 = arith.constant 0 : index
    %256 = vector.load %arg2[%255, %c0_141, %c0_142] : memref<44x11x4xbf16, #tpu.memory_space<vmem>>, vector<1x11x4xbf16>
    %257 = vector.shape_cast %256 : vector<1x11x4xbf16> to vector<11x4xbf16>
    %258 = vector.extract_strided_slice %257 {offsets = [0, 0], sizes = [8, 4], strides = [1, 1]} : vector<11x4xbf16> to vector<8x4xbf16>
    %c172 = arith.constant 172 : index
    %c0_143 = arith.constant 0 : index
    %259 = vector.load %arg3[%c172, %c0_143] : memref<196x64xbf16, #tpu.memory_space<vmem>>, vector<4x64xbf16>
    %cst_144 = arith.constant dense<0.000000e+00> : vector<8x64xf32>
    %260 = tpu.matmul %258, %259, %cst_144 {dimension_numbers = #tpu.dot_dimension_numbers<[1], [0], [0], [1], [0, 0, 1, 1], [], []>} : vector<8x4xbf16>, vector<4x64xbf16>, vector<8x64xf32> -> vector<8x64xf32>
    %261 = arith.addf %252, %260 : vector<8x64xf32>
    %262 = vector.extract_strided_slice %257 {offsets = [1, 0], sizes = [8, 4], strides = [1, 1]} : vector<11x4xbf16> to vector<8x4xbf16>
    %c180 = arith.constant 180 : index
    %c0_145 = arith.constant 0 : index
    %263 = vector.load %arg3[%c180, %c0_145] : memref<196x64xbf16, #tpu.memory_space<vmem>>, vector<4x64xbf16>
    %cst_146 = arith.constant dense<0.000000e+00> : vector<8x64xf32>
    %264 = tpu.matmul %262, %263, %cst_146 {dimension_numbers = #tpu.dot_dimension_numbers<[1], [0], [0], [1], [0, 0, 1, 1], [], []>} : vector<8x4xbf16>, vector<4x64xbf16>, vector<8x64xf32> -> vector<8x64xf32>
    %265 = arith.addf %261, %264 : vector<8x64xf32>
    %266 = vector.extract_strided_slice %257 {offsets = [2, 0], sizes = [8, 4], strides = [1, 1]} : vector<11x4xbf16> to vector<8x4xbf16>
    %c188 = arith.constant 188 : index
    %c0_147 = arith.constant 0 : index
    %267 = vector.load %arg3[%c188, %c0_147] : memref<196x64xbf16, #tpu.memory_space<vmem>>, vector<4x64xbf16>
    %cst_148 = arith.constant dense<0.000000e+00> : vector<8x64xf32>
    %268 = tpu.matmul %266, %267, %cst_148 {dimension_numbers = #tpu.dot_dimension_numbers<[1], [0], [0], [1], [0, 0, 1, 1], [], []>} : vector<8x4xbf16>, vector<4x64xbf16>, vector<8x64xf32> -> vector<8x64xf32>
    %269 = arith.addf %265, %268 : vector<8x64xf32>
    %c0_149 = arith.constant 0 : index
    %c0_150 = arith.constant 0 : index
    %270 = vector.load %arg4[%c0_149, %c0_150] : memref<1x64xf32, #tpu.memory_space<vmem>>, vector<1x64xf32>
    %271 = vector.broadcast %270 : vector<1x64xf32> to vector<8x64xf32>
    %272 = arith.mulf %269, %271 : vector<8x64xf32>
    %c0_151 = arith.constant 0 : index
    %c0_152 = arith.constant 0 : index
    %273 = vector.load %arg5[%c0_151, %c0_152] : memref<1x64xf32, #tpu.memory_space<vmem>>, vector<1x64xf32>
    %274 = vector.broadcast %273 : vector<1x64xf32> to vector<8x64xf32>
    %275 = arith.addf %272, %274 : vector<8x64xf32>
    %cst_153 = arith.constant 0.000000e+00 : f32
    %276 = vector.broadcast %cst_153 : f32 to vector<8x64xf32>
    %277 = arith.maximumf %275, %276 : vector<8x64xf32>
    %278 = arith.truncf %277 : vector<8x64xf32> to vector<8x64xbf16>
    %c0_154 = arith.constant 0 : index
    %c0_155 = arith.constant 0 : index
    %279 = vector.load %arg6[%c0_154, %c0_155] : memref<64x256xbf16, #tpu.memory_space<vmem>>, vector<64x256xbf16>
    %cst_156 = arith.constant dense<0.000000e+00> : vector<8x256xf32>
    %280 = tpu.matmul %278, %279, %cst_156 {dimension_numbers = #tpu.dot_dimension_numbers<[1], [0], [0], [1], [0, 0, 1, 1], [], []>} : vector<8x64xbf16>, vector<64x256xbf16>, vector<8x256xf32> -> vector<8x256xf32>
    %c0_157 = arith.constant 0 : index
    %c0_158 = arith.constant 0 : index
    %281 = vector.load %arg7[%c0_157, %c0_158] : memref<1x256xf32, #tpu.memory_space<vmem>>, vector<1x256xf32>
    %282 = vector.broadcast %281 : vector<1x256xf32> to vector<8x256xf32>
    %283 = arith.mulf %280, %282 : vector<8x256xf32>
    %c0_159 = arith.constant 0 : index
    %c0_160 = arith.constant 0 : index
    %284 = vector.load %arg8[%c0_159, %c0_160] : memref<1x256xf32, #tpu.memory_space<vmem>>, vector<1x256xf32>
    %285 = vector.broadcast %284 : vector<1x256xf32> to vector<8x256xf32>
    %286 = arith.addf %283, %285 : vector<8x256xf32>
    %cst_161 = arith.constant 0.000000e+00 : f32
    %287 = vector.broadcast %cst_161 : f32 to vector<8x256xf32>
    %288 = arith.maximumf %286, %287 : vector<8x256xf32>
    %c0_162 = arith.constant 0 : index
    %c0_163 = arith.constant 0 : index
    %289 = vector.load %arg10[%c0_162, %c0_163] : memref<1x256xf32, #tpu.memory_space<vmem>>, vector<1x256xf32>
    %cst_164 = arith.constant dense<0.000000e+00> : vector<256xf32>
    %290 = vector.multi_reduction <add>, %288, %cst_164 [0] : vector<8x256xf32> to vector<256xf32>
    %291 = vector.shape_cast %290 : vector<256xf32> to vector<1x256xf32>
    %292 = arith.addf %289, %291 : vector<1x256xf32>
    %c0_165 = arith.constant 0 : index
    %c0_166 = arith.constant 0 : index
    %293 = vector.load %arg10[%c0_165, %c0_166] : memref<1x256xf32, #tpu.memory_space<vmem>>, vector<1x256xf32>
    tpu.vector_store %arg10[%c0_165, %c0_166], %292 {strides = array<i32>} : memref<1x256xf32, #tpu.memory_space<vmem>>, vector<1x256xf32>,
    %c7_i32 = arith.constant 7 : i32
    %294 = arith.cmpi eq, %arg1, %c7_i32 : i32
    %295 = arith.extui %294 : i1 to i32
    %c0_i32_167 = arith.constant 0 : i32
    %296 = arith.cmpi ne, %295, %c0_i32_167 : i32
    scf.if %296 {
      %c0_168 = arith.constant 0 : index
      %c0_169 = arith.constant 0 : index
      %297 = vector.load %arg10[%c0_168, %c0_169] : memref<1x256xf32, #tpu.memory_space<vmem>>, vector<1x256xf32>
      %cst_170 = arith.constant 1.562500e-02 : f32
      %298 = vector.broadcast %cst_170 : f32 to vector<1x256xf32>
      %299 = arith.mulf %297, %298 : vector<1x256xf32>
      %c0_171 = arith.constant 0 : index
      %c0_172 = arith.constant 0 : index
      %c0_173 = arith.constant 0 : index
      %300 = vector.load %arg9[%c0_171, %c0_172, %c0_173] : memref<1x1x256xf32, #tpu.memory_space<vmem>>, vector<1x1x256xf32>
      %301 = vector.shape_cast %300 : vector<1x1x256xf32> to vector<1x256xf32>
      %302 = vector.shape_cast %299 : vector<1x256xf32> to vector<1x1x256xf32>
      tpu.vector_store %arg9[%c0_171, %c0_172, %c0_173], %302 {strides = array<i32>} : memref<1x1x256xf32, #tpu.memory_space<vmem>>, vector<1x1x256xf32>,
    } else {
    }
    return
  }
  func.func @transform_0(%arg0: i32, %arg1: i32) -> (i32, i32, i32) {
    %c0_i32 = arith.constant 0 : i32
    %c0_i32_0 = arith.constant 0 : i32
    %c0_i32_1 = arith.constant 0 : i32
    return %arg0, %c0_i32, %c0_i32_0 : i32, i32, i32
  }
  func.func @transform_1(%arg0: i32, %arg1: i32) -> (i32, i32) {
    %c0_i32 = arith.constant 0 : i32
    %c0_i32_0 = arith.constant 0 : i32
    %c0_i32_1 = arith.constant 0 : i32
    return %c0_i32, %c0_i32_0 : i32, i32
  }
  func.func @transform_2(%arg0: i32, %arg1: i32) -> (i32, i32) {
    %c0_i32 = arith.constant 0 : i32
    %c0_i32_0 = arith.constant 0 : i32
    %c0_i32_1 = arith.constant 0 : i32
    return %c0_i32, %c0_i32_0 : i32, i32
  }
  func.func @transform_3(%arg0: i32, %arg1: i32) -> (i32, i32) {
    %c0_i32 = arith.constant 0 : i32
    %c0_i32_0 = arith.constant 0 : i32
    %c0_i32_1 = arith.constant 0 : i32
    return %c0_i32, %c0_i32_0 : i32, i32
  }
  func.func @transform_4(%arg0: i32, %arg1: i32) -> (i32, i32) {
    %c0_i32 = arith.constant 0 : i32
    %c0_i32_0 = arith.constant 0 : i32
    %c0_i32_1 = arith.constant 0 : i32
    return %c0_i32, %c0_i32_0 : i32, i32
  }
  func.func @transform_5(%arg0: i32, %arg1: i32) -> (i32, i32) {
    %c0_i32 = arith.constant 0 : i32
    %c0_i32_0 = arith.constant 0 : i32
    %c0_i32_1 = arith.constant 0 : i32
    return %c0_i32, %c0_i32_0 : i32, i32
  }
  func.func @transform_6(%arg0: i32, %arg1: i32) -> (i32, i32) {
    %c0_i32 = arith.constant 0 : i32
    %c0_i32_0 = arith.constant 0 : i32
    %c0_i32_1 = arith.constant 0 : i32
    return %c0_i32, %c0_i32_0 : i32, i32
  }
  func.func @transform_7(%arg0: i32, %arg1: i32) -> (i32, i32, i32) {
    %c0_i32 = arith.constant 0 : i32
    %c0_i32_0 = arith.constant 0 : i32
    %c0_i32_1 = arith.constant 0 : i32
    return %arg0, %c0_i32, %c0_i32_0 : i32, i32, i32
  }
}

module attributes {stable_mosaic.version = 11 : i64} {
  func.func @_lneg_kernel(%arg0: i32, %arg1: i32, %arg2: memref<8x16xbf16, #tpu.memory_space<vmem>>, %arg3: memref<16x128xbf16, #tpu.memory_space<vmem>>, %arg4: memref<8x128xf32, #tpu.memory_space<vmem>>) attributes {dimension_semantics = [#tpu.dimension_semantics<parallel>, #tpu.dimension_semantics<parallel>], iteration_bounds = array<i64: 1, 1>, scalar_prefetch = 0 : i64, scratch_operands = 0 : i64, tpu.core_type = #tpu.core_type<tc>, window_params = [{transform_indices = @transform_0, window_bounds = array<i64: 8, 16>}, {transform_indices = @transform_1, window_bounds = array<i64: 16, 128>}, {transform_indices = @transform_2, window_bounds = array<i64: 8, 128>}]} {
    %c0 = arith.constant 0 : index
    %c0_0 = arith.constant 0 : index
    %0 = vector.load %arg2[%c0, %c0_0] : memref<8x16xbf16, #tpu.memory_space<vmem>>, vector<8x16xbf16>
    %c0_1 = arith.constant 0 : index
    %c0_2 = arith.constant 0 : index
    %1 = vector.load %arg3[%c0_1, %c0_2] : memref<16x128xbf16, #tpu.memory_space<vmem>>, vector<16x128xbf16>
    %cst = arith.constant dense<0.000000e+00> : vector<8x128xf32>
    %2 = tpu.matmul %0, %1, %cst {dimension_numbers = #tpu.dot_dimension_numbers<[1], [0], [0], [1], [0, 0, 1, 1], [], []>} : vector<8x16xbf16>, vector<16x128xbf16>, vector<8x128xf32> -> vector<8x128xf32>
    %cst_3 = arith.constant 14.2857141 : f32
    %3 = vector.broadcast %cst_3 : f32 to vector<8x128xf32>
    %4 = arith.mulf %2, %3 : vector<8x128xf32>
    %c0_4 = arith.constant 0 : index
    %c0_5 = arith.constant 0 : index
    %5 = vector.load %arg4[%c0_4, %c0_5] : memref<8x128xf32, #tpu.memory_space<vmem>>, vector<8x128xf32>
    tpu.vector_store %arg4[%c0_4, %c0_5], %4 {strides = array<i32>} : memref<8x128xf32, #tpu.memory_space<vmem>>, vector<8x128xf32>,
    return
  }
  func.func @transform_0(%arg0: i32, %arg1: i32) -> (i32, i32) {
    %c0_i32 = arith.constant 0 : i32
    %c0_i32_0 = arith.constant 0 : i32
    return %arg0, %c0_i32 : i32, i32
  }
  func.func @transform_1(%arg0: i32, %arg1: i32) -> (i32, i32) {
    %c0_i32 = arith.constant 0 : i32
    %c0_i32_0 = arith.constant 0 : i32
    return %c0_i32, %arg1 : i32, i32
  }
  func.func @transform_2(%arg0: i32, %arg1: i32) -> (i32, i32) {
    %c0_i32 = arith.constant 0 : i32
    return %arg0, %arg1 : i32, i32
  }
}

module attributes {stable_mosaic.version = 11 : i64} {
  func.func @_proj_norm_kernel(%arg0: i32, %arg1: memref<8x256xbf16, #tpu.memory_space<vmem>>, %arg2: memref<8x256xbf16, #tpu.memory_space<vmem>>, %arg3: memref<256x256xbf16, #tpu.memory_space<vmem>>, %arg4: memref<1x256xf32, #tpu.memory_space<vmem>>, %arg5: memref<256x16xbf16, #tpu.memory_space<vmem>>, %arg6: memref<1x16xf32, #tpu.memory_space<vmem>>, %arg7: memref<256x256xbf16, #tpu.memory_space<vmem>>, %arg8: memref<1x256xf32, #tpu.memory_space<vmem>>, %arg9: memref<256x16xbf16, #tpu.memory_space<vmem>>, %arg10: memref<1x16xf32, #tpu.memory_space<vmem>>, %arg11: memref<8x16xbf16, #tpu.memory_space<vmem>>, %arg12: memref<8x16xf32, #tpu.memory_space<vmem>>, %arg13: memref<8x128xf32, #tpu.memory_space<vmem>>) attributes {dimension_semantics = [#tpu.dimension_semantics<arbitrary>], iteration_bounds = array<i64: 1>, scalar_prefetch = 0 : i64, scratch_operands = 0 : i64, tpu.core_type = #tpu.core_type<tc>, window_params = [{pipeline_mode = #tpu.pipeline_mode<synchronous>, transform_indices = @transform_0, window_bounds = array<i64: 8, 256>}, {pipeline_mode = #tpu.pipeline_mode<synchronous>, transform_indices = @transform_1, window_bounds = array<i64: 8, 256>}, {pipeline_mode = #tpu.pipeline_mode<synchronous>, transform_indices = @transform_2, window_bounds = array<i64: 256, 256>}, {pipeline_mode = #tpu.pipeline_mode<synchronous>, transform_indices = @transform_3, window_bounds = array<i64: 1, 256>}, {pipeline_mode = #tpu.pipeline_mode<synchronous>, transform_indices = @transform_4, window_bounds = array<i64: 256, 16>}, {pipeline_mode = #tpu.pipeline_mode<synchronous>, transform_indices = @transform_5, window_bounds = array<i64: 1, 16>}, {pipeline_mode = #tpu.pipeline_mode<synchronous>, transform_indices = @transform_6, window_bounds = array<i64: 256, 256>}, {pipeline_mode = #tpu.pipeline_mode<synchronous>, transform_indices = @transform_7, window_bounds = array<i64: 1, 256>}, {pipeline_mode = #tpu.pipeline_mode<synchronous>, transform_indices = @transform_8, window_bounds = array<i64: 256, 16>}, {pipeline_mode = #tpu.pipeline_mode<synchronous>, transform_indices = @transform_9, window_bounds = array<i64: 1, 16>}, {pipeline_mode = #tpu.pipeline_mode<synchronous>, transform_indices = @transform_10, window_bounds = array<i64: 8, 16>}, {pipeline_mode = #tpu.pipeline_mode<synchronous>, transform_indices = @transform_11, window_bounds = array<i64: 8, 16>}, {pipeline_mode = #tpu.pipeline_mode<synchronous>, transform_indices = @transform_12, window_bounds = array<i64: 8, 128>}]} {
    %c0 = arith.constant 0 : index
    %c0_0 = arith.constant 0 : index
    %0 = vector.load %arg1[%c0, %c0_0] : memref<8x256xbf16, #tpu.memory_space<vmem>>, vector<8x256xbf16>
    %c0_1 = arith.constant 0 : index
    %c0_2 = arith.constant 0 : index
    %1 = vector.load %arg3[%c0_1, %c0_2] : memref<256x256xbf16, #tpu.memory_space<vmem>>, vector<256x256xbf16>
    %cst = arith.constant dense<0.000000e+00> : vector<8x256xf32>
    %2 = tpu.matmul %0, %1, %cst {dimension_numbers = #tpu.dot_dimension_numbers<[1], [0], [0], [1], [0, 0, 1, 1], [], []>} : vector<8x256xbf16>, vector<256x256xbf16>, vector<8x256xf32> -> vector<8x256xf32>
    %c0_3 = arith.constant 0 : index
    %c0_4 = arith.constant 0 : index
    %3 = vector.load %arg4[%c0_3, %c0_4] : memref<1x256xf32, #tpu.memory_space<vmem>>, vector<1x256xf32>
    %4 = vector.broadcast %3 : vector<1x256xf32> to vector<8x256xf32>
    %5 = arith.addf %2, %4 : vector<8x256xf32>
    %cst_5 = arith.constant 0.000000e+00 : f32
    %6 = vector.broadcast %cst_5 : f32 to vector<8x256xf32>
    %7 = arith.maximumf %5, %6 : vector<8x256xf32>
    %8 = arith.truncf %7 : vector<8x256xf32> to vector<8x256xbf16>
    %c0_6 = arith.constant 0 : index
    %c0_7 = arith.constant 0 : index
    %9 = vector.load %arg5[%c0_6, %c0_7] : memref<256x16xbf16, #tpu.memory_space<vmem>>, vector<256x16xbf16>
    %cst_8 = arith.constant dense<0.000000e+00> : vector<8x16xf32>
    %10 = tpu.matmul %8, %9, %cst_8 {dimension_numbers = #tpu.dot_dimension_numbers<[1], [0], [0], [1], [0, 0, 1, 1], [], []>} : vector<8x256xbf16>, vector<256x16xbf16>, vector<8x16xf32> -> vector<8x16xf32>
    %c0_9 = arith.constant 0 : index
    %c0_10 = arith.constant 0 : index
    %11 = vector.load %arg6[%c0_9, %c0_10] : memref<1x16xf32, #tpu.memory_space<vmem>>, vector<1x16xf32>
    %12 = vector.broadcast %11 : vector<1x16xf32> to vector<8x16xf32>
    %13 = arith.addf %10, %12 : vector<8x16xf32>
    %14 = arith.mulf %13, %13 : vector<8x16xf32>
    %cst_11 = arith.constant dense<0.000000e+00> : vector<8xf32>
    %15 = vector.multi_reduction <add>, %14, %cst_11 [1] : vector<8x16xf32> to vector<8xf32>
    %16 = vector.shape_cast %15 : vector<8xf32> to vector<8x1xf32>
    %cst_12 = arith.constant 1.000000e-24 : f32
    %17 = vector.broadcast %cst_12 : f32 to vector<8x1xf32>
    %18 = arith.maximumf %16, %17 : vector<8x1xf32>
    %19 = math.rsqrt %18 : vector<8x1xf32>
    %20 = vector.broadcast %19 : vector<8x1xf32> to vector<8x16xf32>
    %21 = arith.mulf %13, %20 : vector<8x16xf32>
    %c0_13 = arith.constant 0 : index
    %c0_14 = arith.constant 0 : index
    %22 = vector.load %arg2[%c0_13, %c0_14] : memref<8x256xbf16, #tpu.memory_space<vmem>>, vector<8x256xbf16>
    %c0_15 = arith.constant 0 : index
    %c0_16 = arith.constant 0 : index
    %23 = vector.load %arg7[%c0_15, %c0_16] : memref<256x256xbf16, #tpu.memory_space<vmem>>, vector<256x256xbf16>
    %cst_17 = arith.constant dense<0.000000e+00> : vector<8x256xf32>
    %24 = tpu.matmul %22, %23, %cst_17 {dimension_numbers = #tpu.dot_dimension_numbers<[1], [0], [0], [1], [0, 0, 1, 1], [], []>} : vector<8x256xbf16>, vector<256x256xbf16>, vector<8x256xf32> -> vector<8x256xf32>
    %c0_18 = arith.constant 0 : index
    %c0_19 = arith.constant 0 : index
    %25 = vector.load %arg8[%c0_18, %c0_19] : memref<1x256xf32, #tpu.memory_space<vmem>>, vector<1x256xf32>
    %26 = vector.broadcast %25 : vector<1x256xf32> to vector<8x256xf32>
    %27 = arith.addf %24, %26 : vector<8x256xf32>
    %cst_20 = arith.constant 0.000000e+00 : f32
    %28 = vector.broadcast %cst_20 : f32 to vector<8x256xf32>
    %29 = arith.maximumf %27, %28 : vector<8x256xf32>
    %30 = arith.truncf %29 : vector<8x256xf32> to vector<8x256xbf16>
    %c0_21 = arith.constant 0 : index
    %c0_22 = arith.constant 0 : index
    %31 = vector.load %arg9[%c0_21, %c0_22] : memref<256x16xbf16, #tpu.memory_space<vmem>>, vector<256x16xbf16>
    %cst_23 = arith.constant dense<0.000000e+00> : vector<8x16xf32>
    %32 = tpu.matmul %30, %31, %cst_23 {dimension_numbers = #tpu.dot_dimension_numbers<[1], [0], [0], [1], [0, 0, 1, 1], [], []>} : vector<8x256xbf16>, vector<256x16xbf16>, vector<8x16xf32> -> vector<8x16xf32>
    %c0_24 = arith.constant 0 : index
    %c0_25 = arith.constant 0 : index
    %33 = vector.load %arg10[%c0_24, %c0_25] : memref<1x16xf32, #tpu.memory_space<vmem>>, vector<1x16xf32>
    %34 = vector.broadcast %33 : vector<1x16xf32> to vector<8x16xf32>
    %35 = arith.addf %32, %34 : vector<8x16xf32>
    %36 = arith.mulf %35, %35 : vector<8x16xf32>
    %cst_26 = arith.constant dense<0.000000e+00> : vector<8xf32>
    %37 = vector.multi_reduction <add>, %36, %cst_26 [1] : vector<8x16xf32> to vector<8xf32>
    %38 = vector.shape_cast %37 : vector<8xf32> to vector<8x1xf32>
    %cst_27 = arith.constant 1.000000e-24 : f32
    %39 = vector.broadcast %cst_27 : f32 to vector<8x1xf32>
    %40 = arith.maximumf %38, %39 : vector<8x1xf32>
    %41 = math.rsqrt %40 : vector<8x1xf32>
    %42 = vector.broadcast %41 : vector<8x1xf32> to vector<8x16xf32>
    %43 = arith.mulf %35, %42 : vector<8x16xf32>
    %44 = arith.truncf %21 : vector<8x16xf32> to vector<8x16xbf16>
    %c0_28 = arith.constant 0 : index
    %c0_29 = arith.constant 0 : index
    %45 = vector.load %arg11[%c0_28, %c0_29] : memref<8x16xbf16, #tpu.memory_space<vmem>>, vector<8x16xbf16>
    tpu.vector_store %arg11[%c0_28, %c0_29], %44 {strides = array<i32>} : memref<8x16xbf16, #tpu.memory_space<vmem>>, vector<8x16xbf16>,
    %c0_30 = arith.constant 0 : index
    %c0_31 = arith.constant 0 : index
    %46 = vector.load %arg12[%c0_30, %c0_31] : memref<8x16xf32, #tpu.memory_space<vmem>>, vector<8x16xf32>
    tpu.vector_store %arg12[%c0_30, %c0_31], %43 {strides = array<i32>} : memref<8x16xf32, #tpu.memory_space<vmem>>, vector<8x16xf32>,
    %47 = arith.mulf %21, %43 : vector<8x16xf32>
    %cst_32 = arith.constant dense<0.000000e+00> : vector<8xf32>
    %48 = vector.multi_reduction <add>, %47, %cst_32 [1] : vector<8x16xf32> to vector<8xf32>
    %49 = vector.shape_cast %48 : vector<8xf32> to vector<8x1xf32>
    %cst_33 = arith.constant 14.2857141 : f32
    %50 = vector.broadcast %cst_33 : f32 to vector<8x1xf32>
    %51 = arith.mulf %49, %50 : vector<8x1xf32>
    %52 = vector.shape_cast %51 : vector<8x1xf32> to vector<8x1xf32>
    %53 = vector.broadcast %52 : vector<8x1xf32> to vector<8x128xf32>
    %c0_34 = arith.constant 0 : index
    %c0_35 = arith.constant 0 : index
    %54 = vector.load %arg13[%c0_34, %c0_35] : memref<8x128xf32, #tpu.memory_space<vmem>>, vector<8x128xf32>
    tpu.vector_store %arg13[%c0_34, %c0_35], %53 {strides = array<i32>} : memref<8x128xf32, #tpu.memory_space<vmem>>, vector<8x128xf32>,
    return
  }
  func.func @transform_0(%arg0: i32) -> (i32, i32) {
    %c0_i32 = arith.constant 0 : i32
    %c0_i32_0 = arith.constant 0 : i32
    %c0_i32_1 = arith.constant 0 : i32
    return %c0_i32, %c0_i32_0 : i32, i32
  }
  func.func @transform_1(%arg0: i32) -> (i32, i32) {
    %c0_i32 = arith.constant 0 : i32
    %c0_i32_0 = arith.constant 0 : i32
    %c0_i32_1 = arith.constant 0 : i32
    return %c0_i32, %c0_i32_0 : i32, i32
  }
  func.func @transform_2(%arg0: i32) -> (i32, i32) {
    %c0_i32 = arith.constant 0 : i32
    %c0_i32_0 = arith.constant 0 : i32
    %c0_i32_1 = arith.constant 0 : i32
    return %c0_i32, %c0_i32_0 : i32, i32
  }
  func.func @transform_3(%arg0: i32) -> (i32, i32) {
    %c0_i32 = arith.constant 0 : i32
    %c0_i32_0 = arith.constant 0 : i32
    %c0_i32_1 = arith.constant 0 : i32
    return %c0_i32, %c0_i32_0 : i32, i32
  }
  func.func @transform_4(%arg0: i32) -> (i32, i32) {
    %c0_i32 = arith.constant 0 : i32
    %c0_i32_0 = arith.constant 0 : i32
    %c0_i32_1 = arith.constant 0 : i32
    return %c0_i32, %c0_i32_0 : i32, i32
  }
  func.func @transform_5(%arg0: i32) -> (i32, i32) {
    %c0_i32 = arith.constant 0 : i32
    %c0_i32_0 = arith.constant 0 : i32
    %c0_i32_1 = arith.constant 0 : i32
    return %c0_i32, %c0_i32_0 : i32, i32
  }
  func.func @transform_6(%arg0: i32) -> (i32, i32) {
    %c0_i32 = arith.constant 0 : i32
    %c0_i32_0 = arith.constant 0 : i32
    %c0_i32_1 = arith.constant 0 : i32
    return %c0_i32, %c0_i32_0 : i32, i32
  }
  func.func @transform_7(%arg0: i32) -> (i32, i32) {
    %c0_i32 = arith.constant 0 : i32
    %c0_i32_0 = arith.constant 0 : i32
    %c0_i32_1 = arith.constant 0 : i32
    return %c0_i32, %c0_i32_0 : i32, i32
  }
  func.func @transform_8(%arg0: i32) -> (i32, i32) {
    %c0_i32 = arith.constant 0 : i32
    %c0_i32_0 = arith.constant 0 : i32
    %c0_i32_1 = arith.constant 0 : i32
    return %c0_i32, %c0_i32_0 : i32, i32
  }
  func.func @transform_9(%arg0: i32) -> (i32, i32) {
    %c0_i32 = arith.constant 0 : i32
    %c0_i32_0 = arith.constant 0 : i32
    %c0_i32_1 = arith.constant 0 : i32
    return %c0_i32, %c0_i32_0 : i32, i32
  }
  func.func @transform_10(%arg0: i32) -> (i32, i32) {
    %c0_i32 = arith.constant 0 : i32
    %c0_i32_0 = arith.constant 0 : i32
    %c0_i32_1 = arith.constant 0 : i32
    return %c0_i32, %c0_i32_0 : i32, i32
  }
  func.func @transform_11(%arg0: i32) -> (i32, i32) {
    %c0_i32 = arith.constant 0 : i32
    %c0_i32_0 = arith.constant 0 : i32
    %c0_i32_1 = arith.constant 0 : i32
    return %c0_i32, %c0_i32_0 : i32, i32
  }
  func.func @transform_12(%arg0: i32) -> (i32, i32) {
    %c0_i32 = arith.constant 0 : i32
    %c0_i32_0 = arith.constant 0 : i32
    %c0_i32_1 = arith.constant 0 : i32
    return %c0_i32, %c0_i32_0 : i32, i32
  }
}

</mosaic_0001>

<bundles_post_ra>
// kernel: moco_forward.7
= control target key start
LH: loop header
LB: loop body
LE: loop exit
PB: predicated region body
PF: predicated region fallthrough
CT: control target
= control target key end

     0   :  { %vm21_vm0 = vcmask 130048   ;;  %s74_s1 = inlined_call_operand.vmem [shape: bf16[16,128], index: 1, kind: input, shape index: {}]   ;;  %s75_s0 = inlined_call_operand.vmem [shape: bf16[8,16], index: 0, kind: input, shape index: {}]   ;;  %s76_s2 = inlined_call_operand.vmem [shape: f32[8,128], index: 2, kind: output, shape index: {}]  }
   0x1   :  { %v49_v0 = vld [vmem:[%s74_s1] sm:$0xff] }
   0x2   :  { %32 = vmatpush.bf16.msra.mxu0 %v49_v0  ;;  %v12_v1 = vld [vmem:[%s75_s0] sm:$0xf] }
   0x5   :  { %48 = vmatmul.msk.bf16.vlgmr.msra.gmra.mxu0 %vm21_vm0, %v12_v1 }
  0x82   :  { %v34_v2 = vpop.f32.mrf.mxu0 }
  0x83   :  { %v38_v3 = vmul.f32 14.285714, %v34_v2 }
  0x85   :  { %39 = vst [vmem:[%s76_s2] sm:$0xff] %v38_v3 }
  0x8a   :  { %v36_v4 = vpop.f32.mrf.mxu0 }

// kernel: moco_forward.6
= control target key start
LH: loop header
LB: loop body
LE: loop exit
PB: predicated region body
PF: predicated region fallthrough
CT: control target
= control target key end

     0   :  { %vm459_vm0 = vcmask 130048   ;;  %vm912_vm4 = vcmask 125952   ;;  %s1999_s2 = inlined_call_operand.vmem [shape: bf16[256,256], index: 2, kind: input, shape index: {}]   ;;  %s2000_s0 = inlined_call_operand.vmem [shape: bf16[8,256], index: 0, kind: input, shape index: {}]   ;;  %s2001_s4 = inlined_call_operand.vmem [shape: bf16[256,16], index: 4, kind: input, shape index: {}]   ;;  %s2002_s6 = inlined_call_operand.vmem [shape: bf16[256,256], index: 6, kind: input, shape index: {}]   ;;  %s2003_s5 = inlined_call_operand.vmem [shape: f32[1,16], index: 5, kind: input, shape index: {}]   ;;  %s2004_s1 = inlined_call_operand.vmem [shape: bf16[8,256], index: 1, kind: input, shape index: {}]   ;;  %s2005_s3 = inlined_call_operand.vmem [shape: f32[1,256], index: 3, kind: input, shape index: {}]   ;;  %s2006_s8 = inlined_call_operand.vmem [shape: bf16[256,16], index: 8, kind: input, shape index: {}]   ;;  %s2007_s7 = inlined_call_operand.vmem [shape: f32[1,256], index: 7, kind: input, shape index: {}]   ;;  %s2008_s9 = inlined_call_operand.vmem [shape: f32[1,16], index: 9, kind: input, shape index: {}]   ;;  %s2009_s10 = inlined_call_operand.vmem [shape: bf16[8,16], index: 10, kind: output, shape index: {0}]   ;;  %s2010_s11 = inlined_call_operand.vmem [shape: f32[8,16], index: 11, kind: output, shape index: {1}]   ;;  %s2011_s12 = inlined_call_operand.vmem [shape: f32[8,128], index: 12, kind: output, shape index: {2}]  }
   0x1   :  { %v991_v0 = vld [vmem:[%s1999_s2 + $0x70] sm:$0xf]  ;;  %v1332_v1 = vld [vmem:[%s1999_s2 + $0x74] sm:$0xf0]  ;;  %v1331_v5 = vld [vmem:[%s1999_s2 + $0x74] sm:$0xf] }
   0x2   :  { %v1055_v2 = vld [vmem:[%s1999_s2 + $0xf0] sm:$0xf]  ;;  %v992_v3 = vor.u32 %v1332_v1, %v991_v0  ;;  %v1348_v4 = vld [vmem:[%s1999_s2 + $0xf4] sm:$0xf0]  ;;  %v993_v6 = vld [vmem:[%s1999_s2 + $0x78] sm:$0xf0] }
   0x3   :  { %v1056_v7 = vor.u32 %v1348_v4, %v1055_v2  ;;  %v996_v8 = vor.u32 %v1331_v5, %v993_v6  ;;  %v1347_v9 = vld [vmem:[%s1999_s2 + $0xf4] sm:$0xf]  ;;  %v1057_v10 = vld [vmem:[%s1999_s2 + $0xf8] sm:$0xf0]  ;;  %v983_v11 = vld [vmem:[%s1999_s2 + $0x60] sm:$0xf] }
   0x4   :  { %244 = vmatpush.bf16.msra.mxu0 %v992_v3  ;;  %v1060_v12 = vor.u32 %v1347_v9, %v1057_v10  ;;  %v1330_v13 = vld [vmem:[%s1999_s2 + $0x64] sm:$0xf0]  ;;  %v1047_v14 = vld [vmem:[%s1999_s2 + $0xe0] sm:$0xf]  ;;  %v1329_v18 = vld [vmem:[%s1999_s2 + $0x64] sm:$0xf] }
   0x5   :  { %v1346_v15 = vld [vmem:[%s1999_s2 + $0xe4] sm:$0xf0]  ;;  %257 = vmatpush.bf16.msra.mxu1 %v1056_v7  ;;  %270 = vmatpush.bf16.msra.mxu2 %v996_v8  ;;  %v984_v16 = vor.u32 %v1330_v13, %v983_v11  ;;  %v985_v19 = vld [vmem:[%s1999_s2 + $0x68] sm:$0xf0]  ;;  %v1345_v20 = vld [vmem:[%s1999_s2 + $0xe4] sm:$0xf] }
   0x6   :  { %v1048_v17 = vor.u32 %v1346_v15, %v1047_v14  ;;  %283 = vmatpush.bf16.msra.mxu3 %v1060_v12  ;;  %v988_v21 = vor.u32 %v1329_v18, %v985_v19  ;;  %v1049_v22 = vld [vmem:[%s1999_s2 + $0xe8] sm:$0xf0]  ;;  %v975_v23 = vld [vmem:[%s1999_s2 + $0x50] sm:$0xf]  ;;  %v1328_v24 = vld [vmem:[%s1999_s2 + $0x54] sm:$0xf0] }
   0x7   :  { %v1052_v25 = vor.u32 %v1345_v20, %v1049_v22  ;;  %v1039_v26 = vld [vmem:[%s1999_s2 + $0xd0] sm:$0xf]  ;;  %v1344_v27 = vld [vmem:[%s1999_s2 + $0xd4] sm:$0xf0]  ;;  %v1327_v28 = vld [vmem:[%s1999_s2 + $0x54] sm:$0xf]  ;;  %v976_v29 = vor.u32 %v1328_v24, %v975_v23 }
   0x8   :  { %245 = vmatpush.bf16.msra.mxu0 %v984_v16  ;;  %v977_v30 = vld [vmem:[%s1999_s2 + $0x58] sm:$0xf0]  ;;  %v1343_v31 = vld [vmem:[%s1999_s2 + $0xd4] sm:$0xf]  ;;  %v1040_v33 = vor.u32 %v1344_v27, %v1039_v26  ;;  %v967_v35 = vld [vmem:[%s1999_s2 + $0x40] sm:$0xf] }
   0x9   :  { %v1041_v32 = vld [vmem:[%s1999_s2 + $0xd8] sm:$0xf0]  ;;  %258 = vmatpush.bf16.msra.mxu1 %v1048_v17  ;;  %271 = vmatpush.bf16.msra.mxu2 %v988_v21  ;;  %v980_v34 = vor.u32 %v1327_v28, %v977_v30  ;;  %v1326_v36 = vld [vmem:[%s1999_s2 + $0x44] sm:$0xf0]  ;;  %v1031_v37 = vld [vmem:[%s1999_s2 + $0xc0] sm:$0xf] }
   0xa   :  { %284 = vmatpush.bf16.msra.mxu3 %v1052_v25  ;;  %v1044_v38 = vor.u32 %v1343_v31, %v1041_v32  ;;  %v1342_v39 = vld [vmem:[%s1999_s2 + $0xc4] sm:$0xf0]  ;;  %v1325_v40 = vld [vmem:[%s1999_s2 + $0x44] sm:$0xf]  ;;  %v969_v41 = vld [vmem:[%s1999_s2 + $0x48] sm:$0xf0]  ;;  %v968_v44 = vor.u32 %v1326_v36, %v967_v35 }
   0xb   :  { %v1341_v42 = vld [vmem:[%s1999_s2 + $0xc4] sm:$0xf]  ;;  %v1033_v43 = vld [vmem:[%s1999_s2 + $0xc8] sm:$0xf0]  ;;  %v1032_v45 = vor.u32 %v1342_v39, %v1031_v37  ;;  %v972_v46 = vor.u32 %v1325_v40, %v969_v41  ;;  %v959_v47 = vld [vmem:[%s1999_s2 + $0x30] sm:$0xf] }
   0xc   :  { %246 = vmatpush.bf16.msra.mxu0 %v976_v29  ;;  %v1324_v48 = vld [vmem:[%s1999_s2 + $0x34] sm:$0xf0]  ;;  %v1023_v49 = vld [vmem:[%s1999_s2 + $0xb0] sm:$0xf]  ;;  %v1036_v50 = vor.u32 %v1341_v42, %v1033_v43  ;;  %v1323_v52 = vld [vmem:[%s1999_s2 + $0x34] sm:$0xf] }
   0xd   :  { %259 = vmatpush.bf16.msra.mxu1 %v1040_v33  ;;  %272 = vmatpush.bf16.msra.mxu2 %v980_v34  ;;  %v1340_v51 = vld [vmem:[%s1999_s2 + $0xb4] sm:$0xf0]  ;;  %v961_v53 = vld [vmem:[%s1999_s2 + $0x38] sm:$0xf0]  ;;  %v1339_v54 = vld [vmem:[%s1999_s2 + $0xb4] sm:$0xf]  ;;  %v960_v56 = vor.u32 %v1324_v48, %v959_v47 }
   0xe   :  { %285 = vmatpush.bf16.msra.mxu3 %v1044_v38  ;;  %v1025_v55 = vld [vmem:[%s1999_s2 + $0xb8] sm:$0xf0]  ;;  %v1024_v57 = vor.u32 %v1340_v51, %v1023_v49  ;;  %v964_v58 = vor.u32 %v1323_v52, %v961_v53  ;;  %v951_v59 = vld [vmem:[%s1999_s2 + $0x20] sm:$0xf]  ;;  %v1322_v60 = vld [vmem:[%s1999_s2 + $0x24] sm:$0xf0] }
   0xf   :  { %v1015_v61 = vld [vmem:[%s1999_s2 + $0xa0] sm:$0xf]  ;;  %v1028_v62 = vor.u32 %v1339_v54, %v1025_v55  ;;  %v1338_v63 = vld [vmem:[%s1999_s2 + $0xa4] sm:$0xf0]  ;;  %v1321_v0 = vld [vmem:[%s1999_s2 + $0x24] sm:$0xf]  ;;  %v952_v4 = vor.u32 %v1322_v60, %v951_v59 }
  0x10   :  { %247 = vmatpush.bf16.msra.mxu0 %v968_v44  ;;  %v953_v1 = vld [vmem:[%s1999_s2 + $0x28] sm:$0xf0]  ;;  %v1337_v2 = vld [vmem:[%s1999_s2 + $0xa4] sm:$0xf]  ;;  %v1016_v5 = vor.u32 %v1338_v63, %v1015_v61  ;;  %v943_v7 = vld [vmem:[%s1999_s2 + $0x10] sm:$0xf] }
  0x11   :  { %260 = vmatpush.bf16.msra.mxu1 %v1032_v45  ;;  %273 = vmatpush.bf16.msra.mxu2 %v972_v46  ;;  %v1017_v3 = vld [vmem:[%s1999_s2 + $0xa8] sm:$0xf0]  ;;  %v956_v6 = vor.u32 %v1321_v0, %v953_v1  ;;  %v1320_v8 = vld [vmem:[%s1999_s2 + $0x14] sm:$0xf0]  ;;  %v1007_v9 = vld [vmem:[%s1999_s2 + $0x90] sm:$0xf] }
  0x12   :  { %286 = vmatpush.bf16.msra.mxu3 %v1036_v50  ;;  %v1020_v10 = vor.u32 %v1337_v2, %v1017_v3  ;;  %v1336_v11 = vld [vmem:[%s1999_s2 + $0x94] sm:$0xf0]  ;;  %v1319_v12 = vld [vmem:[%s1999_s2 + $0x14] sm:$0xf]  ;;  %v945_v13 = vld [vmem:[%s1999_s2 + $0x18] sm:$0xf0]  ;;  %v944_v16 = vor.u32 %v1320_v8, %v943_v7 }
  0x13   :  { %v1335_v14 = vld [vmem:[%s1999_s2 + $0x94] sm:$0xf]  ;;  %v1009_v15 = vld [vmem:[%s1999_s2 + $0x98] sm:$0xf0]  ;;  %v38_v17 = vld [vmem:[%s2000_s0] sm:$0xff]  ;;  %v1008_v18 = vor.u32 %v1336_v11, %v1007_v9  ;;  %v948_v19 = vor.u32 %v1319_v12, %v945_v13 }
  0x14   :  { %248 = vmatpush.bf16.msra.mxu0 %v960_v56  ;;  %v935_v20 = vld [vmem:[%s1999_s2] sm:$0xf]  ;;  %v1318_v21 = vld [vmem:[%s1999_s2 + $0x4] sm:$0xf0]  ;;  %v1012_v23 = vor.u32 %v1335_v14, %v1009_v15  ;;  %v1317_v25 = vld [vmem:[%s1999_s2 + $0x4] sm:$0xf]  ;;  %v78_v29 = vunpack.c.l.b16 %v38_v17  ;;  %v79_v31 = vunpack.c.h.b16 %v38_v17 }
  0x15   :  { %261 = vmatpush.bf16.msra.mxu1 %v1024_v57  ;;  %274 = vmatpush.bf16.msra.mxu2 %v964_v58  ;;  %v999_v22 = vld [vmem:[%s1999_s2 + $0x80] sm:$0xf]  ;;  %v1334_v24 = vld [vmem:[%s1999_s2 + $0x84] sm:$0xf0]  ;;  %v937_v26 = vld [vmem:[%s1999_s2 + $0x8] sm:$0xf0]  ;;  %v936_v30 = vor.u32 %v1318_v21, %v935_v20 }
  0x16   :  { %287 = vmatpush.bf16.msra.mxu3 %v1028_v62  ;;  %v1333_v27 = vld [vmem:[%s1999_s2 + $0x84] sm:$0xf]  ;;  %v1001_v28 = vld [vmem:[%s1999_s2 + $0x88] sm:$0xf0]  ;;  %v1000_v32 = vor.u32 %v1334_v24, %v999_v22  ;;  %v940_v33 = vor.u32 %v1317_v25, %v937_v26  ;;  %v1356_v35 = vld [vmem:[%s2001_s4 + $0x38] sm:$0xff]  ;;  %v80_v38 = vpack.c.b16 %v78_v29, %v78_v29  ;;  %v81_v42 = vpack.c.b16 %v79_v31, %v79_v31 }
  0x17   :  { %v1004_v34 = vor.u32 %v1333_v27, %v1001_v28  ;;  %v1183_v36 = vld [vmem:[%s2002_s6 + $0x70] sm:$0xf]  ;;  %v1380_v37 = vld [vmem:[%s2002_s6 + $0x74] sm:$0xf0]  ;;  %v1175_v46 = vld [vmem:[%s2002_s6 + $0x60] sm:$0xf] }
  0x18   :  { %249 = vmatpush.bf16.msra.mxu0 %v952_v4  ;;  %v1364_v39 = vld [vmem:[%s2001_s4 + $0x78] sm:$0xff]  ;;  %v1247_v40 = vld [vmem:[%s2002_s6 + $0xf0] sm:$0xf]  ;;  %v1184_v43 = vor.u32 %v1380_v37, %v1183_v36  ;;  %v1378_v47 = vld [vmem:[%s2002_s6 + $0x64] sm:$0xf0] }
  0x19   :  { %262 = vmatpush.bf16.msra.mxu1 %v1016_v5  ;;  %275 = vmatpush.bf16.msra.mxu2 %v956_v6  ;;  %v1396_v41 = vld [vmem:[%s2002_s6 + $0xf4] sm:$0xf0]  ;;  %v1355_v44 = vld [vmem:[%s2001_s4 + $0x30] sm:$0xff]  ;;  %v1239_v49 = vld [vmem:[%s2002_s6 + $0xe0] sm:$0xf]  ;;  %v1176_v51 = vor.u32 %v1378_v47, %v1175_v46 }
  0x1a   :  { %288 = vmatpush.bf16.msra.mxu3 %v1020_v10  ;;  %v1248_v45 = vor.u32 %v1396_v41, %v1247_v40  ;;  %v1363_v48 = vld [vmem:[%s2001_s4 + $0x70] sm:$0xff]  ;;  %v1394_v50 = vld [vmem:[%s2002_s6 + $0xe4] sm:$0xf0]  ;;  %v1376_v55 = vld [vmem:[%s2002_s6 + $0x54] sm:$0xf0] }
  0x1b   :  { %v1354_v52 = vld [vmem:[%s2001_s4 + $0x28] sm:$0xff]  ;;  %v1240_v53 = vor.u32 %v1394_v50, %v1239_v49  ;;  %v1167_v54 = vld [vmem:[%s2002_s6 + $0x50] sm:$0xf]  ;;  %v1392_v58 = vld [vmem:[%s2002_s6 + $0xd4] sm:$0xf0] }
  0x1c   :  { %250 = vmatpush.bf16.msra.mxu0 %v944_v16  ;;  %v1362_v56 = vld [vmem:[%s2001_s4 + $0x68] sm:$0xff]  ;;  %v1231_v57 = vld [vmem:[%s2002_s6 + $0xd0] sm:$0xf]  ;;  %v1168_v59 = vor.u32 %v1376_v55, %v1167_v54  ;;  %v1353_v60 = vld [vmem:[%s2001_s4 + $0x20] sm:$0xff] }
  0x1d   :  { %263 = vmatpush.bf16.msra.mxu1 %v1008_v18  ;;  %276 = vmatpush.bf16.msra.mxu2 %v948_v19  ;;  %v1232_v61 = vor.u32 %v1392_v58, %v1231_v57  ;;  %v1159_v62 = vld [vmem:[%s2002_s6 + $0x40] sm:$0xf]  ;;  %v1374_v63 = vld [vmem:[%s2002_s6 + $0x44] sm:$0xf0]  ;;  %v1352_v4 = vld [vmem:[%s2001_s4 + $0x18] sm:$0xff] }
  0x1e   :  { %289 = vmatpush.bf16.msra.mxu3 %v1012_v23  ;;  %v1361_v0 = vld [vmem:[%s2001_s4 + $0x60] sm:$0xff]  ;;  %v1390_v2 = vld [vmem:[%s2002_s6 + $0xc4] sm:$0xf0]  ;;  %v1160_v3 = vor.u32 %v1374_v63, %v1159_v62  ;;  %v1151_v6 = vld [vmem:[%s2002_s6 + $0x30] sm:$0xf] }
  0x1f   :  { %v1223_v1 = vld [vmem:[%s2002_s6 + $0xc0] sm:$0xf]  ;;  %v1372_v7 = vld [vmem:[%s2002_s6 + $0x34] sm:$0xf0]  ;;  %v1351_v10 = vld [vmem:[%s2001_s4 + $0x10] sm:$0xff] }
  0x20   :  { %251 = vmatpush.bf16.msra.mxu0 %v936_v30  ;;  %v1224_v5 = vor.u32 %v1390_v2, %v1223_v1  ;;  %v1360_v8 = vld [vmem:[%s2001_s4 + $0x58] sm:$0xff]  ;;  %v1152_v9 = vor.u32 %v1372_v7, %v1151_v6  ;;  %v1359_v11 = vld [vmem:[%s2001_s4 + $0x50] sm:$0xff]  ;;  %v1350_v12 = vld [vmem:[%s2001_s4 + $0x8] sm:$0xff] }
  0x21   :  { %264 = vmatpush.bf16.msra.mxu1 %v1000_v32  ;;  %277 = vmatpush.bf16.msra.mxu2 %v940_v33  ;;  %v1358_v13 = vld [vmem:[%s2001_s4 + $0x48] sm:$0xff]  ;;  %v1379_v14 = vld [vmem:[%s2002_s6 + $0x74] sm:$0xf]  ;;  %v1185_v15 = vld [vmem:[%s2002_s6 + $0x78] sm:$0xf0] }
  0x22   :  { %290 = vmatpush.bf16.msra.mxu3 %v1004_v34  ;;  %v1349_v16 = vld [vmem:[%s2001_s4] sm:$0xff]  ;;  %v1188_v17 = vor.u32 %v1379_v14, %v1185_v15  ;;  %v1177_v20 = vld [vmem:[%s2002_s6 + $0x68] sm:$0xf0]  ;;  %v1215_v22 = vld [vmem:[%s2002_s6 + $0xb0] sm:$0xf] }
  0x23   :  { %252 = vmatmul.bf16.vlgmr.msra.gmra.mxu0 %v80_v38  ;;  %v1357_v18 = vld [vmem:[%s2001_s4 + $0x40] sm:$0xff]  ;;  %v1388_v23 = vld [vmem:[%s2002_s6 + $0xb4] sm:$0xf0]  ;;  %v1395_v24 = vld [vmem:[%s2002_s6 + $0xf4] sm:$0xf] }
  0x24   :  { %432 = vmatpush.bf16.msrb.mxu0 %v1356_v35  ;;  %265 = vmatmul.bf16.vlgmr.msra.gmra.mxu1 %v81_v42  ;;  %v1377_v19 = vld [vmem:[%s2002_s6 + $0x64] sm:$0xf]  ;;  %v1216_v25 = vor.u32 %v1388_v23, %v1215_v22  ;;  %v1249_v26 = vld [vmem:[%s2002_s6 + $0xf8] sm:$0xf0]  ;;  %v1143_v28 = vld [vmem:[%s2002_s6 + $0x20] sm:$0xf] }
  0x25   :  { %445 = vmatpush.bf16.msrb.mxu1 %v1364_v39  ;;  %278 = vmatmul.bf16.vlgmr.msra.gmra.mxu2 %v80_v38  ;;  %v1180_v21 = vor.u32 %v1377_v19, %v1177_v20  ;;  %v1252_v27 = vor.u32 %v1395_v24, %v1249_v26  ;;  %v1370_v29 = vld [vmem:[%s2002_s6 + $0x24] sm:$0xf0]  ;;  %v1375_v30 = vld [vmem:[%s2002_s6 + $0x54] sm:$0xf]  ;;  %v1169_v32 = vld [vmem:[%s2002_s6 + $0x58] sm:$0xf0] }
  0x26   :  { %291 = vmatmul.bf16.vlgmr.msra.gmra.mxu3 %v81_v42  ;;  %681 = vmatpush.bf16.msrb.mxu2 %v1184_v43  ;;  %v1144_v31 = vor.u32 %v1370_v29, %v1143_v28  ;;  %v1172_v33 = vor.u32 %v1375_v30, %v1169_v32  ;;  %v1207_v34 = vld [vmem:[%s2002_s6 + $0xa0] sm:$0xf]  ;;  %v1386_v35 = vld [vmem:[%s2002_s6 + $0xa4] sm:$0xf0]  ;;  %v1393_v36 = vld [vmem:[%s2002_s6 + $0xe4] sm:$0xf] }
  0x27   :  { %694 = vmatpush.bf16.msrb.mxu3 %v1248_v45  ;;  %v1208_v37 = vor.u32 %v1386_v35, %v1207_v34  ;;  %v1241_v38 = vld [vmem:[%s2002_s6 + $0xe8] sm:$0xf0]  ;;  %v1135_v40 = vld [vmem:[%s2002_s6 + $0x10] sm:$0xf]  ;;  %v1368_v41 = vld [vmem:[%s2002_s6 + $0x14] sm:$0xf0] }
  0x28   :  { %433 = vmatpush.bf16.msrb.mxu0 %v1355_v44  ;;  %v1244_v39 = vor.u32 %v1393_v36, %v1241_v38  ;;  %v1373_v42 = vld [vmem:[%s2002_s6 + $0x44] sm:$0xf]  ;;  %v1136_v43 = vor.u32 %v1368_v41, %v1135_v40  ;;  %v1161_v44 = vld [vmem:[%s2002_s6 + $0x48] sm:$0xf0]  ;;  %v1199_v46 = vld [vmem:[%s2002_s6 + $0x90] sm:$0xf] }
  0x29   :  { %446 = vmatpush.bf16.msrb.mxu1 %v1363_v48  ;;  %v1164_v45 = vor.u32 %v1373_v42, %v1161_v44  ;;  %v1384_v47 = vld [vmem:[%s2002_s6 + $0x94] sm:$0xf0]  ;;  %v1391_v49 = vld [vmem:[%s2002_s6 + $0xd4] sm:$0xf]  ;;  %v1233_v50 = vld [vmem:[%s2002_s6 + $0xd8] sm:$0xf0] }
  0x2a   :  { %682 = vmatpush.bf16.msrb.mxu2 %v1176_v51  ;;  %v1200_v48 = vor.u32 %v1384_v47, %v1199_v46  ;;  %v1236_v51 = vor.u32 %v1391_v49, %v1233_v50  ;;  %v1371_v54 = vld [vmem:[%s2002_s6 + $0x34] sm:$0xf]  ;;  %v475_v57 = vld [vmem:[%s2004_s1] sm:$0xff]  ;;  %v1209_v15 = vld [vmem:[%s2002_s6 + $0xa8] sm:$0xf0] }
  0x2b   :  { %695 = vmatpush.bf16.msrb.mxu3 %v1240_v53  ;;  %v1366_v53 = vld [vmem:[%s2002_s6 + $0x4] sm:$0xf0]  ;;  %v515_v62 = vunpack.c.l.b16 %v475_v57  ;;  %v1383_v19 = vld [vmem:[%s2002_s6 + $0x94] sm:$0xf]  ;;  %v1201_v20 = vld [vmem:[%s2002_s6 + $0x98] sm:$0xf0] }
  0x2c   :  { %434 = vmatpush.bf16.msrb.mxu0 %v1354_v52  ;;  %v1127_v52 = vld [vmem:[%s2002_s6] sm:$0xf]  ;;  %v1204_v22 = vor.u32 %v1383_v19, %v1201_v20  ;;  %v1381_v23 = vld [vmem:[%s2002_s6 + $0x84] sm:$0xf]  ;;  %v1193_v24 = vld [vmem:[%s2002_s6 + $0x88] sm:$0xf0] }
  0x2d   :  { %447 = vmatpush.bf16.msrb.mxu1 %v1362_v56  ;;  %v1128_v55 = vor.u32 %v1366_v53, %v1127_v52  ;;  %v1153_v56 = vld [vmem:[%s2002_s6 + $0x38] sm:$0xf0]  ;;  %v1880_v2 = vpack.c.b16 %v515_v62, %v515_v62  ;;  %v1196_v26 = vor.u32 %v1381_v23, %v1193_v24  ;;  %v1401_v49 = vld [vmem:[%s2006_s8 + $0x20] sm:$0xff]  ;;  %v1411_v50 = vld [vmem:[%s2006_s8 + $0x70] sm:$0xff] }
  0x2e   :  { %683 = vmatpush.bf16.msrb.mxu2 %v1168_v59  ;;  %v1156_v58 = vor.u32 %v1371_v54, %v1153_v56  ;;  %v1191_v59 = vld [vmem:[%s2002_s6 + $0x80] sm:$0xf]  ;;  %v1404_v29 = vld [vmem:[%s2006_s8 + $0x38] sm:$0xff]  ;;  %v1410_v52 = vld [vmem:[%s2006_s8 + $0x68] sm:$0xff] }
  0x2f   :  { %696 = vmatpush.bf16.msrb.mxu3 %v1232_v61  ;;  %v1389_v61 = vld [vmem:[%s2002_s6 + $0xc4] sm:$0xf]  ;;  %v1412_v32 = vld [vmem:[%s2006_s8 + $0x78] sm:$0xff]  ;;  %v1399_v53 = vld [vmem:[%s2006_s8 + $0x10] sm:$0xff] }
  0x30   :  { %435 = vmatpush.bf16.msrb.mxu0 %v1353_v60  ;;  %v1382_v60 = vld [vmem:[%s2002_s6 + $0x84] sm:$0xf0]  ;;  %v508_v54 = vld [vmem:[%s2007_s7] sm:$0x3] }
  0x31   :  { %448 = vmatpush.bf16.msrb.mxu1 %v1361_v0  ;;  %v1192_v63 = vor.u32 %v1382_v60, %v1191_v59  ;;  %v1225_v0 = vld [vmem:[%s2002_s6 + $0xc8] sm:$0xf0]  ;;  %v510_v56 = vperm.slane %v508_v54, 0 }
  0x32   :  { %684 = vmatpush.bf16.msrb.mxu2 %v1160_v3  ;;  %v1228_v1 = vor.u32 %v1389_v61, %v1225_v0  ;;  %v1369_v3 = vld [vmem:[%s2002_s6 + $0x24] sm:$0xf]  ;;  %v1408_v61 = vld [vmem:[%s2006_s8 + $0x58] sm:$0xff] }
  0x33   :  { %697 = vmatpush.bf16.msrb.mxu3 %v1224_v5  ;;  %v516_v5 = vunpack.c.h.b16 %v475_v57  ;;  %v1398_v57 = vld [vmem:[%s2006_s8 + $0x8] sm:$0xff] }
  0x34   :  { %436 = vmatpush.bf16.msrb.mxu0 %v1352_v4  ;;  %v1145_v4 = vld [vmem:[%s2002_s6 + $0x28] sm:$0xf0] }
  0x35   :  { %449 = vmatpush.bf16.msrb.mxu1 %v1360_v8  ;;  %v1148_v6 = vor.u32 %v1369_v3, %v1145_v4  ;;  %v518_v7 = vpack.c.b16 %v516_v5, %v516_v5  ;;  %v1387_v8 = vld [vmem:[%s2002_s6 + $0xb4] sm:$0xf]  ;;  %v1406_v5 = vld [vmem:[%s2006_s8 + $0x48] sm:$0xff] }
  0x36   :  { %685 = vmatpush.bf16.msrb.mxu2 %v1152_v9  ;;  %v1217_v9 = vld [vmem:[%s2002_s6 + $0xb8] sm:$0xf0] }
  0x37   :  { %698 = vmatpush.bf16.msrb.mxu3 %v1216_v25  ;;  %v71_v25 = vld [vmem:[%s2005_s3] sm:$0x3] }
  0x38   :  { %437 = vmatpush.bf16.msrb.mxu0 %v1351_v10  ;;  %v1220_v10 = vor.u32 %v1387_v8, %v1217_v9  ;;  %v74_v35 = vperm.slane %v71_v25, 1 }
  0x39   :  { %450 = vmatpush.bf16.msrb.mxu1 %v1359_v11  ;;  %v1367_v11 = vld [vmem:[%s2002_s6 + $0x14] sm:$0xf] }
  0x3a   :  { %686 = vmatpush.bf16.msrb.mxu2 %v1144_v31 }
  0x3b   :  { %699 = vmatpush.bf16.msrb.mxu3 %v1208_v37  ;;  %v1402_v37 = vld [vmem:[%s2006_s8 + $0x28] sm:$0xff] }
  0x3c   :  { %438 = vmatpush.bf16.msrb.mxu0 %v1350_v12  ;;  %v1137_v12 = vld [vmem:[%s2002_s6 + $0x18] sm:$0xf0] }
  0x3d   :  { %451 = vmatpush.bf16.msrb.mxu1 %v1358_v13  ;;  %v1385_v13 = vld [vmem:[%s2002_s6 + $0xa4] sm:$0xf]  ;;  %v1140_v14 = vor.u32 %v1367_v11, %v1137_v12 }
  0x3e   :  { %687 = vmatpush.bf16.msrb.mxu2 %v1136_v43 }
  0x3f   :  { %700 = vmatpush.bf16.msrb.mxu3 %v1200_v48 }
  0x40   :  { %439 = vmatpush.bf16.msrb.mxu0 %v1349_v16  ;;  %v1365_v16 = vld [vmem:[%s2002_s6 + $0x4] sm:$0xf] }
  0x41   :  { %452 = vmatpush.bf16.msrb.mxu1 %v1357_v18  ;;  %v1212_v18 = vor.u32 %v1385_v13, %v1209_v15 }
  0x42   :  { %688 = vmatpush.bf16.msrb.mxu2 %v1128_v55  ;;  %v1409_v55 = vld [vmem:[%s2006_s8 + $0x60] sm:$0xff] }
  0x43   :  { %701 = vmatpush.bf16.msrb.mxu3 %v1192_v63  ;;  %v1397_v63 = vld [vmem:[%s2006_s8] sm:$0xff] }
  0x44   :  { %707 = vmatpush.bf16.msra.mxu0 %v1188_v17  ;;  %v1129_v17 = vld [vmem:[%s2002_s6 + $0x8] sm:$0xf0] }
  0x45   :  { %720 = vmatpush.bf16.msra.mxu1 %v1252_v27  ;;  %689 = vmatmul.bf16.vlgmr.msrb.gmra.mxu2 %v1880_v2  ;;  %v73_v27 = vperm.slane %v71_v25, 0 }
  0x46   :  { %702 = vmatmul.bf16.vlgmr.msrb.gmra.mxu3 %v518_v7  ;;  %869 = vmatpush.bf16.msra.mxu2 %v1404_v29 }
  0x47   :  { %882 = vmatpush.bf16.msra.mxu3 %v1412_v32 }
  0x48   :  { %708 = vmatpush.bf16.msra.mxu0 %v1180_v21  ;;  %v1132_v21 = vor.u32 %v1365_v16, %v1129_v17  ;;  %v511_v16 = vperm.slane %v508_v54, 1 }
  0x49   :  { %721 = vmatpush.bf16.msra.mxu1 %v1244_v39 }
  0x4b   :  { %883 = vmatpush.bf16.msra.mxu3 %v1411_v50 }
  0x4c   :  { %709 = vmatpush.bf16.msra.mxu0 %v1172_v33  ;;  %v1403_v33 = vld [vmem:[%s2006_s8 + $0x30] sm:$0xff] }
  0x4d   :  { %722 = vmatpush.bf16.msra.mxu1 %v1236_v51  ;;  %870 = vmatpush.bf16.msra.mxu2 %v1403_v33  ;;  %v1400_v51 = vld [vmem:[%s2006_s8 + $0x18] sm:$0xff] }
  0x4f   :  { %884 = vmatpush.bf16.msra.mxu3 %v1410_v52 }
  0x50   :  { %710 = vmatpush.bf16.msra.mxu0 %v1164_v45 }
  0x51   :  { %723 = vmatpush.bf16.msra.mxu1 %v1228_v1  ;;  %871 = vmatpush.bf16.msra.mxu2 %v1402_v37  ;;  %v1407_v1 = vld [vmem:[%s2006_s8 + $0x50] sm:$0xff] }
  0x53   :  { %885 = vmatpush.bf16.msra.mxu3 %v1409_v55 }
  0x54   :  { %711 = vmatpush.bf16.msra.mxu0 %v1156_v58 }
  0x55   :  { %724 = vmatpush.bf16.msra.mxu1 %v1220_v10  ;;  %872 = vmatpush.bf16.msra.mxu2 %v1401_v49 }
  0x57   :  { %886 = vmatpush.bf16.msra.mxu3 %v1408_v61 }
  0x58   :  { %712 = vmatpush.bf16.msra.mxu0 %v1148_v6  ;;  %v1405_v6 = vld [vmem:[%s2006_s8 + $0x40] sm:$0xff] }
  0x59   :  { %725 = vmatpush.bf16.msra.mxu1 %v1212_v18  ;;  %873 = vmatpush.bf16.msra.mxu2 %v1400_v51 }
  0x5b   :  { %887 = vmatpush.bf16.msra.mxu3 %v1407_v1 }
  0x5c   :  { %713 = vmatpush.bf16.msra.mxu0 %v1140_v14 }
  0x5d   :  { %726 = vmatpush.bf16.msra.mxu1 %v1204_v22  ;;  %874 = vmatpush.bf16.msra.mxu2 %v1399_v53 }
  0x5f   :  { %888 = vmatpush.bf16.msra.mxu3 %v1406_v5 }
  0x60   :  { %714 = vmatpush.bf16.msra.mxu0 %v1132_v21 }
  0x61   :  { %727 = vmatpush.bf16.msra.mxu1 %v1196_v26  ;;  %875 = vmatpush.bf16.msra.mxu2 %v1398_v57 }
  0x63   :  { %889 = vmatpush.bf16.msra.mxu3 %v1405_v6 }
  0x65   :  { %876 = vmatpush.bf16.msra.mxu2 %v1397_v63 }
  0xa0   :  { %v253_v28 = vpop.f32.mrf.mxu0 }
  0xa1   :  { %v254_v30 = vadd.f32 %v253_v28, %v73_v27  ;;  %v266_v31 = vpop.f32.mrf.mxu1 }
  0xa3   :  { %v267_v34 = vadd.f32 %v266_v31, %v254_v30 }
  0xa5   :  { %v296_v36 = vmax.f32 %v267_v34, 0.0 }
  0xa7   :  { %v298_v38 = vpack.c.bf16 %v296_v36, %v296_v36 }
  0xa8   :  { %v279_v39 = vpop.f32.mrf.mxu2  ;;  %v255_v42 = vpop.f32.mrf.mxu0 }
  0xa9   :  { %v280_v40 = vadd.f32 %v279_v39, %v74_v35  ;;  %v292_v41 = vpop.f32.mrf.mxu3  ;;  %v268_v43 = vpop.f32.mrf.mxu1  ;;  %440 = vmatmul.bf16.vlgmr.msrb.gmra.mxu0 %v298_v38  ;;  %v1414_v38 = vld [vmem:[%s2008_s9] ss:$0 sm:$0xff] }
  0xab   :  { %v293_v44 = vadd.f32 %v292_v41, %v280_v40 }
  0xad   :  { %v297_v45 = vmax.f32 %v293_v44, 0.0 }
  0xaf   :  { %v299_v46 = vpack.c.bf16 %v297_v45, %v297_v45 }
  0xb0   :  { %v281_v47 = vpop.f32.mrf.mxu2 }
  0xb1   :  { %v294_v48 = vpop.f32.mrf.mxu3  ;;  %453 = vmatmul.bf16.vlgmr.msrb.gmra.mxu1 %v299_v46 }
  0xb9   :  { %715 = vmatmul.bf16.vlgmr.msra.gmra.mxu0 %v1880_v2 }
  0xc1   :  { %728 = vmatmul.bf16.vlgmr.msra.gmra.mxu1 %v518_v7  ;;  %v1413_v7 = vld [vmem:[%s2003_s5] ss:$0 sm:$0xff] }
  0xc8   :  { %v690_v58 = vpop.f32.mrf.mxu2 }
  0xc9   :  { %v691_v59 = vadd.f32 %v690_v58, %v510_v56  ;;  %v703_v60 = vpop.f32.mrf.mxu3 }
  0xcb   :  { %v704_v62 = vadd.f32 %v703_v60, %v691_v59 }
  0xcd   :  { %v733_v0 = vmax.f32 %v704_v62, 0.0 }
  0xcf   :  { %v735_v2 = vpack.c.bf16 %v733_v0, %v733_v0 }
  0xd0   :  { %v692_v3 = vpop.f32.mrf.mxu2 }
  0xd1   :  { %877 = vmatmul.bf16.vlgmr.msra.gmra.mxu2 %v735_v2  ;;  %v705_v4 = vpop.f32.mrf.mxu3 }
 0x126   :  { %v441_v8 = vpop.f32.mrf.mxu0 }
 0x127   :  { %v442_v9 = vadd.f32 %v1413_v7, %v441_v8 }
 0x12e   :  { %v454_v10 = vpop.f32.mrf.mxu1  ;;  %v443_v12 = vpop.f32.mrf.mxu0 }
 0x12f   :  { %v455_v11 = vadd.f32 %v454_v10, %v442_v9 }
 0x131   :  { %v458_v13 = vmul.f32 %v455_v11, %v455_v11 }
 0x133   :  { %v460_v14 = vsel %vm459_vm0, %v458_v13, 0.0 }
 0x134   :  { %461 = vadd.xlane.f32.xlu0 %v460_v14 }
 0x136   :  { %v456_v15 = vpop.f32.mrf.mxu1  ;;  %v716_v17 = vpop.f32.mrf.mxu0 }
 0x137   :  { %v717_v18 = vadd.f32 %v716_v17, %v511_v16 }
 0x13e   :  { %v729_v19 = vpop.f32.mrf.mxu1  ;;  %v718_v21 = vpop.f32.mrf.mxu0 }
 0x13f   :  { %v730_v20 = vadd.f32 %v729_v19, %v717_v18 }
 0x141   :  { %v734_v22 = vmax.f32 %v730_v20, 0.0 }
 0x143   :  { %v736_v23 = vpack.c.bf16 %v734_v22, %v734_v22 }
 0x145   :  { %890 = vmatmul.bf16.vlgmr.msra.gmra.mxu3 %v736_v23 }
 0x146   :  { %v731_v24 = vpop.f32.mrf.mxu1 }
 0x154   :  { %v878_v25 = vpop.f32.mrf.mxu2 }
 0x155   :  { %v879_v39 = vadd.f32 %v1414_v38, %v878_v25 }
 0x15c   :  { %v880_v27 = vpop.f32.mrf.mxu2 }
 0x1a7   :  { %v462_v26 = vpop.xlane.xlu0 %461 }
 0x1a8   :  { %v463_v28 = vmax.f32 %v462_v26, 1e-24 }
 0x1aa   :  { %1415 = vrsqrt.f32 %v463_v28  ;;  %vm470_vm2 = vweird.f32 %v463_v28 }
 0x1b0   :  { %v1416_v29 = vpop.eup %1415 }
 0x1b1   :  { %v465_v30 = vmul.f32 %v1416_v29, %v463_v28  ;;  %vm471_vm1 = vweird.f32 %v1416_v29 }
 0x1b2   :  { %vm472_vm3 = vmor %vm470_vm2, %vm471_vm1 }
 0x1b3   :  { %v466_v31 = vmul.f32 %v1416_v29, %v465_v30 }
 0x1b5   :  { %v467_v32 = vmul.f32 0.5, %v466_v31 }
 0x1b7   :  { %v468_v33 = vsub.f32 1.5, %v467_v32 }
 0x1b9   :  { %v469_v34 = vmul.f32 %v1416_v29, %v468_v33 }
 0x1bb   :  { %v473_v35 = vsel %vm472_vm3, %v1416_v29, %v469_v34 }
 0x1bc   :  { %v474_v36 = vmul.f32 %v473_v35, %v455_v11 }
 0x1be   :  { %v911_v37 = vpack.c.bf16 %v474_v36, %v474_v36 }
 0x1c0   :  { %913 = vst.msk [vmem:[%s2009_s10] sm:$0xf] %vm912_vm4, %v911_v37 }
 0x1c8   :  { %v891_v40 = vpop.f32.mrf.mxu3 }
 0x1c9   :  { %v892_v41 = vadd.f32 %v891_v40, %v879_v39 }
 0x1cb   :  { %v895_v42 = vmul.f32 %v892_v41, %v892_v41 }
 0x1cd   :  { %v896_v43 = vsel %vm459_vm0, %v895_v42, 0.0 }
 0x1ce   :  { %897 = vadd.xlane.f32.xlu0 %v896_v43 }
 0x1d0   :  { %v893_v44 = vpop.f32.mrf.mxu3 }
 0x241   :  { %v898_v45 = vpop.xlane.xlu0 %897 }
 0x242   :  { %v899_v46 = vmax.f32 %v898_v45, 1e-24 }
 0x244   :  { %1417 = vrsqrt.f32 %v899_v46  ;;  %vm906_vm6 = vweird.f32 %v899_v46 }
 0x24a   :  { %v1418_v47 = vpop.eup %1417 }
 0x24b   :  { %v901_v48 = vmul.f32 %v1418_v47, %v899_v46  ;;  %vm907_vm5 = vweird.f32 %v1418_v47 }
 0x24c   :  { %vm908_vm7 = vmor %vm906_vm6, %vm907_vm5 }
 0x24d   :  { %v902_v49 = vmul.f32 %v1418_v47, %v901_v48 }
 0x24f   :  { %v903_v50 = vmul.f32 0.5, %v902_v49 }
 0x251   :  { %v904_v51 = vsub.f32 1.5, %v903_v50 }
 0x253   :  { %v905_v52 = vmul.f32 %v1418_v47, %v904_v51 }
 0x255   :  { %v909_v53 = vsel %vm908_vm7, %v1418_v47, %v905_v52 }
 0x256   :  { %v910_v54 = vmul.f32 %v909_v53, %v892_v41 }
 0x258   :  { %v915_v55 = vmul.f32 %v910_v54, %v474_v36  ;;  %914 = vst.msk [vmem:[%s2010_s11] sm:$0xff] %vm459_vm0, %v910_v54 }
 0x25a   :  { %v916_v56 = vsel %vm459_vm0, %v915_v55, 0.0 }
 0x25b   :  { %917 = vadd.xlane.f32.xlu1 %v916_v56 }
 0x2ce   :  { %v918_v57 = vpop.xlane.xlu1 %917 }
 0x2cf   :  { %v919_v58 = vmul.f32 14.285714, %v918_v57 }
 0x2d1   :  { %920 = vst [vmem:[%s2011_s12] sm:$0xff] %v919_v58 }

// kernel: moco_forward.5
= control target key start
LH: loop header
LB: loop body
LE: loop exit
PB: predicated region body
PF: predicated region fallthrough
CT: control target
= control target key end

     0   :  { %s2300_s24 = smov 0   ;;  %s2302_s25 = smov 0   ;;  %s2713_s0 = inlined_call_operand.vmem [shape: bf16[88,11,4], index: 0, kind: input, shape index: {}]   ;;  %s2714_s1 = inlined_call_operand.vmem [shape: bf16[196,64], index: 1, kind: input, shape index: {}]   ;;  %s2715_s2 = inlined_call_operand.vmem [shape: f32[1,64], index: 2, kind: input, shape index: {}]   ;;  %s2716_s3 = inlined_call_operand.vmem [shape: f32[1,64], index: 3, kind: input, shape index: {}]   ;;  %s2717_s4 = inlined_call_operand.vmem [shape: bf16[64,256], index: 4, kind: input, shape index: {}]   ;;  %s2718_s5 = inlined_call_operand.vmem [shape: f32[1,256], index: 5, kind: input, shape index: {}]   ;;  %s2719_s6 = inlined_call_operand.vmem [shape: f32[1,256], index: 6, kind: input, shape index: {}]   ;;  %s2720_s7 = inlined_call_operand.vmem [shape: f32[2,1,256], index: 7, kind: output, shape index: {}]  }
   0x1   :  { %s2304_s26 = smov 0   ;;  %s2306_s27 = smov 0  }
   0x2   :  { %s2308_s28 = smov 0  }
   0x3 LB: > { %s26_s29 = sadd.s32 1, %s2249_s26  ;;  %s29_s30 = sadd.s32 1, %s2253_s27  ;;  %s2257_s28 = sphi %s2308_s28, %s17_s28   ;;  %s2253_s27 = sphi %s2306_s27, %s2724_s27   ;;  %s2249_s26 = sphi %s2304_s26, %s2723_s26   ;;  %s2245_s25 = sphi %s2302_s25, %s2722_s25   ;;  %s2241_s24 = sphi %s2300_s24, %s2721_s24  }
   0x4   : > { %p27_p0 = scmp.ge.s32.totalorder %s26_s29, 8  ;;  %p1964_p1 = scmp.ge.s32.totalorder %s2257_s28, 1 }
   0x5   : > { %p251_p2 = scmp.lt.s32.totalorder %s2257_s28, 17 }
   0x6   : > { %s2726_s29 = smov (%p27_p0, %s26_s29), 0  ;;  %s2728_s30 = smov (!%p27_p0, %s29_s30), %s2253_s27 }
   0x7   : > { %p252_p3 = pnand %p1964_p1, %p251_p2  ;;  %p31_p4 = scmp.ge.s32.totalorder %s2728_s30, 2 }
   0x8   : > { %s283_s8 = smul.u32 (!%p252_p3), 44, %s2245_s25  ;;  %p290_p5 = scmp.lt.s32.totalorder (!%p252_p3), %s2245_s25, 1 }
   0x9   : > { %s2730_s30 = smov (%p31_p4, %s2728_s30), 0  ;;  %255 = sbr.rel (%p252_p3) target bundleno = 531 (0x213), region = 48 }
   0xa   : > { %p284_p6 = scmp.lt.s32.totalorder (!%p252_p3), %s283_s8, 87  ;;  %p1968_p7 = scmp.ne.s32.totalorder (!%p252_p3), %s2241_s24, 0 }
   0xe   : > { %s2732_s25 = smov (!%p290_p5, %s2245_s25), 1  ;;  %s2734_s8 = smov (!%p284_p6, %s283_s8), 87 }
   0xf   : > { %s1967_s9 = sshll.u32 %s2732_s25, 1  ;;  %s2152_s10 = sshll.u32 %s2734_s8, 3 }
  0x10   : > { %s2335_s13 = scalar_lea.vmem %s2720_s7, %s1967_s9  ;;  %s288_s16 = scalar_lea.vmem %s2713_s0, %s2152_s10 }
  0x11   : > { %298 = sbr.rel (%p1968_p7) target bundleno = 26 (0x1a), region = 52 }
  0x16   : > { %v299_v0 = vlaneseq  ;;  %v2259_v1 = vmov 0.0  }
  0x18   : > { %vm301_vm0 = vcmp.lt.s32.totalorder %v299_v0, 256 }
  0x19   : > { %303 = vst.msk [vmem:[#allocation2] sm:$0x3] %vm301_vm0, %v2259_v1 }
  0x1a PF: > { %vm327_vm1 = vcmask 1041408   ;;  %v363_v2 = vld [vmem:[%s2714_s1 + $0x8] sm:$0x3]  ;;  %s2153_s19 = sshll.u32 %s2241_s24, 3  ;;  %v310_v4 = vld [vmem:[%s2714_s1 + $0x4] sm:$0x3] }
  0x1b   : > { %v369_v3 = vsel %vm327_vm1, %v363_v2, 0  ;;  %s2346_s20 = scalar_lea.vmem %s288_s16, %s2153_s19  ;;  %v309_v5 = vld [vmem:[%s2714_s1] sm:$0x3]  ;;  %v329_v8 = vsel %vm327_vm1, %v310_v4, 0  ;;  %v385_v11 = vld [vmem:[%s2714_s1 + $0xc] sm:$0x3] }
  0x1c   : > { %378 = vmatpush.bf16.msra.mxu2 %v369_v3  ;;  %v1973_v6 = vld [vmem:[%s2346_s20] sm:$0xf]  ;;  %v2154_v7 = vld [vmem:[%s2346_s20] sm:$0x30]  ;;  %v348_v9 = vsel %vm327_vm1, %v309_v5, 0  ;;  %338 = vmatpush.bf16.msra.mxu0 %v329_v8  ;;  %vm323_vm2 = vcmask 31744  }
  0x1d   : > { %v1974_v10 = vor.u32 %v2154_v7, %v1973_v6  ;;  %357 = vmatpush.bf16.msra.mxu1 %v348_v9  ;;  %v307_v12 = vld [vmem:[%s2346_s20] sm:$0xf]  ;;  %v393_v14 = vsel %vm327_vm1, %v385_v11, 0  ;;  %v477_v16 = vld [vmem:[%s2714_s1 + $0x8] sm:$0xc]  ;;  %vm1775_vm3 = vcmask 523264  }
  0x1e   : > { %v415_v13 = vld [vmem:[%s2714_s1] sm:$0xc]  ;;  %v509_v17 = vld [vmem:[%s2714_s1 + $0xc] sm:$0xc]  ;;  %402 = vmatpush.bf16.msra.mxu3 %v393_v14  ;;  %v480_v21 = vunpack.c.l.b16 %v477_v16  ;;  %v440_v22 = vld [vmem:[%s2714_s1 + $0x4] sm:$0xc] }
  0x1f   : > { %v417_v15 = vunpack.c.l.b16 %v415_v13  ;;  %v364_v18 = vrot.slane %v1974_v10, 1  ;;  %v317_v19 = vshrl.u32 %v1974_v10, 16  ;;  %v319_v20 = vshll.u32 %v1974_v10, 16  ;;  %v1985_v26 = vld [vmem:[%s2346_s20 + $0x58] sm:$0xf]  ;;  %p2149_p8 = scmp.ne.s32.totalorder %s2241_s24, 7 }
  0x20   : > { %1976 = vmatmul.msk.bf16.vlgmr.msra.gmra.mxu1 %vm323_vm2, %v307_v12  ;;  %v511_v24 = vunpack.c.l.b16 %v509_v17  ;;  %v454_v25 = vunpack.c.l.b16 %v440_v22  ;;  %v2155_v27 = vld [vmem:[%s2346_s20 + $0x58] sm:$0x30]  ;;  %v481_v31 = vpack.c.b16 %v480_v21, %v480_v21  ;;  %v534_v36 = vld [vmem:[%s2714_s1 + $0x10] sm:$0xc]  ;;  %v597_v41 = vld [vmem:[%s2714_s1 + $0x18] sm:$0xc] }
  0x21   : > { %v418_v23 = vpack.c.b16 %v417_v15, %v417_v15  ;;  %1977 = vmatmul.msk.bf16.vlgmr.msra.gmra.mxu2 %vm323_vm2, %v364_v18  ;;  %v321_v28 = vrot.slane %v319_v20, 1  ;;  %v386_v29 = vrot.slane %v317_v19, 1  ;;  %v387_v30 = vrot.slane %v319_v20, 2  ;;  %v631_v42 = vld [vmem:[%s2714_s1 + $0x10] sm:$0x3] }
  0x22   : > { %v512_v33 = vpack.c.b16 %v511_v24, %v511_v24  ;;  %v455_v34 = vpack.c.b16 %v454_v25, %v454_v25  ;;  %v1986_v35 = vor.u32 %v2155_v27, %v1985_v26  ;;  %v482_v39 = vrot.slane %v481_v31, 2  ;;  %v571_v46 = vld [vmem:[%s2714_s1 + $0x14] sm:$0xc]  ;;  %v685_v63 = vld [vmem:[%s2714_s1 + $0x18] sm:$0x3] }
  0x23   : > { %v419_v32 = vrot.slane %v418_v23, 2  ;;  %v322_v37 = vor.u32 %v321_v28, %v317_v19  ;;  %v388_v38 = vor.u32 %v387_v30, %v386_v29  ;;  %v548_v40 = vunpack.c.l.b16 %v534_v36  ;;  %v713_v2 = vld [vmem:[%s2714_s1 + $0x1c] sm:$0x3]  ;;  %v1995_v5 = vld [vmem:[%s2346_s20 + $0xb0] sm:$0xf] }
  0x24   : > { %v513_v44 = vrot.slane %v512_v33, 2  ;;  %v456_v45 = vrot.slane %v455_v34, 2  ;;  %v487_v47 = vsel %vm327_vm1, %v482_v39, 0  ;;  %v449_v49 = vshll.u32 %v1986_v35, 16  ;;  %v2156_v6 = vld [vmem:[%s2346_s20 + $0xb0] sm:$0x30] }
  0x25   : > { %v424_v43 = vsel %vm327_vm1, %v419_v32, 0  ;;  %1975 = vmatmul.msk.bf16.vlgmr.msra.gmra.mxu0 %vm323_vm2, %v322_v37  ;;  %1978 = vmatmul.msk.bf16.vlgmr.msra.gmra.mxu3 %vm323_vm2, %v388_v38  ;;  %v549_v48 = vpack.c.b16 %v548_v40, %v548_v40  ;;  %v602_v52 = vunpack.c.l.b16 %v597_v41  ;;  %v636_v53 = vsel %vm327_vm1, %v631_v42, 0  ;;  %v652_v9 = vld [vmem:[%s2714_s1 + $0x14] sm:$0x3]  ;;  %v734_v10 = vld [vmem:[%s2714_s1 + $0x20] sm:$0x3] }
  0x26   : > { %433 = vmatpush.bf16.msrb.mxu0 %v424_v43  ;;  %496 = vmatpush.bf16.msrb.mxu2 %v487_v47  ;;  %v518_v50 = vsel %vm327_vm1, %v513_v44, 0  ;;  %v461_v51 = vsel %vm327_vm1, %v456_v45, 0  ;;  %v574_v55 = vunpack.c.l.b16 %v571_v46  ;;  %v447_v56 = vshrl.u32 %v1986_v35, 16  ;;  %v1980_v12 = vld [vmem:[%s2346_s20 + $0x58] sm:$0xf] }
  0x27   : > { %527 = vmatpush.bf16.msrb.mxu3 %v518_v50  ;;  %470 = vmatpush.bf16.msrb.mxu1 %v461_v51  ;;  %v550_v54 = vrot.slane %v549_v48, 2  ;;  %v451_v57 = vrot.slane %v449_v49, 1  ;;  %v603_v58 = vpack.c.b16 %v602_v52, %v602_v52  ;;  %v478_v3 = vrot.slane %v1986_v35, 1  ;;  %v1990_v13 = vld [vmem:[%s2346_s20 + $0xb0] sm:$0xf] }
  0x28   : > { %v575_v60 = vpack.c.b16 %v574_v55, %v574_v55  ;;  %v691_v7 = vsel %vm327_vm1, %v685_v63, 0  ;;  %v718_v8 = vsel %vm327_vm1, %v713_v2, 0  ;;  %v1996_v11 = vor.u32 %v2156_v6, %v1995_v5  ;;  %v819_v18 = vld [vmem:[%s2714_s1 + $0x1c] sm:$0xc]  ;;  %v844_v20 = vld [vmem:[%s2714_s1 + $0x20] sm:$0xc] }
  0x29   : > { %v555_v59 = vsel %vm327_vm1, %v550_v54, 0  ;;  %v604_v61 = vrot.slane %v603_v58, 2  ;;  %v452_v0 = vor.u32 %v451_v57, %v447_v56  ;;  %v669_v14 = vsel %vm327_vm1, %v652_v9, 0  ;;  %v789_v27 = vld [vmem:[%s2714_s1 + $0x28] sm:$0x3] }
  0x2a   : > { %564 = vmatpush.bf16.msra.mxu0 %v555_v59  ;;  %v576_v62 = vrot.slane %v575_v60, 2  ;;  %v751_v15 = vsel %vm327_vm1, %v734_v10, 0  ;;  %v541_v16 = vshrl.u32 %v1996_v11, 16  ;;  %v543_v17 = vshll.u32 %v1996_v11, 16  ;;  %v767_v34 = vld [vmem:[%s2714_s1 + $0x24] sm:$0x3] }
  0x2b   : > { %645 = vmatpush.bf16.msra.mxu3 %v636_v53  ;;  %v609_v1 = vsel %vm327_vm1, %v604_v61, 0  ;;  %v821_v19 = vunpack.c.l.b16 %v819_v18  ;;  %v858_v21 = vunpack.c.l.b16 %v844_v20  ;;  %v572_v28 = vrot.slane %v1996_v11, 1  ;;  %v2001_v36 = vld [vmem:[%s2346_s20 + $0x108] sm:$0xf]  ;;  %v2157_v38 = vld [vmem:[%s2346_s20 + $0x108] sm:$0x30] }
  0x2c   : > { %618 = vmatpush.bf16.msra.mxu2 %v609_v1  ;;  %v581_v4 = vsel %vm327_vm1, %v576_v62, 0  ;;  %v598_v23 = vrot.slane %v541_v16, 1  ;;  %v599_v24 = vrot.slane %v543_v17, 2  ;;  %v545_v30 = vrot.slane %v543_v17, 1  ;;  %v2006_v37 = vld [vmem:[%s2346_s20 + $0x108] sm:$0xf] }
  0x2d   : > { %590 = vmatpush.bf16.msra.mxu1 %v581_v4  ;;  %v822_v22 = vpack.c.b16 %v821_v19, %v821_v19  ;;  %v859_v26 = vpack.c.b16 %v858_v21, %v858_v21  ;;  %v797_v31 = vsel %vm327_vm1, %v789_v27, 0  ;;  %v2016_v39 = vld [vmem:[%s2346_s20 + $0x8] sm:$0xf]  ;;  %v2158_v40 = vld [vmem:[%s2346_s20 + $0x8] sm:$0x30]  ;;  %v773_v41 = vsel %vm327_vm1, %v767_v34, 0 }
  0x2e   : > { %v600_v29 = vor.u32 %v599_v24, %v598_v23  ;;  %v546_v35 = vor.u32 %v545_v30, %v541_v16  ;;  %v2007_v43 = vor.u32 %v2157_v38, %v2006_v37  ;;  %v2450_v44 = vor.u32 %v2158_v40, %v2016_v39  ;;  %v881_v45 = vld [vmem:[%s2714_s1 + $0x24] sm:$0xc]  ;;  %v938_v46 = vld [vmem:[%s2714_s1 + $0x2c] sm:$0xc]  ;;  %v975_v47 = vld [vmem:[%s2714_s1 + $0x30] sm:$0xc] }
  0x2f   : > { %v823_v25 = vrot.slane %v822_v22, 2  ;;  %v860_v33 = vrot.slane %v859_v26, 2  ;;  %v952_v48 = vunpack.c.l.b16 %v938_v46  ;;  %v913_v49 = vld [vmem:[%s2714_s1 + $0x28] sm:$0xc]  ;;  %v884_v50 = vunpack.c.l.b16 %v881_v45  ;;  %v2027_v9 = vld [vmem:[%s2346_s20 + $0x60] sm:$0xf] }
  0x30   : > { %1987 = vmatmul.msk.bf16.vlgmr.msrb.gmra.mxu1 %vm323_vm2, %v452_v0  ;;  %v978_v51 = vunpack.c.l.b16 %v975_v47  ;;  %v915_v52 = vunpack.c.l.b16 %v913_v49  ;;  %v661_v54 = vshll.u32 %v2007_v43, 16  ;;  %v743_v55 = vshll.u32 %v2450_v44, 16  ;;  %v2011_v2 = vld [vmem:[%s2346_s20 + $0x8] sm:$0xf]  ;;  %v2159_v10 = vld [vmem:[%s2346_s20 + $0x60] sm:$0x30] }
  0x31   : > { %1988 = vmatmul.msk.bf16.vlgmr.msrb.gmra.mxu2 %vm323_vm2, %v478_v3  ;;  %700 = vmatpush.bf16.msrb.mxu1 %v691_v7  ;;  %v828_v32 = vsel %vm327_vm1, %v823_v25, 0  ;;  %v865_v42 = vsel %vm327_vm1, %v860_v33, 0  ;;  %v953_v53 = vpack.c.b16 %v952_v48, %v952_v48  ;;  %v885_v57 = vpack.c.b16 %v884_v50, %v884_v50  ;;  %v1035_v20 = vld [vmem:[%s2714_s1 + $0x2c] sm:$0x3]  ;;  %v1056_v22 = vld [vmem:[%s2714_s1 + $0x30] sm:$0x3] }
  0x32   : > { %727 = vmatpush.bf16.msrb.mxu2 %v718_v8  ;;  %v916_v56 = vpack.c.b16 %v915_v52, %v915_v52  ;;  %v979_v59 = vpack.c.b16 %v978_v51, %v978_v51  ;;  %v686_v61 = vrot.slane %v2007_v43, 1  ;;  %v659_v62 = vshrl.u32 %v2007_v43, 16  ;;  %v2022_v23 = vld [vmem:[%s2346_s20 + $0x60] sm:$0xf]  ;;  %v2037_v26 = vld [vmem:[%s2346_s20 + $0xb8] sm:$0xf] }
  0x33   : > { %v954_v58 = vrot.slane %v953_v53, 2  ;;  %v663_v63 = vrot.slane %v661_v54, 1  ;;  %v741_v0 = vshrl.u32 %v2450_v44, 16  ;;  %v745_v1 = vrot.slane %v743_v55, 1  ;;  %v2160_v27 = vld [vmem:[%s2346_s20 + $0xb8] sm:$0x30] }
  0x34   : > { %v917_v60 = vrot.slane %v916_v56, 2  ;;  %v886_v4 = vrot.slane %v885_v57, 2  ;;  %v980_v6 = vrot.slane %v979_v59, 2  ;;  %v791_v17 = vrot.slane %v743_v55, 2  ;;  %v1138_v40 = vld [vmem:[%s2714_s1 + $0x3c] sm:$0x3] }
  0x35   : > { %1982 = vmatmul.msk.bf16.vlgmr.msrb.gmra.mxu0 %vm323_vm2, %v1980_v12  ;;  %1992 = vmatmul.msk.bf16.vlgmr.msrb.gmra.mxu3 %vm323_vm2, %v1990_v13  ;;  %v959_v5 = vsel %vm327_vm1, %v954_v58, 0  ;;  %v664_v7 = vor.u32 %v663_v63, %v659_v62  ;;  %v746_v8 = vor.u32 %v745_v1, %v741_v0  ;;  %v2028_v13 = vor.u32 %v2159_v10, %v2027_v9  ;;  %v2032_v43 = vld [vmem:[%s2346_s20 + $0xb8] sm:$0xf]  ;;  %v2161_v45 = vld [vmem:[%s2346_s20 + $0x110] sm:$0x30] }
  0x36   : > { %678 = vmatpush.bf16.msrb.mxu0 %v669_v14  ;;  %760 = vmatpush.bf16.msrb.mxu3 %v751_v15  ;;  %v922_v3 = vsel %vm327_vm1, %v917_v60, 0  ;;  %v891_v11 = vsel %vm327_vm1, %v886_v4, 0  ;;  %v985_v12 = vsel %vm327_vm1, %v980_v6, 0  ;;  %v1001_v14 = vld [vmem:[%s2714_s1 + $0x34] sm:$0xc]  ;;  %v790_v16 = vrot.slane %v741_v0, 1 }
  0x37   : > { %v1006_v15 = vunpack.c.l.b16 %v1001_v14  ;;  %v853_v18 = vshll.u32 %v2028_v13, 16  ;;  %v851_v24 = vshrl.u32 %v2028_v13, 16  ;;  %v1073_v30 = vsel %vm327_vm1, %v1056_v22, 0  ;;  %v1117_v49 = vld [vmem:[%s2714_s1 + $0x38] sm:$0x3] }
  0x38   : > { %v792_v21 = vor.u32 %v791_v17, %v790_v16  ;;  %v2038_v34 = vor.u32 %v2160_v27, %v2037_v26  ;;  %v1155_v46 = vsel %vm327_vm1, %v1138_v40, 0  ;;  %v1193_v50 = vld [vmem:[%s2714_s1 + $0x44] sm:$0x3]  ;;  %v882_v51 = vrot.slane %v2028_v13, 1  ;;  %v1223_v56 = vld [vmem:[%s2714_s1 + $0x38] sm:$0xc] }
  0x39   : > { %v1007_v19 = vpack.c.b16 %v1006_v15, %v1006_v15  ;;  %v855_v25 = vrot.slane %v853_v18, 1  ;;  %v1122_v53 = vsel %vm327_vm1, %v1117_v49, 0  ;;  %v1201_v54 = vsel %vm327_vm1, %v1193_v50, 0  ;;  %v1285_v57 = vld [vmem:[%s2714_s1 + $0x40] sm:$0xc] }
  0x3a   : > { %v947_v37 = vshll.u32 %v2038_v34, 16  ;;  %v945_v38 = vshrl.u32 %v2038_v34, 16  ;;  %v976_v52 = vrot.slane %v2038_v34, 1  ;;  %v1317_v58 = vld [vmem:[%s2714_s1 + $0x44] sm:$0xc]  ;;  %v1288_v59 = vunpack.c.l.b16 %v1285_v57 }
  0x3b   : > { %v856_v33 = vor.u32 %v855_v25, %v851_v24  ;;  %v1248_v60 = vld [vmem:[%s2714_s1 + $0x3c] sm:$0xc]  ;;  %v1319_v62 = vunpack.c.l.b16 %v1317_v58  ;;  %v2162_v14 = vld [vmem:[%s2346_s20 + $0x10] sm:$0x30]  ;;  %v1493_v57 = vld [vmem:[%s2714_s1 + $0x50] sm:$0x3] }
  0x3c   : > { %v949_v39 = vrot.slane %v947_v37, 1  ;;  %v1262_v63 = vunpack.c.l.b16 %v1248_v60  ;;  %v1289_v0 = vpack.c.b16 %v1288_v59, %v1288_v59  ;;  %v1002_v9 = vrot.slane %v945_v38, 1  ;;  %v2079_v60 = vld [vmem:[%s2346_s20 + $0xc0] sm:$0xf] }
  0x3d   : > { %v1320_v6 = vpack.c.b16 %v1319_v62, %v1319_v62  ;;  %v1003_v10 = vrot.slane %v947_v37, 2  ;;  %v2069_v37 = vld [vmem:[%s2346_s20 + $0x68] sm:$0xf]  ;;  %v1499_v62 = vsel %vm327_vm1, %v1493_v57, 0  ;;  %vm1839_vm4 = vcmask 1040384  }
  0x3f   : > { %v1321_v17 = vrot.slane %v1320_v6, 2  ;;  %v1004_v18 = vor.u32 %v1003_v10, %v1002_v9 }
  0x40   : > { %1998 = vmatmul.msk.bf16.vlgmr.msra.gmra.mxu1 %vm323_vm2, %v572_v28  ;;  %v1040_v28 = vsel %vm327_vm1, %v1035_v20, 0 }
  0x41   : > { %1999 = vmatmul.msk.bf16.vlgmr.msra.gmra.mxu2 %vm323_vm2, %v600_v29  ;;  %806 = vmatpush.bf16.msra.mxu1 %v797_v31  ;;  %v1008_v29 = vrot.slane %v1007_v19, 2  ;;  %v1089_v31 = vld [vmem:[%s2714_s1 + $0x34] sm:$0x3]  ;;  %v1326_v22 = vsel %vm327_vm1, %v1321_v17, 0 }
  0x42   : > { %837 = vmatpush.bf16.msra.mxu2 %v828_v32  ;;  %v768_v32 = vrot.slane %v2450_v44, 1  ;;  %v2048_v44 = vld [vmem:[%s2346_s20 + $0x110] sm:$0xf] }
  0x43   : > { %v2049_v48 = vor.u32 %v2161_v45, %v2048_v44  ;;  %v1439_v45 = vld [vmem:[%s2714_s1 + $0x48] sm:$0x3] }
  0x44   : > { %v1444_v50 = vsel %vm327_vm1, %v1439_v45, 0 }
  0x45   : > { %1997 = vmatmul.msk.bf16.vlgmr.msra.gmra.mxu0 %vm323_vm2, %v546_v35  ;;  %2003 = vmatmul.msk.bf16.vlgmr.msra.gmra.mxu3 %vm323_vm2, %v2001_v36  ;;  %v1013_v35 = vsel %vm327_vm1, %v1008_v29, 0  ;;  %v1095_v36 = vsel %vm327_vm1, %v1089_v31, 0  ;;  %v1065_v55 = vshll.u32 %v2049_v48, 16  ;;  %v1063_v1 = vshrl.u32 %v2049_v48, 16 }
  0x46   : > { %782 = vmatpush.bf16.msra.mxu0 %v773_v41  ;;  %874 = vmatpush.bf16.msra.mxu3 %v865_v42  ;;  %v1171_v41 = vld [vmem:[%s2714_s1 + $0x40] sm:$0x3]  ;;  %v950_v42 = vor.u32 %v949_v39, %v945_v38  ;;  %v1090_v19 = vrot.slane %v2049_v48, 1  ;;  %v2163_v38 = vld [vmem:[%s2346_s20 + $0x68] sm:$0x30] }
  0x47   : > { %v1177_v47 = vsel %vm327_vm1, %v1171_v41, 0  ;;  %v2070_v44 = vor.u32 %v2163_v38, %v2069_v37  ;;  %v2053_v48 = vld [vmem:[%s2346_s20 + $0x10] sm:$0xf]  ;;  %v2085_v38 = vld [vmem:[%s2346_s20 + $0x118] sm:$0xf] }
  0x49   : > { %v1286_v59 = vrot.slane %v2070_v44, 1 }
  0x50   : > { %2009 = vmatmul.msk.bf16.vlgmr.msrb.gmra.mxu1 %vm323_vm2, %v686_v61  ;;  %v1225_v61 = vunpack.c.l.b16 %v1223_v56  ;;  %v1521_v56 = vld [vmem:[%s2714_s1 + $0x54] sm:$0x3] }
  0x51   : > { %2013 = vmatmul.msk.bf16.vlgmr.msrb.gmra.mxu2 %vm323_vm2, %v2011_v2  ;;  %931 = vmatpush.bf16.msrb.mxu1 %v922_v3  ;;  %v1067_v2 = vrot.slane %v1065_v55, 1  ;;  %v1263_v3 = vpack.c.b16 %v1262_v63, %v1262_v63  ;;  %v1526_v63 = vsel %vm327_vm1, %v1521_v56, 0 }
  0x52   : > { %968 = vmatpush.bf16.msrb.mxu2 %v959_v5  ;;  %v1226_v4 = vpack.c.b16 %v1225_v61, %v1225_v61  ;;  %v1290_v5 = vrot.slane %v1289_v0, 2  ;;  %v2164_v61 = vld [vmem:[%s2346_s20 + $0xc0] sm:$0x30]  ;;  %v1460_v0 = vld [vmem:[%s2714_s1 + $0x4c] sm:$0x3] }
  0x54   : > { %v1227_v15 = vrot.slane %v1226_v4, 2  ;;  %v1295_v16 = vsel %vm327_vm1, %v1290_v5, 0  ;;  %v2064_v4 = vld [vmem:[%s2346_s20 + $0x68] sm:$0xf]  ;;  %v2074_v5 = vld [vmem:[%s2346_s20 + $0xc0] sm:$0xf] }
  0x55   : > { %2008 = vmatmul.msk.bf16.vlgmr.msrb.gmra.mxu0 %vm323_vm2, %v664_v7  ;;  %2018 = vmatmul.msk.bf16.vlgmr.msrb.gmra.mxu3 %vm323_vm2, %v746_v8  ;;  %v1264_v7 = vrot.slane %v1263_v3, 2  ;;  %v1068_v8 = vor.u32 %v1067_v2, %v1063_v1  ;;  %v1542_v1 = vld [vmem:[%s2714_s1 + $0x58] sm:$0x3]  ;;  %v2080_v2 = vor.u32 %v2164_v61, %v2079_v60 }
  0x56   : > { %900 = vmatpush.bf16.msrb.mxu0 %v891_v11  ;;  %994 = vmatpush.bf16.msrb.mxu3 %v985_v12  ;;  %v2043_v11 = vld [vmem:[%s2346_s20 + $0x110] sm:$0xf] }
  0x57   : > { %v2058_v12 = vld [vmem:[%s2346_s20 + $0x10] sm:$0xf]  ;;  %v1269_v13 = vsel %vm327_vm1, %v1264_v7, 0  ;;  %v1477_v7 = vsel %vm327_vm1, %v1460_v0, 0 }
  0x58   : > { %v2059_v20 = vor.u32 %v2162_v14, %v2058_v12  ;;  %v1349_v12 = vshrl.u32 %v2080_v2, 16 }
  0x5a   : > { %v1147_v24 = vshll.u32 %v2059_v20, 16  ;;  %v1145_v26 = vshrl.u32 %v2059_v20, 16  ;;  %v1406_v17 = vrot.slane %v1349_v12, 1 }
  0x5c   : > { %v1149_v27 = vrot.slane %v1147_v24, 1 }
  0x5e   : > { %v1150_v34 = vor.u32 %v1149_v27, %v1145_v26 }
  0x60   : > { %2020 = vmatmul.msk.bf16.vlgmr.msra.gmra.mxu1 %vm323_vm2, %v792_v21  ;;  %v1232_v21 = vsel %vm327_vm1, %v1227_v15, 0  ;;  %v1627_v15 = vld [vmem:[%s2714_s1 + $0x54] sm:$0xc] }
  0x61   : > { %2024 = vmatmul.msk.bf16.vlgmr.msra.gmra.mxu2 %vm323_vm2, %v2022_v23  ;;  %1049 = vmatpush.bf16.msra.mxu1 %v1040_v28  ;;  %v1342_v23 = vld [vmem:[%s2714_s1 + $0x48] sm:$0xc]  ;;  %v1405_v28 = vld [vmem:[%s2714_s1 + $0x50] sm:$0xc] }
  0x62   : > { %1082 = vmatpush.bf16.msra.mxu2 %v1073_v30  ;;  %v1356_v25 = vunpack.c.l.b16 %v1342_v23  ;;  %v1410_v29 = vunpack.c.l.b16 %v1405_v28 }
  0x64   : > { %v1357_v30 = vpack.c.b16 %v1356_v25, %v1356_v25  ;;  %v1411_v31 = vpack.c.b16 %v1410_v29, %v1410_v29  ;;  %v1380_v25 = vrot.slane %v2080_v2, 1 }
  0x65   : > { %2019 = vmatmul.msk.bf16.vlgmr.msra.gmra.mxu0 %vm323_vm2, %v768_v32  ;;  %2029 = vmatmul.msk.bf16.vlgmr.msra.gmra.mxu3 %vm323_vm2, %v856_v33  ;;  %v1172_v32 = vrot.slane %v2059_v20, 1  ;;  %v1194_v33 = vrot.slane %v1145_v26, 1  ;;  %v1597_v26 = vld [vmem:[%s2714_s1 + $0x60] sm:$0x3] }
  0x66   : > { %1022 = vmatpush.bf16.msra.mxu0 %v1013_v35  ;;  %1104 = vmatpush.bf16.msra.mxu3 %v1095_v36  ;;  %v1379_v35 = vld [vmem:[%s2714_s1 + $0x4c] sm:$0xc]  ;;  %v1195_v36 = vrot.slane %v1147_v24, 2  ;;  %v1412_v39 = vrot.slane %v1411_v31, 2  ;;  %v1358_v41 = vrot.slane %v1357_v30, 2 }
  0x67   : > { %v1382_v40 = vunpack.c.l.b16 %v1379_v35 }
  0x68   : > { %v1363_v49 = vsel %vm327_vm1, %v1358_v41, 0  ;;  %v2165_v41 = vld [vmem:[%s2346_s20 + $0x118] sm:$0x30] }
  0x70   : > { %2034 = vmatmul.msk.bf16.vlgmr.msrb.gmra.mxu1 %vm323_vm2, %v2032_v43  ;;  %v1383_v43 = vpack.c.b16 %v1382_v40, %v1382_v40 }
  0x71   : > { %2039 = vmatmul.msk.bf16.vlgmr.msrb.gmra.mxu2 %vm323_vm2, %v950_v42  ;;  %1164 = vmatpush.bf16.msrb.mxu1 %v1155_v46  ;;  %v1417_v42 = vsel %vm327_vm1, %v1412_v39, 0  ;;  %v1196_v46 = vor.u32 %v1195_v36, %v1194_v33  ;;  %v1575_v36 = vld [vmem:[%s2714_s1 + $0x5c] sm:$0x3]  ;;  %v2090_v39 = vld [vmem:[%s2346_s20 + $0x118] sm:$0xf] }
  0x72   : > { %1186 = vmatpush.bf16.msrb.mxu2 %v1177_v47  ;;  %v1384_v47 = vrot.slane %v1383_v43, 2  ;;  %v2166_v43 = vld [vmem:[%s2346_s20 + $0x18] sm:$0x30]  ;;  %v1581_v45 = vsel %vm327_vm1, %v1575_v36, 0 }
  0x75   : > { %2030 = vmatmul.msk.bf16.vlgmr.msrb.gmra.mxu0 %vm323_vm2, %v882_v51  ;;  %2040 = vmatmul.msk.bf16.vlgmr.msrb.gmra.mxu3 %vm323_vm2, %v976_v52  ;;  %v1389_v51 = vsel %vm327_vm1, %v1384_v47, 0  ;;  %v1257_v52 = vshll.u32 %v2070_v44, 16 }
  0x76   : > { %1131 = vmatpush.bf16.msrb.mxu0 %v1122_v53  ;;  %1210 = vmatpush.bf16.msrb.mxu3 %v1201_v54  ;;  %v1255_v53 = vshrl.u32 %v2070_v44, 16 }
  0x77   : > { %v1259_v54 = vrot.slane %v1257_v52, 1  ;;  %v1689_v52 = vld [vmem:[%s2714_s1 + $0x5c] sm:$0xc] }
  0x79   : > { %v1260_v55 = vor.u32 %v1259_v54, %v1255_v53  ;;  %v1692_v54 = vunpack.c.l.b16 %v1689_v52 }
  0x7b   : > { %v1693_v60 = vpack.c.b16 %v1692_v54, %v1692_v54 }
  0x80   : > { %2045 = vmatmul.msk.bf16.vlgmr.msra.gmra.mxu1 %vm323_vm2, %v2043_v11 }
  0x81   : > { %2050 = vmatmul.msk.bf16.vlgmr.msra.gmra.mxu2 %vm323_vm2, %v1068_v8  ;;  %1278 = vmatpush.bf16.msra.mxu1 %v1269_v13  ;;  %v1559_v8 = vsel %vm327_vm1, %v1542_v1, 0  ;;  %v1351_v13 = vshll.u32 %v2080_v2, 16 }
  0x82   : > { %1304 = vmatpush.bf16.msra.mxu2 %v1295_v16 }
  0x83   : > { %v1353_v29 = vrot.slane %v1351_v13, 1 }
  0x85   : > { %2041 = vmatmul.msk.bf16.vlgmr.msra.gmra.mxu0 %vm323_vm2, %v1004_v18  ;;  %2051 = vmatmul.msk.bf16.vlgmr.msra.gmra.mxu3 %vm323_vm2, %v1090_v19  ;;  %v1407_v18 = vrot.slane %v1351_v13, 2  ;;  %v1629_v19 = vunpack.c.l.b16 %v1627_v15  ;;  %v1354_v37 = vor.u32 %v1353_v29, %v1349_v12 }
  0x86   : > { %1241 = vmatpush.bf16.msra.mxu0 %v1232_v21  ;;  %1335 = vmatpush.bf16.msra.mxu3 %v1326_v22  ;;  %v1652_v21 = vld [vmem:[%s2714_s1 + $0x58] sm:$0xc] }
  0x87   : > { %v1630_v22 = vpack.c.b16 %v1629_v19, %v1629_v19  ;;  %v1666_v23 = vunpack.c.l.b16 %v1652_v21  ;;  %v1408_v27 = vor.u32 %v1407_v18, %v1406_v17 }
  0x89   : > { %v1631_v30 = vrot.slane %v1630_v22, 2  ;;  %v1667_v31 = vpack.c.b16 %v1666_v23, %v1666_v23 }
  0x8b   : > { %v1636_v33 = vsel %vm327_vm1, %v1631_v30, 0  ;;  %v2106_v30 = vld [vmem:[%s2346_s20 + $0x70] sm:$0xf] }
  0x90   : > { %2060 = vmatmul.msk.bf16.vlgmr.msrb.gmra.mxu1 %vm323_vm2, %v1150_v34  ;;  %v1668_v34 = vrot.slane %v1667_v31, 2 }
  0x91   : > { %2061 = vmatmul.msk.bf16.vlgmr.msrb.gmra.mxu2 %vm323_vm2, %v1172_v32  ;;  %1398 = vmatpush.bf16.msrb.mxu1 %v1389_v51  ;;  %v1605_v32 = vsel %vm327_vm1, %v1597_v26, 0 }
  0x92   : > { %1426 = vmatpush.bf16.msrb.mxu2 %v1417_v42  ;;  %v2100_v42 = vld [vmem:[%s2346_s20 + $0x18] sm:$0xf] }
  0x93   : > { %v2101_v51 = vor.u32 %v2166_v43, %v2100_v42 }
  0x95   : > { %2055 = vmatmul.msk.bf16.vlgmr.msrb.gmra.mxu0 %vm323_vm2, %v2053_v48  ;;  %2062 = vmatmul.msk.bf16.vlgmr.msrb.gmra.mxu3 %vm323_vm2, %v1196_v46  ;;  %v1673_v46 = vsel %vm327_vm1, %v1668_v34, 0  ;;  %v1549_v2 = vshrl.u32 %v2101_v51, 16 }
  0x96   : > { %1372 = vmatpush.bf16.msrb.mxu0 %v1363_v49  ;;  %1453 = vmatpush.bf16.msrb.mxu3 %v1444_v50  ;;  %v2091_v50 = vor.u32 %v2165_v41, %v2090_v39 }
  0x98   : > { %v1469_v57 = vshll.u32 %v2091_v50, 16  ;;  %v1467_v0 = vshrl.u32 %v2091_v50, 16 }
  0x9a   : > { %v1471_v1 = vrot.slane %v1469_v57, 1 }
  0x9d   : > { %v359_v58 = vpop.f32.mrf.mxu1 }
  0xa0   : > { %2071 = vmatmul.msk.bf16.vlgmr.msra.gmra.mxu1 %vm323_vm2, %v1260_v55 }
  0xa1   : > { %2072 = vmatmul.msk.bf16.vlgmr.msra.gmra.mxu2 %vm323_vm2, %v1286_v59  ;;  %1508 = vmatpush.bf16.msra.mxu1 %v1499_v62  ;;  %v1494_v62 = vrot.slane %v2091_v50, 1 }
  0xa2   : > { %v340_v3 = vpop.f32.mrf.mxu0  ;;  %1535 = vmatpush.bf16.msra.mxu2 %v1526_v63 }
  0xa3   : > { %v360_v6 = vadd.f32 %v359_v58, %v340_v3  ;;  %v1551_v58 = vshll.u32 %v2101_v51, 16 }
  0xa4   : > { %v380_v9 = vpop.f32.mrf.mxu2 }
  0xa5   : > { %v384_v10 = vadd.f32 %v380_v9, %v360_v6  ;;  %2066 = vmatmul.msk.bf16.vlgmr.msra.gmra.mxu0 %vm323_vm2, %v2064_v4  ;;  %2076 = vmatmul.msk.bf16.vlgmr.msra.gmra.mxu3 %vm323_vm2, %v2074_v5  ;;  %v361_v11 = vpop.f32.mrf.mxu1  ;;  %v1553_v3 = vrot.slane %v1551_v58, 1  ;;  %v2095_v4 = vld [vmem:[%s2346_s20 + $0x18] sm:$0xf]  ;;  %v1694_v5 = vrot.slane %v1693_v60, 2  ;;  %v1599_v21 = vrot.slane %v1551_v58, 2 }
  0xa6   : > { %1486 = vmatpush.bf16.msra.mxu0 %v1477_v7  ;;  %1568 = vmatpush.bf16.msra.mxu3 %v1559_v8  ;;  %v1472_v7 = vor.u32 %v1471_v1, %v1467_v0  ;;  %v2167_v11 = vld [vmem:[%s2346_s20 + $0x70] sm:$0x30] }
  0xa7   : > { %v1554_v8 = vor.u32 %v1553_v3, %v1549_v2  ;;  %v1699_v13 = vsel %vm327_vm1, %v1694_v5, 0 }
  0xa8   : > { %v404_v14 = vpop.f32.mrf.mxu3 }
  0xa9   : > { %v408_v16 = vadd.f32 %v404_v14, %v384_v10  ;;  %v2111_v10 = vld [vmem:[%s2346_s20 + $0x70] sm:$0xf] }
  0xaa   : > { %v342_v20 = vpop.f32.mrf.mxu0  ;;  %v2112_v17 = vor.u32 %v2167_v11, %v2111_v10 }
  0xab   : > { %v1598_v20 = vrot.slane %v1549_v2, 1 }
  0xac   : > { %v382_v24 = vpop.f32.mrf.mxu2  ;;  %v1661_v23 = vshll.u32 %v2112_v17, 16 }
  0xad   : > { %v472_v28 = vpop.f32.mrf.mxu1  ;;  %v1600_v26 = vor.u32 %v1599_v21, %v1598_v20 }
  0xae   : > { %v1663_v29 = vrot.slane %v1661_v23, 1 }
  0xb0   : > { %v406_v35 = vpop.f32.mrf.mxu3  ;;  %2082 = vmatmul.msk.bf16.vlgmr.msrb.gmra.mxu1 %vm323_vm2, %v1380_v25 }
  0xb1   : > { %2083 = vmatmul.msk.bf16.vlgmr.msrb.gmra.mxu2 %vm323_vm2, %v1408_v27  ;;  %1614 = vmatpush.bf16.msrb.mxu1 %v1605_v32  ;;  %v1576_v32 = vrot.slane %v2101_v51, 1 }
  0xb2   : > { %v435_v40 = vpop.f32.mrf.mxu0  ;;  %1645 = vmatpush.bf16.msrb.mxu2 %v1636_v33 }
  0xb3   : > { %v439_v44 = vadd.f32 %v435_v40, %v408_v16 }
  0xb4   : > { %v498_v47 = vpop.f32.mrf.mxu2 }
  0xb5   : > { %v476_v48 = vadd.f32 %v472_v28, %v439_v44  ;;  %2081 = vmatmul.msk.bf16.vlgmr.msrb.gmra.mxu0 %vm323_vm2, %v1354_v37  ;;  %2087 = vmatmul.msk.bf16.vlgmr.msrb.gmra.mxu3 %vm323_vm2, %v2085_v38  ;;  %v474_v49 = vpop.f32.mrf.mxu1  ;;  %v1659_v28 = vshrl.u32 %v2112_v17, 16 }
  0xb6   : > { %1590 = vmatpush.bf16.msrb.mxu0 %v1581_v45  ;;  %1682 = vmatpush.bf16.msrb.mxu3 %v1673_v46  ;;  %v1690_v46 = vrot.slane %v2112_v17, 1 }
  0xb7   : > { %v502_v53 = vadd.f32 %v498_v47, %v476_v48  ;;  %v1664_v33 = vor.u32 %v1663_v29, %v1659_v28 }
  0xb8   : > { %v529_v55 = vpop.f32.mrf.mxu3 }
  0xb9   : > { %v533_v56 = vadd.f32 %v529_v55, %v502_v53 }
  0xba   : > { %v437_v59 = vpop.f32.mrf.mxu0 }
  0xbc   : > { %v500_v61 = vpop.f32.mrf.mxu2 }
  0xbd   : > { %v592_v63 = vpop.f32.mrf.mxu1 }
  0xc0   : > { %v531_v6 = vpop.f32.mrf.mxu3  ;;  %2093 = vmatmul.msk.bf16.vlgmr.msra.gmra.mxu1 %vm323_vm2, %v1494_v62 }
  0xc1   : > { %2097 = vmatmul.msk.bf16.vlgmr.msra.gmra.mxu2 %vm323_vm2, %v2095_v4 }
  0xc2   : > { %v566_v9 = vpop.f32.mrf.mxu0 }
  0xc3   : > { %v570_v12 = vadd.f32 %v566_v9, %v533_v56 }
  0xc4   : > { %v620_v14 = vpop.f32.mrf.mxu2 }
  0xc5   : > { %v596_v15 = vadd.f32 %v592_v63, %v570_v12  ;;  %2092 = vmatmul.msk.bf16.vlgmr.msra.gmra.mxu0 %vm323_vm2, %v1472_v7  ;;  %2102 = vmatmul.msk.bf16.vlgmr.msra.gmra.mxu3 %vm323_vm2, %v1554_v8  ;;  %v594_v16 = vpop.f32.mrf.mxu1 }
  0xc6   : > { %1708 = vmatpush.bf16.msra.mxu0 %v1699_v13 }
  0xc7   : > { %v624_v18 = vadd.f32 %v620_v14, %v596_v15 }
  0xc8   : > { %v647_v19 = vpop.f32.mrf.mxu3 }
  0xc9   : > { %v651_v22 = vadd.f32 %v647_v19, %v624_v18 }
  0xca   : > { %v568_v24 = vpop.f32.mrf.mxu0 }
  0xcc   : > { %v622_v25 = vpop.f32.mrf.mxu2 }
  0xcd   : > { %v702_v27 = vpop.f32.mrf.mxu1 }
  0xd0   : > { %v649_v31 = vpop.f32.mrf.mxu3  ;;  %2104 = vmatmul.msk.bf16.vlgmr.msrb.gmra.mxu1 %vm323_vm2, %v1600_v26 }
  0xd1   : > { %2108 = vmatmul.msk.bf16.vlgmr.msrb.gmra.mxu2 %vm323_vm2, %v2106_v30 }
  0xd2   : > { %v680_v34 = vpop.f32.mrf.mxu0 }
  0xd3   : > { %v684_v35 = vadd.f32 %v680_v34, %v651_v22 }
  0xd4   : > { %v729_v36 = vpop.f32.mrf.mxu2 }
  0xd5   : > { %v706_v37 = vadd.f32 %v702_v27, %v684_v35  ;;  %2103 = vmatmul.msk.bf16.vlgmr.msrb.gmra.mxu0 %vm323_vm2, %v1576_v32  ;;  %2113 = vmatmul.msk.bf16.vlgmr.msrb.gmra.mxu3 %vm323_vm2, %v1664_v33  ;;  %v704_v38 = vpop.f32.mrf.mxu1 }
  0xd7   : > { %v733_v39 = vadd.f32 %v729_v36, %v706_v37 }
  0xd8   : > { %v762_v40 = vpop.f32.mrf.mxu3 }
  0xd9   : > { %v766_v41 = vadd.f32 %v762_v40, %v733_v39 }
  0xda   : > { %v682_v42 = vpop.f32.mrf.mxu0 }
  0xdc   : > { %v731_v43 = vpop.f32.mrf.mxu2 }
  0xdd   : > { %v808_v44 = vpop.f32.mrf.mxu1 }
  0xe0   : > { %v764_v45 = vpop.f32.mrf.mxu3 }
  0xe2   : > { %v784_v47 = vpop.f32.mrf.mxu0 }
  0xe3   : > { %v788_v48 = vadd.f32 %v784_v47, %v766_v41 }
  0xe4   : > { %v839_v49 = vpop.f32.mrf.mxu2 }
  0xe5   : > { %v812_v50 = vadd.f32 %v808_v44, %v788_v48  ;;  %2114 = vmatmul.msk.bf16.vlgmr.msra.gmra.mxu0 %vm323_vm2, %v1690_v46  ;;  %v810_v51 = vpop.f32.mrf.mxu1 }
  0xe7   : > { %v843_v52 = vadd.f32 %v839_v49, %v812_v50  ;;  %v2174_v49 = vld [vmem:[%s2717_s4 + $0x34] sm:$0xf]  ;;  %v2143_v50 = vld [vmem:[%s2717_s4 + $0x38] sm:$0xf0] }
  0xe8   : > { %v876_v53 = vpop.f32.mrf.mxu3  ;;  %v2146_v51 = vor.u32 %v2174_v49, %v2143_v50 }
  0xe9   : > { %v880_v54 = vadd.f32 %v876_v53, %v843_v52  ;;  %v2141_v52 = vld [vmem:[%s2717_s4 + $0x30] sm:$0xf]  ;;  %v2175_v53 = vld [vmem:[%s2717_s4 + $0x34] sm:$0xf0] }
  0xea   : > { %v786_v55 = vpop.f32.mrf.mxu0  ;;  %1796 = vmatpush.bf16.msra.mxu2 %v2146_v51 }
  0xeb   : > { %v2142_v55 = vor.u32 %v2175_v53, %v2141_v52 }
  0xec   : > { %v841_v56 = vpop.f32.mrf.mxu2 }
  0xed   : > { %v933_v57 = vpop.f32.mrf.mxu1  ;;  %1783 = vmatpush.bf16.msra.mxu1 %v2142_v55 }
  0xf0   : > { %v878_v58 = vpop.f32.mrf.mxu3 }
  0xf1   : > { %v2172_v58 = vld [vmem:[%s2717_s4 + $0x24] sm:$0xf] }
  0xf2   : > { %v902_v59 = vpop.f32.mrf.mxu0 }
  0xf3   : > { %v906_v3 = vadd.f32 %v902_v59, %v880_v54  ;;  %v2135_v59 = vld [vmem:[%s2717_s4 + $0x28] sm:$0xf0] }
  0xf4   : > { %v970_v60 = vpop.f32.mrf.mxu2 }
  0xf5   : > { %v935_v61 = vpop.f32.mrf.mxu1  ;;  %v937_v6 = vadd.f32 %v933_v57, %v906_v3  ;;  %v2170_v3 = vld [vmem:[%s2717_s4 + $0x14] sm:$0xf] }
  0xf7   : > { %v974_v9 = vadd.f32 %v970_v60, %v937_v6  ;;  %v2133_v60 = vld [vmem:[%s2717_s4 + $0x20] sm:$0xf] }
  0xf8   : > { %v996_v62 = vpop.f32.mrf.mxu3 }
  0xf9   : > { %v1000_v12 = vadd.f32 %v996_v62, %v974_v9  ;;  %v2138_v62 = vor.u32 %v2172_v58, %v2135_v59 }
  0xfa   : > { %v904_v63 = vpop.f32.mrf.mxu0 }
  0xfb   : > { %v2173_v63 = vld [vmem:[%s2717_s4 + $0x24] sm:$0xf0]  ;;  %1797 = vmatpush.bf16.msra.mxu2 %v2138_v62 }
  0xfc   : > { %v972_v0 = vpop.f32.mrf.mxu2 }
  0xfd   : > { %v1051_v1 = vpop.f32.mrf.mxu1 }
 0x100   : > { %v998_v2 = vpop.f32.mrf.mxu3 }
 0x102   : > { %v1024_v4 = vpop.f32.mrf.mxu0 }
 0x103   : > { %v1028_v14 = vadd.f32 %v1024_v4, %v1000_v12  ;;  %v2127_v4 = vld [vmem:[%s2717_s4 + $0x18] sm:$0xf0] }
 0x104   : > { %v1084_v5 = vpop.f32.mrf.mxu2  ;;  %v2130_v6 = vor.u32 %v2170_v3, %v2127_v4 }
 0x105   : > { %v1053_v7 = vpop.f32.mrf.mxu1  ;;  %v1055_v17 = vadd.f32 %v1051_v1, %v1028_v14  ;;  %v2134_v1 = vor.u32 %v2173_v63, %v2133_v60  ;;  %v2119_v14 = vld [vmem:[%s2717_s4 + $0x8] sm:$0xf0] }
 0x106   : > { %v2125_v7 = vld [vmem:[%s2717_s4 + $0x10] sm:$0xf]  ;;  %1798 = vmatpush.bf16.msra.mxu2 %v2130_v6 }
 0x107   : > { %v1088_v20 = vadd.f32 %v1084_v5, %v1055_v17  ;;  %1784 = vmatpush.bf16.msra.mxu1 %v2134_v1 }
 0x108   : > { %v1106_v8 = vpop.f32.mrf.mxu3 }
 0x109   : > { %v1110_v23 = vadd.f32 %v1106_v8, %v1088_v20  ;;  %v2171_v8 = vld [vmem:[%s2717_s4 + $0x14] sm:$0xf0] }
 0x10a   : > { %v1026_v10 = vpop.f32.mrf.mxu0 }
 0x10c   : > { %v1086_v11 = vpop.f32.mrf.mxu2 }
 0x10d   : > { %v1166_v13 = vpop.f32.mrf.mxu1  ;;  %v2126_v11 = vor.u32 %v2171_v8, %v2125_v7 }
 0x10f   : > { %1785 = vmatpush.bf16.msra.mxu1 %v2126_v11 }
 0x110   : > { %v1108_v15 = vpop.f32.mrf.mxu3 }
 0x111   : > { %v2117_v15 = vld [vmem:[%s2717_s4] sm:$0xf] }
 0x112   : > { %v1133_v16 = vpop.f32.mrf.mxu0 }
 0x113   : > { %v1137_v25 = vadd.f32 %v1133_v16, %v1110_v23 }
 0x114   : > { %v1188_v18 = vpop.f32.mrf.mxu2 }
 0x115   : > { %v1168_v19 = vpop.f32.mrf.mxu1  ;;  %v1170_v28 = vadd.f32 %v1166_v13, %v1137_v25  ;;  %v2168_v13 = vld [vmem:[%s2717_s4 + $0x4] sm:$0xf] }
 0x116   : > { %v2122_v17 = vor.u32 %v2168_v13, %v2119_v14 }
 0x117   : > { %v1192_v31 = vadd.f32 %v1188_v18, %v1170_v28  ;;  %v2169_v18 = vld [vmem:[%s2717_s4 + $0x4] sm:$0xf0] }
 0x118   : > { %v1212_v21 = vpop.f32.mrf.mxu3  ;;  %v2118_v19 = vor.u32 %v2169_v18, %v2117_v15  ;;  %1799 = vmatpush.bf16.msra.mxu2 %v2122_v17 }
 0x119   : > { %v1216_v34 = vadd.f32 %v1212_v21, %v1192_v31 }
 0x11a   : > { %v1135_v22 = vpop.f32.mrf.mxu0  ;;  %1786 = vmatpush.bf16.msra.mxu1 %v2118_v19 }
 0x11c   : > { %v1190_v24 = vpop.f32.mrf.mxu2 }
 0x11d   : > { %v1280_v26 = vpop.f32.mrf.mxu1 }
 0x120   : > { %v1214_v27 = vpop.f32.mrf.mxu3 }
 0x122   : > { %v1243_v29 = vpop.f32.mrf.mxu0 }
 0x123   : > { %v1247_v36 = vadd.f32 %v1243_v29, %v1216_v34 }
 0x124   : > { %v1306_v30 = vpop.f32.mrf.mxu2 }
 0x125   : > { %v1282_v32 = vpop.f32.mrf.mxu1  ;;  %v1284_v39 = vadd.f32 %v1280_v26, %v1247_v36 }
 0x127   : > { %v1310_v42 = vadd.f32 %v1306_v30, %v1284_v39 }
 0x128   : > { %v1337_v33 = vpop.f32.mrf.mxu3 }
 0x129   : > { %v1341_v45 = vadd.f32 %v1337_v33, %v1310_v42 }
 0x12a   : > { %v1245_v35 = vpop.f32.mrf.mxu0 }
 0x12c   : > { %v1308_v37 = vpop.f32.mrf.mxu2 }
 0x12d   : > { %v1400_v38 = vpop.f32.mrf.mxu1 }
 0x130   : > { %v1339_v40 = vpop.f32.mrf.mxu3 }
 0x132   : > { %v1374_v41 = vpop.f32.mrf.mxu0 }
 0x133   : > { %v1378_v47 = vadd.f32 %v1374_v41, %v1341_v45  ;;  %v2218_v41 = vld [vmem:[%s2716_s3] ss:$0 sm:$0xff] }
 0x134   : > { %v1428_v43 = vpop.f32.mrf.mxu2 }
 0x135   : > { %v1402_v44 = vpop.f32.mrf.mxu1  ;;  %v1404_v56 = vadd.f32 %v1400_v38, %v1378_v47  ;;  %v2217_v38 = vld [vmem:[%s2715_s2] ss:$0 sm:$0xff] }
 0x136   : > { %v1805_v47 = vld [vmem:[%s2718_s5] sm:$0x3] }
 0x137   : > { %v1432_v0 = vadd.f32 %v1428_v43, %v1404_v56  ;;  %v1807_v49 = vperm.slane %v1805_v47, 0 }
 0x138   : > { %v1455_v46 = vpop.f32.mrf.mxu3 }
 0x139   : > { %v1459_v9 = vadd.f32 %v1455_v46, %v1432_v0 }
 0x13a   : > { %v1376_v48 = vpop.f32.mrf.mxu0 }
 0x13b   : > { %v1813_v48 = vld [vmem:[%s2719_s6] sm:$0x3] }
 0x13c   : > { %v1430_v54 = vpop.f32.mrf.mxu2  ;;  %v1815_v50 = vperm.slane %v1813_v48, 0  ;;  %v1816_v56 = vperm.slane %v1813_v48, 1 }
 0x13d   : > { %v1510_v57 = vpop.f32.mrf.mxu1  ;;  %v1808_v54 = vperm.slane %v1805_v47, 1 }
 0x140   : > { %v1457_v61 = vpop.f32.mrf.mxu3 }
 0x142   : > { %v1488_v2 = vpop.f32.mrf.mxu0 }
 0x143   : > { %v1492_v12 = vadd.f32 %v1488_v2, %v1459_v9 }
 0x144   : > { %v1537_v5 = vpop.f32.mrf.mxu2 }
 0x145   : > { %v1512_v10 = vpop.f32.mrf.mxu1  ;;  %v1514_v21 = vadd.f32 %v1510_v57, %v1492_v12  ;;  %v1823_v12 = vld [vmem:[#allocation2] sm:$0x3] }
 0x146   : > { %v1843_v10 = vlaneseq }
 0x147   : > { %v1541_v24 = vadd.f32 %v1537_v5, %v1514_v21 }
 0x148   : > { %v1570_v16 = vpop.f32.mrf.mxu3  ;;  %vm1845_vm5 = vcmp.lt.s32.totalorder %v1843_v10, 256 }
 0x149   : > { %v1574_v27 = vadd.f32 %v1570_v16, %v1541_v24 }
 0x14a   : > { %v1490_v20 = vpop.f32.mrf.mxu0 }
 0x14c   : > { %v1539_v22 = vpop.f32.mrf.mxu2 }
 0x14d   : > { %v1616_v23 = vpop.f32.mrf.mxu1 }
 0x150   : > { %v1572_v25 = vpop.f32.mrf.mxu3 }
 0x152   : > { %v1592_v26 = vpop.f32.mrf.mxu0 }
 0x153   : > { %v1596_v29 = vadd.f32 %v1592_v26, %v1574_v27 }
 0x154   : > { %v1647_v28 = vpop.f32.mrf.mxu2 }
 0x155   : > { %v1618_v30 = vpop.f32.mrf.mxu1  ;;  %v1620_v32 = vadd.f32 %v1616_v23, %v1596_v29 }
 0x157   : > { %v1651_v35 = vadd.f32 %v1647_v28, %v1620_v32 }
 0x158   : > { %v1684_v31 = vpop.f32.mrf.mxu3 }
 0x159   : > { %v1688_v37 = vadd.f32 %v1684_v31, %v1651_v35 }
 0x15a   : > { %v1594_v33 = vpop.f32.mrf.mxu0 }
 0x15c   : > { %v1649_v34 = vpop.f32.mrf.mxu2 }
 0x160   : > { %v1686_v36 = vpop.f32.mrf.mxu3 }
 0x162   : > { %v1710_v39 = vpop.f32.mrf.mxu0 }
 0x163   : > { %v1714_v40 = vadd.f32 %v1710_v39, %v1688_v37 }
 0x165   : > { %v1719_v42 = vmul.f32 %v2217_v38, %v1714_v40 }
 0x167   : > { %v1724_v43 = vadd.f32 %v2218_v41, %v1719_v42 }
 0x169   : > { %v1725_v44 = vmax.f32 %v1724_v43, 0.0 }
 0x16a   : > { %v1712_v45 = vpop.f32.mrf.mxu0 }
 0x16b   : > { %v1726_v46 = vpack.c.bf16 %v1725_v44, %v1725_v44 }
 0x16d   : > { %2147 = vmatmul.msk.bf16.vlgmr.msra.gmra.mxu1 %vm1775_vm3, %v1726_v46  ;;  %2148 = vmatmul.msk.bf16.vlgmr.msra.gmra.mxu2 %vm1775_vm3, %v1726_v46 }
 0x1ea   : > { %v1788_v51 = vpop.f32.mrf.mxu1 }
 0x1eb   : > { %v1811_v52 = vmul.f32 %v1807_v49, %v1788_v51 }
 0x1ed   : > { %v1819_v53 = vadd.f32 %v1815_v50, %v1811_v52 }
 0x1ef   : > { %v1821_v55 = vmax.f32 %v1819_v53, 0.0 }
 0x1f0   : > { %v1801_v57 = vpop.f32.mrf.mxu2 }
 0x1f1   : > { %v1824_v58 = vrot.slane %v1821_v55, 4  ;;  %v1812_v59 = vmul.f32 %v1808_v54, %v1801_v57 }
 0x1f2   : > { %v1790_v60 = vpop.f32.mrf.mxu1 }
 0x1f3   : > { %v1825_v61 = vadd.f32 %v1824_v58, %v1821_v55  ;;  %v1820_v62 = vadd.f32 %v1816_v56, %v1812_v59 }
 0x1f5   : > { %v1822_v63 = vmax.f32 %v1820_v62, 0.0  ;;  %v1826_v0 = vrot.slane %v1825_v61, 2 }
 0x1f7   : > { %v1830_v1 = vrot.slane %v1822_v63, 4  ;;  %v1827_v4 = vadd.f32 %v1826_v0, %v1825_v61 }
 0x1f8   : > { %v1803_v2 = vpop.f32.mrf.mxu2 }
 0x1f9   : > { %v1831_v3 = vadd.f32 %v1830_v1, %v1822_v63  ;;  %v1828_v7 = vrot.slane %v1827_v4, 1 }
 0x1fb   : > { %v1832_v5 = vrot.slane %v1831_v3, 2  ;;  %v1829_v11 = vadd.f32 %v1828_v7, %v1827_v4 }
 0x1fd   : > { %v1833_v6 = vadd.f32 %v1832_v5, %v1831_v3 }
 0x1ff   : > { %v1834_v8 = vrot.slane %v1833_v6, 1 }
 0x201   : > { %v1835_v9 = vadd.f32 %v1834_v8, %v1833_v6 }
 0x203   : > { %v1838_v13 = vrot.slane %v1835_v9, 7 }
 0x204   : > { %1851 = sbr.rel (%p2149_p8) target bundleno = 531 (0x213), region = 56 }
 0x205   : > { %v1840_v14 = vsel %vm1839_vm4, %v1829_v11, %v1838_v13 }
 0x206   : > { %v1842_v15 = vadd.f32 %v1840_v14, %v1823_v12 }
 0x208   : > { %1847 = vst.msk [vmem:[#allocation2] sm:$0x3] %vm1845_vm5, %v1842_v15 }
 0x20f   : > { %v1852_v16 = vld [vmem:[#allocation2] sm:$0x3] }
 0x210   : > { %v1853_v17 = vmul.f32 0.015625, %v1852_v16 }
 0x212   : > { %1854 = vst.msk [vmem:[%s2335_s13] sm:$0x3] %vm1845_vm5, %v1853_v17 }
 0x213 PF: > { %s17_s28 = sadd.s32 1, %s2257_s28   ;;  %s2721_s24 = smov %s2249_s26 }
 0x214   : > { %p14_p9 = scmp.ge.s32.totalorder %s17_s28, 18   ;;  %s2722_s25 = smov %s2253_s27 }
 0x215   : > { %s2723_s26 = smov %s2726_s29  ;;  %s2724_s27 = smov %s2730_s30 }
 0x216   :  { %16 = sbr.rel (!%p14_p9) target bundleno = 3 (0x3), region = 100 }

</bundles_post_ra>
